<compile_context>
chip_gen: v5e
topology: v5e:2x2
jax: 0.10.0
libtpu: 0.0.40
codegen_flags: <defaults>
</compile_context>

<pallas_src>
import functools

import jax
import jax.numpy as jnp
from jax.experimental import pallas as pl
from jax.experimental.pallas import tpu as pltpu


def _round_up(n, m):
    return ((n + m - 1) // m) * m


def _fused_kspace_kernel(x_ref, w_ref, b_ref, m_ref, o_ref, *,
                         NP, S, WP, CH, KD, KH, KW, layers_per_block, n_blocks):
    """Whole KspaceModel forward for one batch element, resident in VMEM.

    x_ref : (CH, NP)             activations: channels in sublanes, flattened
                                 zero-padded spatial volume (lane-padded) in lanes.
    w_ref : (L, KD*KH*CH, KW*CH) per-layer weights: rows (kd,kh,cout), cols (kw,cin).
    b_ref : (L, CH, 1)           per-layer bias.
    m_ref : (1, NP)              1.0 at interior (valid voxel) lanes.
    o_ref : (CH, NP)             output, same layout as x_ref.
    """
    pd, ph, pw = KD // 2, KH // 2, KW // 2
    mask = m_ref[...]                       # hoisted: loaded once per grid step

    def shift_lanes(v, s):
        # result[:, p] = v[:, (p + s) % NP]; s is a static Python int.
        # Circular wrap only affects non-interior lanes (re-zeroed by `mask`).
        if s == 0:
            return v
        return pltpu.roll(v, (-s) % NP, axis=1)     # XLU lane rotate

    def conv_crelu(x, li):
        w = w_ref[li]                       # (KD*KH*CH, KW*CH)  dynamic index
        b = b_ref[li]                       # (CH, 1)
        # im2col over kw only: row kw*CH + c holds x shifted by the in-row tap.
        x5 = jnp.concatenate(
            [shift_lanes(x, kw - pw) for kw in range(KW)], axis=0)   # (KW*CH, NP)
        # Single MXU matmul per layer: M = KD*KH*CH, K = KW*CH, N = NP.
        r = jnp.dot(w, x5, preferred_element_type=jnp.float32)       # (KD*KH*CH, NP)
        # Shift-add the KD*KH row blocks with their (kd, kh) lane offsets.
        acc = None
        for kd in range(KD):
            for kh in range(KH):
                row0 = (kd * KH + kh) * CH
                part = shift_lanes(r[row0:row0 + CH, :],
                                   (kd - pd) * S + (kh - ph) * WP)
                acc = part if acc is None else acc + part
        y = jnp.maximum(acc + b, 0.0)       # bias + CReLU
        return y * mask                     # re-zero the padding halo

    h0 = x_ref[...].astype(jnp.float32)

    def block_body(blk, h):
        def layer_body(l, y):
            return conv_crelu(y, blk * layers_per_block + l)
        y = jax.lax.fori_loop(0, layers_per_block, layer_body, h)
        return y + h                        # residual add

    h = jax.lax.fori_loop(0, n_blocks, block_body, h0)
    o_ref[...] = h.astype(o_ref.dtype)


def kspace_model_forward(x, params):
    """x: (B, D, H, W, 2*C) real layout ([re_0..re_{C-1}, im_0..im_{C-1}]).

    params: {"block1": [(w, b) x3], "block2": [(w, b) x3]} with w the folded
    real-conv weight (KD,KH,KW, 2*cin_c, 2*cout_c) and b the folded bias.
    Returns an array of the same shape as x.
    """
    B, D, H, W, C2 = x.shape
    layers = list(params["block1"]) + list(params["block2"])
    KD, KH, KW = layers[0][0].shape[:3]
    pd, ph, pw = KD // 2, KH // 2, KW // 2
    CH = _round_up(max(max(w.shape[3], w.shape[4]) for w, _ in layers), 8)
    Dp, Hp, Wp = D + KD - 1, H + KH - 1, W + KW - 1
    S, Np = Hp * Wp, Dp * Hp * Wp
    NP = _round_up(Np, 128)

    # Circular-roll safety (see kernel): interior-feeding reads never wrap.
    assert Np <= NP
    assert pd * S + ph * Wp + pw < Np

    # ---- one-time layout plumbing (plain JAX, outside the hot kernel) ------
    xt = jnp.moveaxis(x, -1, 1)                                  # (B, 2C, D, H, W)
    xt = jnp.pad(xt, ((0, 0), (0, CH - C2), (pd, pd), (ph, ph), (pw, pw)))
    x_flat = jnp.pad(xt.reshape(B, CH, Np), ((0, 0), (0, 0), (0, NP - Np)))

    mask = jnp.zeros((Dp, Hp, Wp), jnp.float32)
    mask = mask.at[pd:pd + D, ph:ph + H, pw:pw + W].set(1.0)
    mask = jnp.pad(mask.reshape(1, Np), ((0, 0), (0, NP - Np)))

    # Weights -> (L, KD*KH*CH, KW*CH): rows ordered (kd, kh, cout), cols
    # (kw, cin), matching the in-kernel kw-only im2col + (kd,kh) shift-add.
    w_stack, b_stack = [], []
    for (w, b) in layers:
        cin, cout = w.shape[3], w.shape[4]
        wpd = jnp.zeros((KD, KH, KW, CH, CH), jnp.float32)
        wpd = wpd.at[..., :cin, :cout].set(w)
        w_stack.append(
            jnp.transpose(wpd, (0, 1, 4, 2, 3)).reshape(KD * KH * CH, KW * CH))
        b_stack.append(
            jnp.zeros((CH,), jnp.float32).at[:cout].set(b).reshape(CH, 1))
    w_stack = jnp.stack(w_stack)            # (L, KD*KH*CH, KW*CH)
    b_stack = jnp.stack(b_stack)            # (L, CH, 1)

    kernel = functools.partial(
        _fused_kspace_kernel, NP=NP, S=S, WP=Wp, CH=CH, KD=KD, KH=KH, KW=KW,
        layers_per_block=len(params["block1"]), n_blocks=2)

    out = pl.pallas_call(
        kernel,
        out_shape=jax.ShapeDtypeStruct((B, CH, NP), jnp.float32),
        grid_spec=pltpu.PrefetchScalarGridSpec(
            num_scalar_prefetch=0,
            grid=(B,),
            in_specs=[
                pl.BlockSpec((None, CH, NP), lambda bi: (bi, 0, 0)),
                pl.BlockSpec(w_stack.shape, lambda bi: (0, 0, 0)),
                pl.BlockSpec(b_stack.shape, lambda bi: (0, 0, 0)),
                pl.BlockSpec((1, NP), lambda bi: (0, 0)),
            ],
            out_specs=pl.BlockSpec((None, CH, NP), lambda bi: (bi, 0, 0)),
        ),
        compiler_params=pltpu.CompilerParams(
            dimension_semantics=("parallel",),      # batch on both v7x TCs
            vmem_limit_bytes=32 * 1024 * 1024),
    )(x_flat, w_stack, b_stack, mask)

    # Unpack (B, CH, NP) -> (B, D, H, W, 2C)
    out = out[:, :C2, :Np].reshape(B, C2, Dp, Hp, Wp)
    out = out[:, :, pd:pd + D, ph:ph + H, pw:pw + W]
    return jnp.moveaxis(out, 1, -1)


def make_complex_conv_params(key, cin_c, cout_c, KD, KH, KW):
    """Deterministic init of a ComplexConv3d, folded into one real conv.

    ComplexConv3d is two real convs (conv_r with bias b_r, conv_i with b_i):
      y_r = conv_r(x_r) - conv_i(x_i) = W_r*x_r - W_i*x_i + (b_r - b_i)
      y_i = conv_i(x_r) + conv_r(x_i) = W_i*x_r + W_r*x_i + (b_r + b_i)
    """
    k1, k2, k3, k4 = jax.random.split(key, 4)
    fan_in = cin_c * KD * KH * KW
    scale = 1.0 / jnp.sqrt(jnp.float32(fan_in))
    wr = jax.random.uniform(k1, (KD, KH, KW, cin_c, cout_c), jnp.float32, -scale, scale)
    wi = jax.random.uniform(k2, (KD, KH, KW, cin_c, cout_c), jnp.float32, -scale, scale)
    br = jax.random.uniform(k3, (cout_c,), jnp.float32, -scale, scale)
    bi = jax.random.uniform(k4, (cout_c,), jnp.float32, -scale, scale)
    # Combined real conv on [x_r; x_i] channels -> [y_r; y_i] channels.
    top = jnp.concatenate([wr, wi], axis=-1)    # x_r -> (y_r via W_r, y_i via W_i)
    bot = jnp.concatenate([-wi, wr], axis=-1)   # x_i -> (y_r via -W_i, y_i via W_r)
    w = jnp.concatenate([top, bot], axis=-2)    # (KD,KH,KW, 2*cin_c, 2*cout_c)
    b = jnp.concatenate([br - bi, br + bi])     # (2*cout_c,)
    return w, b


# ---- pure-JAX reference (for correctness check only) ------------------------
def _conv3d_ref(x, w, b, relu):
    y = jax.lax.conv_general_dilated(
        x, w, window_strides=(1, 1, 1), padding="SAME",
        dimension_numbers=("NDHWC", "DHWIO", "NDHWC"),
        precision=jax.lax.Precision.HIGHEST)
    y = y + b
    return jnp.maximum(y, 0.0) if relu else y


def _model_ref(x, params):
    h = x
    for blk in ("block1", "block2"):
        y = h
        for (w, b) in params[blk]:
            y = _conv3d_ref(y, w, b, True)
        h = y + h
    return h


if __name__ == "__main__":
    key = jax.random.PRNGKey(0)
    B, C, D, H, W = 2, 4, 4, 8, 8          # C == num_coils (complex channels)
    KD, KH, KW = 3, 5, 5
    kx, kp = jax.random.split(key)

    # PyTorch-style input: complex (B, C, D, H, W) carried as (..., 2) = (re, im)
    x_torch = jax.random.normal(kx, (B, C, D, H, W, 2), jnp.float32)

    # Convert to model layout (B, D, H, W, 2C): [real channels, imag channels]
    xr, xi = x_torch[..., 0], x_torch[..., 1]          # (B, C, D, H, W)
    x = jnp.concatenate([xr, xi], axis=1)              # (B, 2C, D, H, W)
    x = jnp.transpose(x, (0, 2, 3, 4, 1))              # (B, D, H, W, 2C)

    layer_dims = [(C, 2 * C), (2 * C, 2 * C), (2 * C, C)]
    keys = jax.random.split(kp, 6)
    params = {"block1": [], "block2": []}
    for i, (ci, co) in enumerate(layer_dims):
        params["block1"].append(make_complex_conv_params(keys[i], ci, co, KD, KH, KW))
    for i, (ci, co) in enumerate(layer_dims):
        params["block2"].append(make_complex_conv_params(keys[3 + i], ci, co, KD, KH, KW))

    fwd = jax.jit(kspace_model_forward)
    out = jax.block_until_ready(fwd(x, params))

    ref = _model_ref(x, params)
    max_err = float(jnp.max(jnp.abs(out - ref)))
    assert jnp.allclose(out, ref, atol=5e-3, rtol=5e-3), f"max_err={max_err}"

    print("KERNEL_OK")
</pallas_src>

<mosaic_0001>
module attributes {stable_mosaic.version = 11 : i64} {
  func.func @_fused_kspace_kernel(%arg0: i32, %arg1: memref<1x16x896xf32, #tpu.memory_space<vmem>>, %arg2: memref<6x240x80xf32, #tpu.memory_space<vmem>>, %arg3: memref<6x16x1xf32, #tpu.memory_space<vmem>>, %arg4: memref<1x896xf32, #tpu.memory_space<vmem>>, %arg5: memref<1x16x896xf32, #tpu.memory_space<vmem>>) attributes {dimension_semantics = [#tpu.dimension_semantics<parallel>], iteration_bounds = array<i64: 2>, scalar_prefetch = 0 : i64, scratch_operands = 0 : i64, tpu.core_type = #tpu.core_type<tc>, window_params = [{transform_indices = @transform_0, window_bounds = array<i64: 1, 16, 896>}, {pipeline_mode = #tpu.pipeline_mode<synchronous>, transform_indices = @transform_1, window_bounds = array<i64: 6, 240, 80>}, {pipeline_mode = #tpu.pipeline_mode<synchronous>, transform_indices = @transform_2, window_bounds = array<i64: 6, 16, 1>}, {pipeline_mode = #tpu.pipeline_mode<synchronous>, transform_indices = @transform_3, window_bounds = array<i64: 1, 896>}, {transform_indices = @transform_4, window_bounds = array<i64: 1, 16, 896>}]} {
    %c0 = arith.constant 0 : index
    %c0_0 = arith.constant 0 : index
    %0 = vector.load %arg4[%c0, %c0_0] : memref<1x896xf32, #tpu.memory_space<vmem>>, vector<1x896xf32>
    %c0_1 = arith.constant 0 : index
    %c0_2 = arith.constant 0 : index
    %c0_3 = arith.constant 0 : index
    %1 = vector.load %arg1[%c0_1, %c0_2, %c0_3] : memref<1x16x896xf32, #tpu.memory_space<vmem>>, vector<1x16x896xf32>
    %2 = vector.shape_cast %1 : vector<1x16x896xf32> to vector<16x896xf32>
    %c0_i32 = arith.constant 0 : i32
    %c2_i32 = arith.constant 2 : i32
    %3 = arith.addi %c0_i32, %c2_i32 : i32
    %c1_i32 = arith.constant 1 : i32
    %4 = scf.for %arg6 = %c0_i32 to %3 step %c1_i32 iter_args(%arg7 = %2) -> (vector<16x896xf32>)  : i32 {
      %c0_i32_8 = arith.constant 0 : i32
      %c3_i32 = arith.constant 3 : i32
      %8 = arith.addi %c0_i32_8, %c3_i32 : i32
      %c1_i32_9 = arith.constant 1 : i32
      %9 = scf.for %arg8 = %c0_i32_8 to %8 step %c1_i32_9 iter_args(%arg9 = %arg7) -> (vector<16x896xf32>)  : i32 {
        %c3_i32_11 = arith.constant 3 : i32
        %11 = arith.muli %arg6, %c3_i32_11 : i32
        %12 = arith.addi %11, %arg8 : i32
        %13 = arith.index_cast %12 : i32 to index
        %c0_12 = arith.constant 0 : index
        %c0_13 = arith.constant 0 : index
        %14 = vector.load %arg2[%13, %c0_12, %c0_13] : memref<6x240x80xf32, #tpu.memory_space<vmem>>, vector<1x240x80xf32>
        %15 = vector.shape_cast %14 : vector<1x240x80xf32> to vector<240x80xf32>
        %16 = arith.index_cast %12 : i32 to index
        %c0_14 = arith.constant 0 : index
        %c0_15 = arith.constant 0 : index
        %17 = vector.load %arg3[%16, %c0_14, %c0_15] : memref<6x16x1xf32, #tpu.memory_space<vmem>>, vector<1x16x1xf32>
        %18 = vector.shape_cast %17 : vector<1x16x1xf32> to vector<16x1xf32>
        %c2_i32_16 = arith.constant 2 : i32
        %19 = tpu.dynamic_rotate %arg9 by %c2_i32_16 dim 1 : vector<16x896xf32>, i32 -> vector<16x896xf32>
        %c1_i32_17 = arith.constant 1 : i32
        %20 = tpu.dynamic_rotate %arg9 by %c1_i32_17 dim 1 : vector<16x896xf32>, i32 -> vector<16x896xf32>
        %c895_i32 = arith.constant 895 : i32
        %21 = tpu.dynamic_rotate %arg9 by %c895_i32 dim 1 : vector<16x896xf32>, i32 -> vector<16x896xf32>
        %c894_i32 = arith.constant 894 : i32
        %22 = tpu.dynamic_rotate %arg9 by %c894_i32 dim 1 : vector<16x896xf32>, i32 -> vector<16x896xf32>
        %23 = tpu.concatenate %19, %20, %arg9, %21, %22 in 0 : vector<16x896xf32>, vector<16x896xf32>, vector<16x896xf32>, vector<16x896xf32>, vector<16x896xf32> -> vector<80x896xf32>
        %cst = arith.constant dense<0.000000e+00> : vector<240x896xf32>
        %24 = tpu.matmul %15, %23, %cst {dimension_numbers = #tpu.dot_dimension_numbers<[1], [0], [0], [1], [0, 0, 1, 1], [], []>} : vector<240x80xf32>, vector<80x896xf32>, vector<240x896xf32> -> vector<240x896xf32>
        %25 = vector.extract_strided_slice %24 {offsets = [0, 0], sizes = [16, 896], strides = [1, 1]} : vector<240x896xf32> to vector<16x896xf32>
        %c168_i32 = arith.constant 168 : i32
        %26 = tpu.dynamic_rotate %25 by %c168_i32 dim 1 : vector<16x896xf32>, i32 -> vector<16x896xf32>
        %27 = vector.extract_strided_slice %24 {offsets = [16, 0], sizes = [16, 896], strides = [1, 1]} : vector<240x896xf32> to vector<16x896xf32>
        %c156_i32 = arith.constant 156 : i32
        %28 = tpu.dynamic_rotate %27 by %c156_i32 dim 1 : vector<16x896xf32>, i32 -> vector<16x896xf32>
        %29 = arith.addf %26, %28 : vector<16x896xf32>
        %30 = vector.extract_strided_slice %24 {offsets = [32, 0], sizes = [16, 896], strides = [1, 1]} : vector<240x896xf32> to vector<16x896xf32>
        %c144_i32 = arith.constant 144 : i32
        %31 = tpu.dynamic_rotate %30 by %c144_i32 dim 1 : vector<16x896xf32>, i32 -> vector<16x896xf32>
        %32 = arith.addf %29, %31 : vector<16x896xf32>
        %33 = vector.extract_strided_slice %24 {offsets = [48, 0], sizes = [16, 896], strides = [1, 1]} : vector<240x896xf32> to vector<16x896xf32>
        %c132_i32 = arith.constant 132 : i32
        %34 = tpu.dynamic_rotate %33 by %c132_i32 dim 1 : vector<16x896xf32>, i32 -> vector<16x896xf32>
        %35 = arith.addf %32, %34 : vector<16x896xf32>
        %36 = vector.extract_strided_slice %24 {offsets = [64, 0], sizes = [16, 896], strides = [1, 1]} : vector<240x896xf32> to vector<16x896xf32>
        %c120_i32 = arith.constant 120 : i32
        %37 = tpu.dynamic_rotate %36 by %c120_i32 dim 1 : vector<16x896xf32>, i32 -> vector<16x896xf32>
        %38 = arith.addf %35, %37 : vector<16x896xf32>
        %39 = vector.extract_strided_slice %24 {offsets = [80, 0], sizes = [16, 896], strides = [1, 1]} : vector<240x896xf32> to vector<16x896xf32>
        %c24_i32 = arith.constant 24 : i32
        %40 = tpu.dynamic_rotate %39 by %c24_i32 dim 1 : vector<16x896xf32>, i32 -> vector<16x896xf32>
        %41 = arith.addf %38, %40 : vector<16x896xf32>
        %42 = vector.extract_strided_slice %24 {offsets = [96, 0], sizes = [16, 896], strides = [1, 1]} : vector<240x896xf32> to vector<16x896xf32>
        %c12_i32 = arith.constant 12 : i32
        %43 = tpu.dynamic_rotate %42 by %c12_i32 dim 1 : vector<16x896xf32>, i32 -> vector<16x896xf32>
        %44 = arith.addf %41, %43 : vector<16x896xf32>
        %45 = vector.extract_strided_slice %24 {offsets = [112, 0], sizes = [16, 896], strides = [1, 1]} : vector<240x896xf32> to vector<16x896xf32>
        %46 = arith.addf %44, %45 : vector<16x896xf32>
        %47 = vector.extract_strided_slice %24 {offsets = [128, 0], sizes = [16, 896], strides = [1, 1]} : vector<240x896xf32> to vector<16x896xf32>
        %c884_i32 = arith.constant 884 : i32
        %48 = tpu.dynamic_rotate %47 by %c884_i32 dim 1 : vector<16x896xf32>, i32 -> vector<16x896xf32>
        %49 = arith.addf %46, %48 : vector<16x896xf32>
        %50 = vector.extract_strided_slice %24 {offsets = [144, 0], sizes = [16, 896], strides = [1, 1]} : vector<240x896xf32> to vector<16x896xf32>
        %c872_i32 = arith.constant 872 : i32
        %51 = tpu.dynamic_rotate %50 by %c872_i32 dim 1 : vector<16x896xf32>, i32 -> vector<16x896xf32>
        %52 = arith.addf %49, %51 : vector<16x896xf32>
        %53 = vector.extract_strided_slice %24 {offsets = [160, 0], sizes = [16, 896], strides = [1, 1]} : vector<240x896xf32> to vector<16x896xf32>
        %c776_i32 = arith.constant 776 : i32
        %54 = tpu.dynamic_rotate %53 by %c776_i32 dim 1 : vector<16x896xf32>, i32 -> vector<16x896xf32>
        %55 = arith.addf %52, %54 : vector<16x896xf32>
        %56 = vector.extract_strided_slice %24 {offsets = [176, 0], sizes = [16, 896], strides = [1, 1]} : vector<240x896xf32> to vector<16x896xf32>
        %c764_i32 = arith.constant 764 : i32
        %57 = tpu.dynamic_rotate %56 by %c764_i32 dim 1 : vector<16x896xf32>, i32 -> vector<16x896xf32>
        %58 = arith.addf %55, %57 : vector<16x896xf32>
        %59 = vector.extract_strided_slice %24 {offsets = [192, 0], sizes = [16, 896], strides = [1, 1]} : vector<240x896xf32> to vector<16x896xf32>
        %c752_i32 = arith.constant 752 : i32
        %60 = tpu.dynamic_rotate %59 by %c752_i32 dim 1 : vector<16x896xf32>, i32 -> vector<16x896xf32>
        %61 = arith.addf %58, %60 : vector<16x896xf32>
        %62 = vector.extract_strided_slice %24 {offsets = [208, 0], sizes = [16, 896], strides = [1, 1]} : vector<240x896xf32> to vector<16x896xf32>
        %c740_i32 = arith.constant 740 : i32
        %63 = tpu.dynamic_rotate %62 by %c740_i32 dim 1 : vector<16x896xf32>, i32 -> vector<16x896xf32>
        %64 = arith.addf %61, %63 : vector<16x896xf32>
        %65 = vector.extract_strided_slice %24 {offsets = [224, 0], sizes = [16, 896], strides = [1, 1]} : vector<240x896xf32> to vector<16x896xf32>
        %c728_i32 = arith.constant 728 : i32
        %66 = tpu.dynamic_rotate %65 by %c728_i32 dim 1 : vector<16x896xf32>, i32 -> vector<16x896xf32>
        %67 = arith.addf %64, %66 : vector<16x896xf32>
        %68 = vector.broadcast %18 : vector<16x1xf32> to vector<16x896xf32>
        %69 = arith.addf %67, %68 : vector<16x896xf32>
        %cst_18 = arith.constant 0.000000e+00 : f32
        %70 = vector.broadcast %cst_18 : f32 to vector<16x896xf32>
        %71 = arith.maximumf %69, %70 : vector<16x896xf32>
        %72 = vector.broadcast %0 : vector<1x896xf32> to vector<16x896xf32>
        %73 = arith.mulf %71, %72 : vector<16x896xf32>
        scf.yield %73 : vector<16x896xf32>
      }
      %c3_i32_10 = arith.constant 3 : i32
      %10 = arith.addf %9, %arg7 : vector<16x896xf32>
      scf.yield %10 : vector<16x896xf32>
    }
    %c2_i32_4 = arith.constant 2 : i32
    %c0_5 = arith.constant 0 : index
    %c0_6 = arith.constant 0 : index
    %c0_7 = arith.constant 0 : index
    %5 = vector.load %arg5[%c0_5, %c0_6, %c0_7] : memref<1x16x896xf32, #tpu.memory_space<vmem>>, vector<1x16x896xf32>
    %6 = vector.shape_cast %5 : vector<1x16x896xf32> to vector<16x896xf32>
    %7 = vector.shape_cast %4 : vector<16x896xf32> to vector<1x16x896xf32>
    tpu.vector_store %arg5[%c0_5, %c0_6, %c0_7], %7 {strides = array<i32>} : memref<1x16x896xf32, #tpu.memory_space<vmem>>, vector<1x16x896xf32>,
    return
  }
  func.func @transform_0(%arg0: i32) -> (i32, i32, i32) {
    %c0_i32 = arith.constant 0 : i32
    %c0_i32_0 = arith.constant 0 : i32
    %c0_i32_1 = arith.constant 0 : i32
    return %arg0, %c0_i32, %c0_i32_0 : i32, i32, i32
  }
  func.func @transform_1(%arg0: i32) -> (i32, i32, i32) {
    %c0_i32 = arith.constant 0 : i32
    %c0_i32_0 = arith.constant 0 : i32
    %c0_i32_1 = arith.constant 0 : i32
    %c0_i32_2 = arith.constant 0 : i32
    return %c0_i32, %c0_i32_0, %c0_i32_1 : i32, i32, i32
  }
  func.func @transform_2(%arg0: i32) -> (i32, i32, i32) {
    %c0_i32 = arith.constant 0 : i32
    %c0_i32_0 = arith.constant 0 : i32
    %c0_i32_1 = arith.constant 0 : i32
    %c0_i32_2 = arith.constant 0 : i32
    return %c0_i32, %c0_i32_0, %c0_i32_1 : i32, i32, i32
  }
  func.func @transform_3(%arg0: i32) -> (i32, i32) {
    %c0_i32 = arith.constant 0 : i32
    %c0_i32_0 = arith.constant 0 : i32
    %c0_i32_1 = arith.constant 0 : i32
    return %c0_i32, %c0_i32_0 : i32, i32
  }
  func.func @transform_4(%arg0: i32) -> (i32, i32, i32) {
    %c0_i32 = arith.constant 0 : i32
    %c0_i32_0 = arith.constant 0 : i32
    %c0_i32_1 = arith.constant 0 : i32
    return %arg0, %c0_i32, %c0_i32_0 : i32, i32, i32
  }
}

</mosaic_0001>

<bundles_post_ra>
// kernel: kspace_model_forward.1
= control target key start
LH: loop header
LB: loop body
LE: loop exit
PB: predicated region body
PF: predicated region fallthrough
CT: control target
= control target key end

     0   :  { %s3314_s15 = smov 0   ;;  %s5825_s0 = inlined_call_operand.vmem [shape: f32[2,16,896], index: 0, kind: input, shape index: {}]   ;;  %s5826_s1 = inlined_call_operand.vmem [shape: f32[6,240,80], index: 1, kind: input, shape index: {}]   ;;  %s5827_s2 = inlined_call_operand.vmem [shape: f32[6,16,1], index: 2, kind: input, shape index: {}]   ;;  %s5828_s3 = inlined_call_operand.vmem [shape: f32[1,896], index: 3, kind: input, shape index: {}]   ;;  %s5829_s4 = inlined_call_operand.vmem [shape: f32[2,16,896], index: 4, kind: output, shape index: {}]  }
   0x1 LB: > { %s2355_s16 = sadd.s32 4294967295, %s3148_s15   ;;  %p2359_p0 = scmp.ge.s32.totalorder %s3148_s15, 1  ;;  %s3148_s15 = sphi %s3314_s15, %s14_s15  }
   0x2   : > { %p162_p1 = scmp.lt.s32.totalorder %s3148_s15, 3 }
   0x4   : > { %p163_p2 = pnand %p2359_p0, %p162_p1 }
   0x6   : > { %166 = sbr.rel (%p163_p2) target bundleno = 1024 (0x400), region = 36 }
   0xb   : > { %p188_p3 = scmp.lt.s32.totalorder %s2355_s16, 1  ;;  %v3325_v0 = vld [vmem:[%s5828_s3] sm:$0xff]  ;;  %s3363_s26 = smov 0  }
   0xc   : > { %5917 = vst [vmem:[#allocation2_spill] sm:$0xff] %v3325_v0 }
   0xd   : > { %s6170_s16 = smov (!%p188_p3, %s2355_s16), 1 }
   0xe   : > { %s2605_s19 = smul.u32 112, %s6170_s16 }
  0x10   : > { %s192_s22 = scalar_lea.vmem %s5825_s0, %s2605_s19  ;;  %s3333_s25 = scalar_lea.vmem %s5829_s4, %s2605_s19 }
  0x11   : > { %v199_v1 = vld [vmem:[%s192_s22] sm:$0xff]   ;;  %v200_v2 = vld [vmem:[%s192_s22 + $0x8] sm:$0xff]   ;;  %v201_v3 = vld [vmem:[%s192_s22 + $0x10] sm:$0xff]  }
  0x12   : > { %v202_v4 = vld [vmem:[%s192_s22 + $0x18] sm:$0xff]   ;;  %v203_v5 = vld [vmem:[%s192_s22 + $0x20] sm:$0xff]   ;;  %v204_v6 = vld [vmem:[%s192_s22 + $0x28] sm:$0xff]  }
  0x13   : > { %v205_v7 = vld [vmem:[%s192_s22 + $0x30] sm:$0xff]   ;;  %v206_v8 = vld [vmem:[%s192_s22 + $0x38] sm:$0xff]   ;;  %v207_v9 = vld [vmem:[%s192_s22 + $0x40] sm:$0xff]  }
  0x14   : > { %v208_v10 = vld [vmem:[%s192_s22 + $0x48] sm:$0xff]   ;;  %v209_v11 = vld [vmem:[%s192_s22 + $0x50] sm:$0xff]   ;;  %v210_v12 = vld [vmem:[%s192_s22 + $0x58] sm:$0xff]  }
  0x15   : > { %v211_v13 = vld [vmem:[%s192_s22 + $0x60] sm:$0xff]   ;;  %v212_v14 = vld [vmem:[%s192_s22 + $0x68] sm:$0xff]  }
  0x16 LB: >> { %5918 = vst [vmem:[#allocation3_spill] sm:$0xff] %v3152_v14  ;;  %v5932_v15 = vmov %v3152_v14  ;;  %v5933_v16 = vmov %v3156_v13  ;;  %v5934_v17 = vmov %v3160_v12  ;;  %v5935_v18 = vmov %v3164_v11  ;;  %s3452_s27 = smov 0   ;;  %s3208_s26 = sphi %s3363_s26, %s218_s26   ;;  %v3204_v1 = vphi %v199_v1, %v6168_v1   ;;  %v3200_v2 = vphi %v200_v2, %v6167_v2   ;;  %v3196_v3 = vphi %v201_v3, %v6166_v3   ;;  %v3192_v4 = vphi %v202_v4, %v6165_v4   ;;  %v3188_v5 = vphi %v203_v5, %v6164_v5   ;;  %v3184_v6 = vphi %v204_v6, %v6163_v6   ;;  %v3180_v7 = vphi %v205_v7, %v6162_v7   ;;  %v3176_v8 = vphi %v206_v8, %v6161_v8   ;;  %v3172_v9 = vphi %v207_v9, %v6160_v9   ;;  %v3168_v10 = vphi %v208_v10, %v6159_v10   ;;  %v3164_v11 = vphi %v209_v11, %v6158_v11   ;;  %v3160_v12 = vphi %v210_v12, %v6157_v12   ;;  %v3156_v13 = vphi %v211_v13, %v6156_v13   ;;  %v3152_v14 = vphi %v212_v14, %v6155_v14  }
  0x17   : >> { %5919 = vst [vmem:[#allocation4_spill] sm:$0xff] %v3156_v13  ;;  %v5936_v19 = vmov %v3168_v10  ;;  %v5937_v20 = vmov %v3172_v9  ;;  %v5938_v21 = vmov %v3176_v8  ;;  %v5939_v22 = vmov %v3180_v7 }
  0x18   : >> { %5920 = vst [vmem:[#allocation5_spill] sm:$0xff] %v3160_v12  ;;  %v5940_v23 = vmov %v3184_v6  ;;  %v5941_v24 = vmov %v3188_v5  ;;  %v5942_v25 = vmov %v3192_v4  ;;  %v5943_v26 = vmov %v3196_v3 }
  0x19   : >> { %5921 = vst [vmem:[#allocation6_spill] sm:$0xff] %v3164_v11  ;;  %v5944_v27 = vmov %v3200_v2  ;;  %v5945_v28 = vmov %v3204_v1 }
  0x1a   : >> { %5922 = vst [vmem:[#allocation7_spill] sm:$0xff] %v3168_v10 }
  0x1b   : >> { %5923 = vst [vmem:[#allocation8_spill] sm:$0xff] %v3172_v9 }
  0x1c   : >> { %5924 = vst [vmem:[#allocation9_spill] sm:$0xff] %v3176_v8 }
  0x1d   : >> { %5925 = vst [vmem:[#allocation10_spill] sm:$0xff] %v3180_v7 }
  0x1e   : >> { %5926 = vst [vmem:[#allocation11_spill] sm:$0xff] %v3184_v6 }
  0x1f   : >> { %5927 = vst [vmem:[#allocation12_spill] sm:$0xff] %v3188_v5 }
  0x20   : >> { %5928 = vst [vmem:[#allocation13_spill] sm:$0xff] %v3192_v4 }
  0x21   : >> { %5929 = vst [vmem:[#allocation14_spill] sm:$0xff] %v3196_v3 }
  0x22   : >> { %5930 = vst [vmem:[#allocation15_spill] sm:$0xff] %v3200_v2 }
  0x23   : >> { %5931 = vst [vmem:[#allocation16_spill] sm:$0xff] %v3204_v1 }
  0x24 LB: >>> { %v2873_v29 = vpack.i.bf16 %v3236_v21, %v3264_v28  ;;  %v2883_v30 = vpack.i.bf16 %v3228_v19, %v3256_v26  ;;  %s3270_s28 = smov 2   ;;  %v2878_v31 = vpack.i.bf16 %v3232_v20, %v3260_v27  ;;  %v2888_v32 = vpack.i.bf16 %v3224_v18, %v3252_v25  ;;  %s3271_s29 = smov 1   ;;  %s3268_s27 = sphi %s3452_s27, %s238_s27   ;;  %v3264_v28 = vphi %v5945_v28, %v6139_v28   ;;  %v3260_v27 = vphi %v5944_v27, %v6138_v27   ;;  %v3256_v26 = vphi %v5943_v26, %v6137_v26   ;;  %v3252_v25 = vphi %v5942_v25, %v6136_v25   ;;  %v3248_v24 = vphi %v5941_v24, %v6135_v24   ;;  %v3244_v23 = vphi %v5940_v23, %v6134_v23   ;;  %v3240_v22 = vphi %v5939_v22, %v6133_v22   ;;  %v3236_v21 = vphi %v5938_v21, %v6132_v21   ;;  %v3232_v20 = vphi %v5937_v20, %v6131_v20   ;;  %v3228_v19 = vphi %v5936_v19, %v6130_v19   ;;  %v3224_v18 = vphi %v5935_v18, %v6129_v18   ;;  %v3220_v17 = vphi %v5934_v17, %v6128_v17   ;;  %v3216_v16 = vphi %v5933_v16, %v6127_v16   ;;  %v3212_v15 = vphi %v5932_v15, %v6126_v15  }
  0x25   : >>> { %v2893_v33 = vpack.i.bf16 %v3220_v17, %v3248_v24  ;;  %v2898_v34 = vpack.i.bf16 %v3216_v16, %v3244_v23  ;;  %v2903_v35 = vpack.i.bf16 %v3212_v15, %v3240_v22  ;;  %s3272_s30 = smov 127   ;;  %v2973_v36 = vpack.i.bf16 %v3224_v18, %v3228_v19  ;;  %s3273_s5 = smov 126  }
  0x26   : >>> { %2874 = vrot.lane.b32.xlu0 %v2873_v29, %s3270_s28  ;;  %2884 = vrot.lane.b32.xlu1 %v2883_v30, %s3270_s28  ;;  %v2983_v37 = vpack.i.bf16 %v3232_v20, %v3236_v21  ;;  %v2978_v38 = vpack.i.bf16 %v3252_v25, %v3256_v26  ;;  %v2988_v39 = vpack.i.bf16 %v3260_v27, %v3264_v28  ;;  %v319_v45 = vlaneseq  ;;  %s253_s6 = smul.u32 3, %s3208_s26  ;;  %s3274_s12 = smov 40  }
  0x27   : >>> { %2894 = vrot.lane.b32.xlu2 %v2893_v33, %s3270_s28  ;;  %vm465_vm4 = vcmask 654336   ;;  %s3275_s13 = smov 124   ;;  %s3276_s14 = smov 112  }
  0x28   : >>> { %v3533_v47 = vand.u32 127, %v319_v45  ;;  %s3694_s7 = sadd.s32 %s3268_s27, %s253_s6  ;;  %s3277_s16 = smov 28  }
  0x29   : >>> { %s255_s8 = smul.u32 240, %s3694_s7  ;;  %s3278_s17 = smov 100  }
  0x2a   : >>> { %vm321_vm0 = vcmp.lt.s32.totalorder %v3533_v47, 2  ;;  %vm364_vm1 = vcmp.lt.s32.totalorder %v3533_v47, 1  ;;  %vm450_vm2 = vcmp.lt.s32.totalorder %v3533_v47, 126  ;;  %vm407_vm3 = vcmp.lt.s32.totalorder %v3533_v47, 127  ;;  %s3279_s18 = smov 16   ;;  %s3280_s19 = smov 88  }
  0x2b   : >>> { %s3757_s11 = scalar_lea.vmem %s5826_s1, %s255_s8  ;;  %s3281_s20 = smov 4   ;;  %vm1333_vm5 = vcmp.lt.s32.totalorder %v3533_v47, 40  ;;  %vm1376_vm6 = vcmp.lt.s32.totalorder %v3533_v47, 28  ;;  %vm1433_vm7 = vcmp.lt.s32.totalorder %v3533_v47, 16  ;;  %vm1490_vm8 = vcmp.lt.s32.totalorder %v3533_v47, 4 }
  0x2c   : >>> { %s3282_s21 = smov 120   ;;  %s3283_s22 = smov 24   ;;  %vm1547_vm9 = vcmp.lt.s32.totalorder %v3533_v47, 120  ;;  %vm1604_vm10 = vcmp.lt.s32.totalorder %v3533_v47, 24  ;;  %vm1661_vm11 = vcmp.lt.s32.totalorder %v3533_v47, 12  ;;  %vm1732_vm12 = vcmp.lt.s32.totalorder %v3533_v47, 116 }
  0x2d   : >>> { %s3284_s23 = smov 12   ;;  %s3285_s24 = smov 116   ;;  %vm1789_vm13 = vcmp.lt.s32.totalorder %v3533_v47, 104  ;;  %vm1846_vm14 = vcmp.lt.s32.totalorder %v3533_v47, 8  ;;  %vm1960_vm15 = vcmp.lt.s32.totalorder %v3533_v47, 112 }
  0x2e   : >>> { %2879 = vrot.lane.b32.xlu0 %v2878_v31, %s3270_s28  ;;  %2889 = vrot.lane.b32.xlu1 %v2888_v32, %s3270_s28  ;;  %s238_s27 = sadd.s32 1, %s3268_s27  }
  0x2f   : >>> { %2899 = vrot.lane.b32.xlu2 %v2898_v34, %s3270_s28  ;;  %p5711_p4 = scmp.ge.s32.totalorder %s238_s27, 3  }
  0x30   : >> { %s218_s26 = sadd.s32 (%p5711_p4), 1, %s3208_s26  }
  0x31   : >> { %p5772_p5 = scmp.ge.s32.totalorder (%p5711_p4), %s218_s26, 2  }
  0x36   : >>> { %2909 = vrot.lane.b32.xlu1 %v2873_v29, %s3271_s29  ;;  %2904 = vrot.lane.b32.xlu0 %v2903_v35, %s3270_s28  ;;  %s3286_s28 = smov 104  }
  0x37   : >>> { %2914 = vrot.lane.b32.xlu2 %v2878_v31, %s3271_s29 }
  0x3e   : >>> { %2924 = vrot.lane.b32.xlu1 %v2888_v32, %s3271_s29  ;;  %2919 = vrot.lane.b32.xlu0 %v2883_v30, %s3271_s29 }
  0x3f   : >>> { %2929 = vrot.lane.b32.xlu2 %v2893_v33, %s3271_s29 }
  0x46   : >>> { %2939 = vrot.lane.b32.xlu1 %v2903_v35, %s3271_s29  ;;  %2934 = vrot.lane.b32.xlu0 %v2898_v34, %s3271_s29  ;;  %s3287_s29 = smov 8  }
  0x47   : >>> { %2944 = vrot.lane.b32.xlu2 %v2873_v29, %s3272_s30 }
  0x4e   : >>> { %2954 = vrot.lane.b32.xlu1 %v2883_v30, %s3272_s30  ;;  %2949 = vrot.lane.b32.xlu0 %v2878_v31, %s3272_s30 }
  0x4f   : >>> { %2959 = vrot.lane.b32.xlu2 %v2888_v32, %s3272_s30 }
  0x56   : >>> { %2969 = vrot.lane.b32.xlu1 %v2898_v34, %s3272_s30  ;;  %2964 = vrot.lane.b32.xlu0 %v2893_v33, %s3272_s30 }
  0x57   : >>> { %2974 = vrot.lane.b32.xlu2 %v2973_v36, %s3273_s5 }
  0x5e   : >>> { %2984 = vrot.lane.b32.xlu1 %v2983_v37, %s3273_s5  ;;  %2979 = vrot.lane.b32.xlu0 %v2978_v38, %s3273_s5 }
  0x5f   : >>> { %2989 = vrot.lane.b32.xlu2 %v2988_v39, %s3273_s5 }
  0x66   : >>> { %2999 = vrot.lane.b32.xlu1 %v2893_v33, %s3273_s5  ;;  %2994 = vrot.lane.b32.xlu0 %v2903_v35, %s3272_s30  ;;  %s2362_s30 = sshll.u32 %s3694_s7, 4 }
  0x67   : >>> { %3004 = vrot.lane.b32.xlu2 %v2898_v34, %s3273_s5  ;;  %s288_s8 = scalar_lea.vmem %s5827_s2, %s2362_s30 }
  0x6e   : >>> { %3009 = vrot.lane.b32.xlu0 %v2903_v35, %s3273_s5 }
  0x81   : >>> { %v3521_v40 = vpop.permute.xlu2 %2894 }
  0x89   : >>> { %v3523_v41 = vpop.permute.xlu2 %2899 }
  0x91   : >>> { %v3525_v42 = vpop.permute.xlu2 %2914 }
  0x98   : >>> { %v3527_v43 = vpop.permute.xlu0 %2874  ;;  %v3529_v44 = vpop.permute.xlu1 %2884 }
  0x99   : >>> { %v3531_v46 = vpop.permute.xlu2 %2929  ;;  %v5835_v52 = vunpack.i.h.bf16 %v3529_v44  ;;  %v5834_v53 = vunpack.i.l.bf16 %v3529_v44  ;;  %v2876_v1 = vunpack.i.l.bf16 %v3527_v43 }
  0xa0   : >>> { %v3535_v48 = vpop.permute.xlu0 %2879  ;;  %v3537_v49 = vpop.permute.xlu1 %2889 }
  0xa1   : >>> { %v5831_v50 = vunpack.i.h.bf16 %v3537_v49  ;;  %v5830_v51 = vunpack.i.l.bf16 %v3537_v49  ;;  %v3560_v56 = vpop.permute.xlu2 %2944 }
  0xa2   : >>> { %v5854_v3 = vunpack.i.h.bf16 %v3560_v56 }
  0xa3   : >>> { %v3550_v54 = vsel %vm321_vm0, %v5835_v52, %v5831_v50  ;;  %v3558_v55 = vsel %vm321_vm0, %v5834_v53, %v5830_v51 }
  0xa4   : >>> { %5946 = vst [vmem:[#allocation17_spill] sm:$0xff] %v3550_v54 }
  0xa5   : >>> { %5947 = vst [vmem:[#allocation18_spill] sm:$0xff] %v3558_v55 }
  0xa8   : >>> { %v3562_v57 = vpop.permute.xlu1 %2909  ;;  %v3564_v58 = vpop.permute.xlu0 %2904 }
  0xa9   : >>> { %v3566_v59 = vpop.permute.xlu2 %2959 }
  0xb0   : >>> { %v3568_v60 = vpop.permute.xlu1 %2924  ;;  %v3570_v61 = vpop.permute.xlu0 %2919 }
  0xb1   : >>> { %v5833_v62 = vunpack.i.h.bf16 %v3568_v60  ;;  %v5832_v63 = vunpack.i.l.bf16 %v3568_v60  ;;  %v5837_v29 = vunpack.i.h.bf16 %v3570_v61  ;;  %v5836_v30 = vunpack.i.l.bf16 %v3570_v61  ;;  %v3593_v33 = vpop.permute.xlu2 %2974 }
  0xb2   : >>> { %v5838_v34 = vunpack.i.h.bf16 %v3593_v33  ;;  %v2976_v35 = vunpack.i.l.bf16 %v3593_v33 }
  0xb3   : >>> { %v3583_v31 = vsel %vm364_vm1, %v5837_v29, %v5833_v62  ;;  %v3591_v32 = vsel %vm364_vm1, %v5836_v30, %v5832_v63  ;;  %v2962_v63 = vunpack.i.h.bf16 %v3566_v59  ;;  %v2961_v62 = vunpack.i.l.bf16 %v3566_v59 }
  0xb4   : >>> { %v3606_v38 = vsel %vm450_vm2, %v2976_v35, %v5838_v34 }
  0xb5   : >>> { %776 = vmatpush.msra.mxu2 %v3606_v38 }
  0xb8   : >>> { %v3598_v36 = vpop.permute.xlu1 %2939  ;;  %v3600_v37 = vpop.permute.xlu0 %2934 }
  0xb9   : >>> { %v3630_v34 = vpop.permute.xlu2 %2989 }
  0xba   : >>> { %v2992_v14 = vunpack.i.h.bf16 %v3630_v34  ;;  %v5948_v5 = vunpack.i.l.bf16 %v3630_v34 }
  0xc0   : >>> { %v2955_v39 = vpop.permute.xlu1 %2954  ;;  %v2950_v45 = vpop.permute.xlu0 %2949 }
  0xc1   : >>> { %v2957_v8 = vunpack.i.h.bf16 %v2955_v39  ;;  %v2952_v7 = vunpack.i.h.bf16 %v2950_v45  ;;  %v2956_v4 = vunpack.i.l.bf16 %v2955_v39  ;;  %v2951_v2 = vunpack.i.l.bf16 %v2950_v45 }
  0xc8   : >>> { %v3609_v51 = vpop.permute.xlu1 %2969  ;;  %v3611_v50 = vpop.permute.xlu0 %2964 }
  0xc9   : >>> { %v5843_v53 = vunpack.i.h.bf16 %v3611_v50  ;;  %v5848_v52 = vunpack.i.l.bf16 %v3611_v50 }
  0xcb   : >>> { %v3622_v30 = vsel %vm407_vm3, %v2962_v63, %v5843_v53  ;;  %v3628_v29 = vsel %vm407_vm3, %v2961_v62, %v5848_v52 }
  0xd0   : >>> { %v3634_v13 = vpop.permute.xlu1 %2984  ;;  %v2980_v12 = vpop.permute.xlu0 %2979 }
  0xd1   : >>> { %v2987_v11 = vunpack.i.h.bf16 %v3634_v13  ;;  %v5856_v53 = vunpack.i.l.bf16 %v3634_v13  ;;  %v2982_v10 = vunpack.i.h.bf16 %v2980_v12  ;;  %v2981_v9 = vunpack.i.l.bf16 %v2980_v12 }
  0xd2   : >>> { %v461_v12 = vsel %vm450_vm2, %v5948_v5, %v2992_v14  ;;  %v3664_v5 = vsel %vm407_vm3, %v2957_v8, %v2962_v63  ;;  %v3683_v63 = vsel %vm407_vm3, %v2956_v4, %v2961_v62  ;;  %v2912_v62 = vunpack.i.h.bf16 %v3562_v57 }
  0xd3   : >>> { %v462_v52 = vsel %vm450_vm2, %v5856_v53, %v2987_v11  ;;  %v3644_v59 = vsel %vm450_vm2, %v2987_v11, %v2976_v35  ;;  %v3648_v6 = vsel %vm450_vm2, %v2981_v9, %v2982_v10  ;;  %v3660_v11 = vsel %vm450_vm2, %v2992_v14, %v2981_v9 }
  0xd4   : >>> { %562 = vmatpush.msra.mxu0 %v462_v52  ;;  %2575 = vmatpush.msra.mxu3 %v462_v52  ;;  %v5855_v52 = vunpack.i.l.bf16 %v3560_v56  ;;  %v419_v35 = vsel %vm407_vm3, %v5854_v3, %v2952_v7  ;;  %v3679_v14 = vsel %vm407_vm3, %v2952_v7, %v2957_v8  ;;  %v3698_v7 = vsel %vm407_vm3, %v2951_v2, %v2956_v4 }
  0xd5   : >>> { %669 = vmatpush.msra.mxu1 %v3644_v59  ;;  %777 = vmatpush.msra.mxu2 %v3648_v6  ;;  %v5859_v8 = vunpack.i.h.bf16 %v3598_v36  ;;  %v2917_v3 = vunpack.i.h.bf16 %v3525_v42  ;;  %v2911_v53 = vunpack.i.l.bf16 %v3562_v57  ;;  %v5956_v55 = vunpack.i.l.bf16 %v3634_v13 }
  0xd6   : >>> { %563 = vmatpush.msra.mxu0 %v461_v12  ;;  %2576 = vmatpush.msra.mxu3 %v461_v12 }
  0xd7   : >>> { %670 = vmatpush.msra.mxu1 %v3660_v11  ;;  %778 = vmatpush.msra.mxu2 %v3664_v5  ;;  %v3746_v57 = vsel %vm364_vm1, %v2912_v62, %v2917_v3 }
  0xd8   : >>> { %v3673_v39 = vpop.permute.xlu1 %2999  ;;  %v3675_v9 = vpop.permute.xlu0 %2994  ;;  %564 = vmatpush.msra.mxu0 %v419_v35  ;;  %2577 = vmatpush.msra.mxu3 %v419_v35  ;;  %v418_v35 = vsel %vm407_vm3, %v5855_v52, %v2951_v2  ;;  %v5949_v2 = vunpack.i.h.bf16 %v3593_v33  ;;  %v2882_v52 = vunpack.i.h.bf16 %v3535_v48  ;;  %v5950_v33 = vunpack.i.h.bf16 %v3570_v61 }
  0xd9   : >>> { %v5857_v45 = vunpack.i.h.bf16 %v3673_v39  ;;  %v5858_v12 = vunpack.i.l.bf16 %v3673_v39  ;;  %671 = vmatpush.msra.mxu1 %v3679_v14  ;;  %779 = vmatpush.msra.mxu2 %v3683_v63 }
  0xda   : >>> { %565 = vmatpush.msra.mxu0 %v418_v35  ;;  %2578 = vmatpush.msra.mxu3 %v418_v35  ;;  %v2916_v35 = vunpack.i.l.bf16 %v3525_v42  ;;  %v2881_v42 = vunpack.i.l.bf16 %v3535_v48  ;;  %v2877_v48 = vunpack.i.h.bf16 %v3527_v43  ;;  %v5955_v43 = vunpack.i.l.bf16 %v3529_v44 }
  0xdb   : >>> { %672 = vmatpush.msra.mxu1 %v3698_v7  ;;  %780 = vmatpush.msra.mxu2 %v3228_v19  ;;  %v3717_v4 = vsel %vm450_vm2, %v5949_v2, %v5857_v45  ;;  %v3734_v2 = vsel %vm364_vm1, %v2917_v3, %v5950_v33  ;;  %v5951_v33 = vunpack.i.l.bf16 %v3570_v61  ;;  %v3005_v45 = vpop.permute.xlu2 %3004  ;;  %v5952_v3 = vunpack.i.l.bf16 %v3598_v36 }
  0xdc   : >>> { %566 = vmatpush.msra.mxu0 %v3236_v21  ;;  %2579 = vmatpush.msra.mxu3 %v3236_v21  ;;  %v3723_v21 = vsel %vm450_vm2, %v2982_v10, %v5858_v12  ;;  %v378_v10 = vsel %vm364_vm1, %v5859_v8, %v2912_v62  ;;  %v3769_v62 = vsel %vm364_vm1, %v2911_v53, %v2916_v35  ;;  %v3007_v0 = vunpack.i.h.bf16 %v3005_v45 }
  0xdd   : >>> { %673 = vmatpush.msra.mxu1 %v3232_v20  ;;  %781 = vmatpush.msra.mxu2 %v3256_v26  ;;  %v3752_v12 = vsel %vm364_vm1, %v2916_v35, %v5951_v33  ;;  %v377_v61 = vsel %vm364_vm1, %v5952_v3, %v2911_v53  ;;  %v5953_v33 = vunpack.i.h.bf16 %v3529_v44  ;;  %v5954_v3 = vunpack.i.h.bf16 %v3564_v58  ;;  %v3785_v35 = vld [vmem:[%s3757_s11] sm:$0xff] }
  0xde   : >>> { %567 = vmatpush.msra.mxu0 %v3264_v28  ;;  %2580 = vmatpush.msra.mxu3 %v3264_v28  ;;  %v3006_v54 = vunpack.i.l.bf16 %v3005_v45  ;;  %v3814_v13 = vsel %vm321_vm0, %v2876_v1, %v2881_v42 }
  0xdf   : >>> { %674 = vmatpush.msra.mxu1 %v3260_v27  ;;  %782 = vmatpush.msra.mxu2 %v3734_v2  ;;  %v335_v53 = vsel %vm321_vm0, %v5954_v3, %v2877_v48 }
  0xe0   : >>> { %v3010_v28 = vpop.permute.xlu0 %3009  ;;  %568 = vmatpush.msra.mxu0 %v378_v10  ;;  %2581 = vmatpush.msra.mxu3 %v378_v10  ;;  %v3775_v10 = vsel %vm321_vm0, %v2882_v52, %v5953_v33  ;;  %v3795_v33 = vsel %vm321_vm0, %v2881_v42, %v5955_v43  ;;  %v2997_v43 = vunpack.i.h.bf16 %v3675_v9 }
  0xe1   : >>> { %v3012_v8 = vunpack.i.h.bf16 %v3010_v28  ;;  %675 = vmatpush.msra.mxu1 %v3746_v57  ;;  %783 = vmatpush.msra.mxu2 %v3752_v12  ;;  %v3011_v44 = vunpack.i.l.bf16 %v3010_v28 }
  0xe2   : >>> { %569 = vmatpush.msra.mxu0 %v377_v61  ;;  %2582 = vmatpush.msra.mxu3 %v377_v61  ;;  %v3789_v61 = vsel %vm321_vm0, %v2877_v48, %v2882_v52  ;;  %v3810_v48 = vld [vmem:[%s3757_s11 + $0xb8] sm:$0xff] }
  0xe3   : >>> { %676 = vmatpush.msra.mxu1 %v3769_v62  ;;  %784 = vmatpush.msra.mxu2 %v3775_v10  ;;  %v464_v3 = vsel %vm450_vm2, %v3012_v8, %v5956_v55  ;;  %v5958_v55 = vunpack.i.h.bf16 %v3673_v39  ;;  %v452_v28 = vsel %vm450_vm2, %v3007_v0, %v3012_v8 }
  0xe4   : >>> { %570 = vmatpush.msra.mxu0 %v335_v53  ;;  %2583 = vmatpush.msra.mxu3 %v335_v53  ;;  %v5957_v53 = vunpack.i.l.bf16 %v3564_v58 }
  0xe5   : >>> { %677 = vmatpush.msra.mxu1 %v3789_v61  ;;  %785 = vmatpush.msra.mxu2 %v3795_v33  ;;  %v454_v45 = vsel %vm450_vm2, %v5958_v55, %v3007_v0  ;;  %v5960_v0 = vunpack.i.l.bf16 %v3630_v34  ;;  %v5962_v34 = vunpack.i.h.bf16 %v3611_v50 }
  0xe6   : >>> { %v334_v52 = vsel %vm321_vm0, %v5957_v53, %v2876_v1  ;;  %2423 = vmatmul.msk.f32.vlgmr.msra.gmra.mxu2 %vm465_vm4, %v3785_v35  ;;  %v5959_v1 = vunpack.i.l.bf16 %v3673_v39  ;;  %v2996_v53 = vunpack.i.l.bf16 %v3675_v9  ;;  %v2971_v39 = vunpack.i.l.bf16 %v3609_v51 }
  0xe7   : >>> { %571 = vmatpush.msra.mxu0 %v334_v52  ;;  %1204 = vmatpush.msrb.mxu2 %v464_v3  ;;  %v2972_v3 = vunpack.i.h.bf16 %v3609_v51  ;;  %v463_v8 = vsel %vm450_vm2, %v3011_v44, %v5960_v0  ;;  %v5961_v9 = vunpack.i.h.bf16 %v3560_v56  ;;  %v2896_v0 = vunpack.i.l.bf16 %v3521_v40 }
  0xe8   : >>> { %2584 = vmatpush.msra.mxu3 %v334_v52  ;;  %678 = vmatpush.msra.mxu1 %v3814_v13  ;;  %v453_v42 = vsel %vm450_vm2, %v5959_v1, %v3006_v54  ;;  %v451_v52 = vsel %vm450_vm2, %v3006_v54, %v3011_v44  ;;  %v3854_v44 = vld [vmem:[%s3757_s11 + $0x8] sm:$0xff]  ;;  %vm2017_vm2 = vcmp.lt.s32.totalorder %v3533_v47, 100 }
  0xe9   : >>> { %2363 = vmatmul.msk.f32.vlgmr.msra.gmra.mxu0 %vm465_vm4, %v3785_v35  ;;  %2386 = vmatmul.msk.f32.vlgmr.msra.gmra.mxu3 %vm465_vm4, %v3810_v48  ;;  %v411_v54 = vsel %vm407_vm3, %v5962_v34, %v2972_v3  ;;  %v409_v51 = vsel %vm407_vm3, %v2972_v3, %v2997_v43  ;;  %v2931_v3 = vunpack.i.l.bf16 %v3531_v46 }
  0xea   : >>> { %2393 = vmatmul.msk.f32.vlgmr.msra.gmra.mxu1 %vm465_vm4, %v3785_v35  ;;  %2585 = vmatpush.msrb.mxu3 %v3644_v59  ;;  %v421_v59 = vsel %vm407_vm3, %v2997_v43, %v5961_v9  ;;  %v2937_v43 = vunpack.i.h.bf16 %v3600_v37 }
  0xeb   : >>> { %990 = vmatpush.msrb.mxu0 %v454_v45  ;;  %1097 = vmatpush.msrb.mxu1 %v452_v28  ;;  %v3864_v45 = vld [vmem:[%s3757_s11 + $0xc0] sm:$0xff] }
  0xec   : >>> { %1205 = vmatpush.msrb.mxu2 %v463_v8  ;;  %2586 = vmatpush.msrb.mxu3 %v3660_v11  ;;  %v5963_v11 = vunpack.i.l.bf16 %v3560_v56  ;;  %v408_v56 = vsel %vm407_vm3, %v2971_v39, %v2996_v53  ;;  %v2901_v8 = vunpack.i.l.bf16 %v3523_v41 }
  0xed   : >>> { %991 = vmatpush.msrb.mxu0 %v453_v42  ;;  %1098 = vmatpush.msrb.mxu1 %v451_v52  ;;  %v3936_v52 = vld [vmem:[%s3757_s11 + $0x10] sm:$0xff] }
  0xee   : >>> { %1206 = vmatpush.msrb.mxu2 %v421_v59  ;;  %2587 = vmatpush.msrb.mxu3 %v3679_v14  ;;  %v420_v55 = vsel %vm407_vm3, %v2996_v53, %v5963_v11  ;;  %v5964_v14 = vunpack.i.l.bf16 %v3611_v50  ;;  %v2936_v50 = vunpack.i.l.bf16 %v3600_v37  ;;  %v3909_v37 = vld [vmem:[%s3757_s11 + $0xc8] sm:$0xff]  ;;  %v3953_v59 = vld [vmem:[%s3757_s11 + $0xd0] sm:$0xff] }
  0xef   : >>> { %992 = vmatpush.msrb.mxu0 %v411_v54  ;;  %1099 = vmatpush.msrb.mxu1 %v409_v51  ;;  %v4134_v54 = vld [vmem:[%s3757_s11 + $0x80] sm:$0xff] }
  0xf0   : >>> { %1207 = vmatpush.msrb.mxu2 %v420_v55  ;;  %2588 = vmatpush.msrb.mxu3 %v3698_v7  ;;  %v410_v28 = vsel %vm407_vm3, %v5964_v14, %v2971_v39  ;;  %v2932_v7 = vunpack.i.h.bf16 %v3531_v46  ;;  %v367_v42 = vsel %vm364_vm1, %v2931_v3, %v2936_v50  ;;  %v5972_v39 = vunpack.i.l.bf16 %v3537_v49  ;;  %v4149_v55 = vld [vmem:[%s3757_s11 + $0x88] sm:$0xff] }
  0xf1   : >>> { %2424 = vmatmul.msk.f32.gmra.mxu2 %vm465_vm4, %v3854_v44  ;;  %993 = vmatpush.msrb.mxu0 %v410_v28  ;;  %v4162_v28 = vld [vmem:[%s3757_s11 + $0x90] sm:$0xff] }
  0xf2   : >>> { %1100 = vmatpush.msrb.mxu1 %v408_v56  ;;  %1208 = vmatpush.msrb.mxu2 %v3212_v15  ;;  %v5965_v15 = vunpack.i.h.bf16 %v3598_v36  ;;  %v326_v9 = vsel %vm321_vm0, %v5972_v39, %v2896_v0 }
  0xf3   : >>> { %2387 = vmatmul.msk.f32.gmra.mxu3 %vm465_vm4, %v3864_v45  ;;  %994 = vmatpush.msrb.mxu0 %v3220_v17 }
  0xf4   : >>> { %2589 = vmatpush.msrb.mxu3 %v3232_v20  ;;  %1101 = vmatpush.msrb.mxu1 %v3216_v16  ;;  %v366_v20 = vsel %vm364_vm1, %v2937_v43, %v5965_v15  ;;  %v5966_v16 = vunpack.i.h.bf16 %v3568_v60 }
  0xf5   : >>> { %1209 = vmatpush.msrb.mxu2 %v3240_v22  ;;  %995 = vmatpush.msrb.mxu0 %v3248_v24  ;;  %v368_v22 = vsel %vm364_vm1, %v2932_v7, %v2937_v43  ;;  %v2897_v24 = vunpack.i.h.bf16 %v3521_v40 }
  0xf6   : >>> { %2590 = vmatpush.msrb.mxu3 %v3260_v27  ;;  %1102 = vmatpush.msrb.mxu1 %v3244_v23  ;;  %v370_v17 = vsel %vm364_vm1, %v5966_v16, %v2932_v7  ;;  %v2902_v27 = vunpack.i.h.bf16 %v3523_v41  ;;  %v5967_v23 = vunpack.i.l.bf16 %v3598_v36  ;;  %v5969_v36 = vunpack.i.h.bf16 %v3564_v58 }
  0xf7   : >>> { %1210 = vmatpush.msrb.mxu2 %v366_v20  ;;  %2364 = vmatmul.msk.f32.gmra.mxu0 %vm465_vm4, %v3854_v44  ;;  %v5971_v41 = vunpack.i.l.bf16 %v3564_v58  ;;  %v324_v58 = vsel %vm321_vm0, %v2896_v0, %v2901_v8 }
  0xf8   : >>> { %2591 = vmatpush.msrb.mxu3 %v3746_v57  ;;  %996 = vmatpush.msrb.mxu0 %v370_v17  ;;  %v365_v46 = vsel %vm364_vm1, %v2936_v50, %v5967_v23  ;;  %v5968_v57 = vunpack.i.l.bf16 %v3568_v60  ;;  %v323_v53 = vsel %vm321_vm0, %v2902_v27, %v5969_v36  ;;  %v5970_v60 = vunpack.i.h.bf16 %v3537_v49  ;;  %v3964_v49 = vld [vmem:[%s3757_s11 + $0x18] sm:$0xff]  ;;  %v4190_v17 = vld [vmem:[%s3757_s11 + $0xa0] sm:$0xff] }
  0xf9   : >>> { %1103 = vmatpush.msrb.mxu1 %v368_v22  ;;  %1211 = vmatpush.msrb.mxu2 %v365_v46  ;;  %v325_v40 = vsel %vm321_vm0, %v2897_v24, %v2902_v27 }
  0xfa   : >>> { %2592 = vmatpush.msrb.mxu3 %v3769_v62  ;;  %v369_v1 = vsel %vm364_vm1, %v5968_v57, %v2931_v3  ;;  %2394 = vmatmul.msk.f32.gmra.mxu1 %vm465_vm4, %v3854_v44  ;;  %v327_v62 = vsel %vm321_vm0, %v5970_v60, %v2897_v24  ;;  %v4176_v3 = vld [vmem:[%s3757_s11 + $0x98] sm:$0xff]  ;;  %v4206_v57 = vld [vmem:[%s3757_s11 + $0xa8] sm:$0xff]  ;;  %v4221_v60 = vld [vmem:[%s3757_s11 + $0xb0] sm:$0xff]  ;;  %vm2074_vm1 = vcmp.lt.s32.totalorder %v3533_v47, 88 }
  0xfb   : >>> { %997 = vmatpush.msrb.mxu0 %v369_v1  ;;  %1104 = vmatpush.msrb.mxu1 %v367_v42 }
  0xfc   : >>> { %1212 = vmatpush.msrb.mxu2 %v323_v53  ;;  %2388 = vmatmul.msk.f32.gmra.mxu3 %vm465_vm4, %v3909_v37 }
  0xfd   : >>> { %2593 = vmatpush.msrb.mxu3 %v3789_v61  ;;  %998 = vmatpush.msrb.mxu0 %v327_v62  ;;  %v322_v61 = vsel %vm321_vm0, %v2901_v8, %v5971_v41  ;;  %vm1903_vm0 = vcmp.lt.s32.totalorder %v3533_v47, 124 }
  0xfe   : >>> { %1105 = vmatpush.msrb.mxu1 %v325_v40  ;;  %1213 = vmatpush.msrb.mxu2 %v322_v61 }
  0xff   : >>> { %2594 = vmatpush.msrb.mxu3 %v3814_v13  ;;  %2425 = vmatmul.msk.f32.gmra.mxu2 %vm465_vm4, %v3936_v52 }
 0x100   : >>> { %999 = vmatpush.msrb.mxu0 %v326_v9  ;;  %1106 = vmatpush.msrb.mxu1 %v324_v58 }
 0x101   : >>> { %2595 = vmatpush.msra.mxu3 %v3606_v38  ;;  %2365 = vmatmul.msk.f32.gmra.mxu0 %vm465_vm4, %v3936_v52  ;;  %v3982_v38 = vld [vmem:[%s3757_s11 + $0x20] sm:$0xff] }
 0x102   : >>> { %2395 = vmatmul.msk.f32.gmra.mxu1 %vm465_vm4, %v3936_v52 }
 0x103   : >>> { %2596 = vmatpush.msra.mxu3 %v3648_v6  ;;  %v3971_v6 = vld [vmem:[%s3757_s11 + $0xd8] sm:$0xff] }
 0x104   : >>> { %2389 = vmatmul.msk.f32.gmra.mxu3 %vm465_vm4, %v3953_v59 }
 0x105   : >>> { %2597 = vmatpush.msra.mxu3 %v3664_v5  ;;  %v4004_v5 = vld [vmem:[%s3757_s11 + $0xe8] sm:$0xff] }
 0x107   : >>> { %2598 = vmatpush.msra.mxu3 %v3683_v63  ;;  %2426 = vmatmul.msk.f32.gmra.mxu2 %vm465_vm4, %v3964_v49  ;;  %v4013_v63 = vld [vmem:[%s3757_s11 + $0x30] sm:$0xff] }
 0x109   : >>> { %2599 = vmatpush.msra.mxu3 %v3228_v19  ;;  %2366 = vmatmul.msk.f32.gmra.mxu0 %vm465_vm4, %v3964_v49  ;;  %v3989_v19 = vld [vmem:[%s3757_s11 + $0xe0] sm:$0xff] }
 0x10a   : >>> { %2396 = vmatmul.msk.f32.gmra.mxu1 %vm465_vm4, %v3964_v49 }
 0x10b   : >>> { %2600 = vmatpush.msra.mxu3 %v3256_v26  ;;  %v3999_v26 = vld [vmem:[%s3757_s11 + $0x28] sm:$0xff] }
 0x10c   : >>> { %2390 = vmatmul.msk.f32.gmra.mxu3 %vm465_vm4, %v3971_v6 }
 0x10d   : >>> { %2601 = vmatpush.msra.mxu3 %v3734_v2  ;;  %v4109_v2 = vld [vmem:[%s3757_s11 + $0x70] sm:$0xff] }
 0x10f   : >>> { %2602 = vmatpush.msra.mxu3 %v3752_v12  ;;  %2427 = vmatmul.msk.f32.gmra.mxu2 %vm465_vm4, %v3982_v38  ;;  %v4025_v12 = vld [vmem:[%s3757_s11 + $0x38] sm:$0xff] }
 0x111   : >>> { %2603 = vmatpush.msra.mxu3 %v3775_v10  ;;  %2367 = vmatmul.msk.f32.gmra.mxu0 %vm465_vm4, %v3982_v38  ;;  %v4120_v10 = vld [vmem:[%s3757_s11 + $0x78] sm:$0xff] }
 0x112   : >>> { %2397 = vmatmul.msk.f32.gmra.mxu1 %vm465_vm4, %v3982_v38 }
 0x113   : >>> { %2604 = vmatpush.msra.mxu3 %v3795_v33 }
 0x114   : >>> { %2391 = vmatmul.msk.f32.gmra.mxu3 %vm465_vm4, %v3989_v19 }
 0x117   : >>> { %2428 = vmatmul.msk.f32.gmra.mxu2 %vm465_vm4, %v3999_v26 }
 0x119   : >>> { %2368 = vmatmul.msk.f32.gmra.mxu0 %vm465_vm4, %v3999_v26 }
 0x11a   : >>> { %2398 = vmatmul.msk.f32.gmra.mxu1 %vm465_vm4, %v3999_v26 }
 0x11c   : >>> { %2392 = vmatmul.msk.f32.gmra.mxu3 %vm465_vm4, %v4004_v5 }
 0x11f   : >>> { %2429 = vmatmul.msk.f32.gmra.mxu2 %vm465_vm4, %v4013_v63 }
 0x121   : >>> { %2369 = vmatmul.msk.f32.gmra.mxu0 %vm465_vm4, %v4013_v63 }
 0x122   : >>> { %2399 = vmatmul.msk.f32.gmra.mxu1 %vm465_vm4, %v4013_v63 }
 0x124   : >>> { %2416 = vmatmul.msk.f32.vlgmr.msrb.gmra.mxu3 %vm465_vm4, %v3810_v48 }
 0x125   : >>> { %883 = vmatpush.msrb.mxu3 %v3717_v4  ;;  %v4040_v4 = vld [vmem:[%s3757_s11 + $0x40] sm:$0xff] }
 0x127   : >>> { %884 = vmatpush.msrb.mxu3 %v3723_v21  ;;  %2430 = vmatmul.msk.f32.gmra.mxu2 %vm465_vm4, %v4025_v12  ;;  %v4098_v21 = vld [vmem:[%s3757_s11 + $0x68] sm:$0xff] }
 0x129   : >>> { %885 = vmatpush.msrb.mxu3 %v3622_v30  ;;  %2370 = vmatmul.msk.f32.gmra.mxu0 %vm465_vm4, %v4025_v12  ;;  %v4065_v30 = vld [vmem:[%s3757_s11 + $0x50] sm:$0xff] }
 0x12a   : >>> { %2400 = vmatmul.msk.f32.gmra.mxu1 %vm465_vm4, %v4025_v12 }
 0x12b   : >>> { %886 = vmatpush.msrb.mxu3 %v3628_v29  ;;  %v5974_v29 = vld [vmem:[#allocation18_spill] sm:$0xff] }
 0x12c   : >>> { %2417 = vmatmul.msk.f32.gmra.mxu3 %vm465_vm4, %v3864_v45 }
 0x12d   : >>> { %887 = vmatpush.msrb.mxu3 %v3224_v18  ;;  %v5973_v18 = vld [vmem:[#allocation17_spill] sm:$0xff] }
 0x12f   : >>> { %888 = vmatpush.msrb.mxu3 %v3252_v25  ;;  %2431 = vmatmul.msk.f32.gmra.mxu2 %vm465_vm4, %v4040_v4  ;;  %v4055_v25 = vld [vmem:[%s3757_s11 + $0x48] sm:$0xff] }
 0x131   : >>> { %889 = vmatpush.msrb.mxu3 %v3583_v31  ;;  %2371 = vmatmul.msk.f32.gmra.mxu0 %vm465_vm4, %v4040_v4  ;;  %v4076_v31 = vld [vmem:[%s3757_s11 + $0x58] sm:$0xff] }
 0x132   : >>> { %2401 = vmatmul.msk.f32.gmra.mxu1 %vm465_vm4, %v4040_v4 }
 0x133   : >>> { %890 = vmatpush.msrb.mxu3 %v3591_v32  ;;  %v4087_v32 = vld [vmem:[%s3757_s11 + $0x60] sm:$0xff] }
 0x134   : >>> { %2418 = vmatmul.msk.f32.gmra.mxu3 %vm465_vm4, %v3909_v37 }
 0x135   : >>> { %891 = vmatpush.msrb.mxu3 %v5973_v18 }
 0x137   : >>> { %892 = vmatpush.msrb.mxu3 %v5974_v29  ;;  %2432 = vmatmul.msk.f32.gmra.mxu2 %vm465_vm4, %v4055_v25 }
 0x139   : >>> { %2372 = vmatmul.msk.f32.gmra.mxu0 %vm465_vm4, %v4055_v25 }
 0x13a   : >>> { %2402 = vmatmul.msk.f32.gmra.mxu1 %vm465_vm4, %v4055_v25 }
 0x13c   : >>> { %2419 = vmatmul.msk.f32.gmra.mxu3 %vm465_vm4, %v3953_v59 }
 0x13f   : >>> { %2433 = vmatmul.msk.f32.gmra.mxu2 %vm465_vm4, %v4065_v30 }
 0x141   : >>> { %2373 = vmatmul.msk.f32.gmra.mxu0 %vm465_vm4, %v4065_v30 }
 0x142   : >>> { %2403 = vmatmul.msk.f32.gmra.mxu1 %vm465_vm4, %v4065_v30 }
 0x144   : >>> { %2420 = vmatmul.msk.f32.gmra.mxu3 %vm465_vm4, %v3971_v6 }
 0x147   : >>> { %2434 = vmatmul.msk.f32.gmra.mxu2 %vm465_vm4, %v4076_v31 }
 0x149   : >>> { %2374 = vmatmul.msk.f32.gmra.mxu0 %vm465_vm4, %v4076_v31 }
 0x14a   : >>> { %2404 = vmatmul.msk.f32.gmra.mxu1 %vm465_vm4, %v4076_v31 }
 0x14c   : >>> { %2421 = vmatmul.msk.f32.gmra.mxu3 %vm465_vm4, %v3989_v19 }
 0x14f   : >>> { %2435 = vmatmul.msk.f32.gmra.mxu2 %vm465_vm4, %v4087_v32 }
 0x151   : >>> { %2375 = vmatmul.msk.f32.gmra.mxu0 %vm465_vm4, %v4087_v32 }
 0x152   : >>> { %2405 = vmatmul.msk.f32.gmra.mxu1 %vm465_vm4, %v4087_v32 }
 0x154   : >>> { %2422 = vmatmul.msk.f32.gmra.mxu3 %vm465_vm4, %v4004_v5 }
 0x157   : >>> { %2436 = vmatmul.msk.f32.gmra.mxu2 %vm465_vm4, %v4098_v21 }
 0x159   : >>> { %2376 = vmatmul.msk.f32.gmra.mxu0 %vm465_vm4, %v4098_v21 }
 0x15a   : >>> { %2406 = vmatmul.msk.f32.gmra.mxu1 %vm465_vm4, %v4098_v21 }
 0x15c   : >>> { %2446 = vmatmul.msk.f32.vlgmr.msra.gmra.mxu3 %vm465_vm4, %v3810_v48 }
 0x15f   : >>> { %2437 = vmatmul.msk.f32.gmra.mxu2 %vm465_vm4, %v4109_v2 }
 0x161   : >>> { %2377 = vmatmul.msk.f32.gmra.mxu0 %vm465_vm4, %v4109_v2 }
 0x162   : >>> { %2407 = vmatmul.msk.f32.gmra.mxu1 %vm465_vm4, %v4109_v2 }
 0x164   : >>> { %2447 = vmatmul.msk.f32.gmra.mxu3 %vm465_vm4, %v3864_v45 }
 0x166   : >>> { %v573_v33 = vpop.f32.mrf.mxu0 }
 0x167   : >>> { %v680_v48 = vpop.f32.mrf.mxu1  ;;  %1305 = vrot.lane.b32.xlu1 %v573_v33, %s3274_s12  ;;  %2438 = vmatmul.msk.f32.gmra.mxu2 %vm465_vm4, %v4120_v10 }
 0x168   : >>> { %1309 = vrot.lane.b32.xlu0 %v680_v48, %s3274_s12 }
 0x169   : >>> { %v787_v13 = vpop.f32.mrf.mxu2  ;;  %2378 = vmatmul.msk.f32.gmra.mxu0 %vm465_vm4, %v4120_v10 }
 0x16a   : >>> { %1313 = vrot.lane.b32.xlu2 %v787_v13, %s3274_s12  ;;  %2408 = vmatmul.msk.f32.gmra.mxu1 %vm465_vm4, %v4120_v10 }
 0x16c   : >>> { %2448 = vmatmul.msk.f32.gmra.mxu3 %vm465_vm4, %v3909_v37  ;;  %v642_v34 = vpop.f32.mrf.mxu3 }
 0x16f   : >>> { %1877 = vrot.lane.b32.xlu1 %v642_v34, %s3275_s13  ;;  %2439 = vmatmul.msk.f32.gmra.mxu2 %vm465_vm4, %v4134_v54 }
 0x171   : >>> { %2379 = vmatmul.msk.f32.gmra.mxu0 %vm465_vm4, %v4134_v54 }
 0x172   : >>> { %2409 = vmatmul.msk.f32.gmra.mxu1 %vm465_vm4, %v4134_v54 }
 0x174   : >>> { %v790_v51 = vpop.f32.mrf.mxu2  ;;  %2449 = vmatmul.msk.f32.gmra.mxu3 %vm465_vm4, %v3953_v59  ;;  %v576_v11 = vpop.f32.mrf.mxu0 }
 0x175   : >>> { %1315 = vrot.lane.b32.xlu0 %v790_v51, %s3274_s12  ;;  %1307 = vrot.lane.b32.xlu2 %v576_v11, %s3274_s12 }
 0x176   : >>> { %v645_v14 = vpop.f32.mrf.mxu3 }
 0x177   : >>> { %2440 = vmatmul.msk.f32.gmra.mxu2 %vm465_vm4, %v4149_v55  ;;  %v683_v45 = vpop.f32.mrf.mxu1 }
 0x178   : >>> { %1311 = vrot.lane.b32.xlu1 %v683_v45, %s3274_s12 }
 0x179   : >>> { %2380 = vmatmul.msk.f32.gmra.mxu0 %vm465_vm4, %v4149_v55 }
 0x17a   : >>> { %2410 = vmatmul.msk.f32.gmra.mxu1 %vm465_vm4, %v4149_v55 }
 0x17c   : >>> { %2450 = vmatmul.msk.f32.gmra.mxu3 %vm465_vm4, %v3971_v6 }
 0x17d   : >>> { %1932 = vrot.lane.b32.xlu2 %v645_v14, %s3276_s14 }
 0x17e   : >>> { %v579_v56 = vpop.f32.mrf.mxu0 }
 0x17f   : >>> { %1348 = vrot.lane.b32.xlu0 %v579_v56, %s3277_s16  ;;  %2441 = vmatmul.msk.f32.gmra.mxu2 %vm465_vm4, %v4162_v28  ;;  %v686_v43 = vpop.f32.mrf.mxu1  ;;  %v648_v50 = vpop.f32.mrf.mxu3 }
 0x181   : >>> { %2381 = vmatmul.msk.f32.gmra.mxu0 %vm465_vm4, %v4162_v28 }
 0x182   : >>> { %v793_v7 = vpop.f32.mrf.mxu2  ;;  %2411 = vmatmul.msk.f32.gmra.mxu1 %vm465_vm4, %v4162_v28 }
 0x183   : >>> { %1356 = vrot.lane.b32.xlu1 %v793_v7, %s3277_s16 }
 0x184   : >>> { %2451 = vmatmul.msk.f32.gmra.mxu3 %vm465_vm4, %v3989_v19 }
 0x185   : >>> { %1352 = vrot.lane.b32.xlu2 %v686_v43, %s3277_s16 }
 0x186   : >>> { %v582_v15 = vpop.f32.mrf.mxu0 }
 0x187   : >>> { %1934 = vrot.lane.b32.xlu0 %v648_v50, %s3276_s14  ;;  %2442 = vmatmul.msk.f32.gmra.mxu2 %vm465_vm4, %v4176_v3  ;;  %v689_v20 = vpop.f32.mrf.mxu1  ;;  %v651_v22 = vpop.f32.mrf.mxu3 }
 0x189   : >>> { %2382 = vmatmul.msk.f32.gmra.mxu0 %vm465_vm4, %v4176_v3 }
 0x18a   : >>> { %v796_v16 = vpop.f32.mrf.mxu2  ;;  %2412 = vmatmul.msk.f32.gmra.mxu1 %vm465_vm4, %v4176_v3 }
 0x18b   : >>> { %1350 = vrot.lane.b32.xlu1 %v582_v15, %s3277_s16 }
 0x18c   : >>> { %2452 = vmatmul.msk.f32.gmra.mxu3 %vm465_vm4, %v4004_v5 }
 0x18d   : >>> { %1358 = vrot.lane.b32.xlu2 %v796_v16, %s3277_s16 }
 0x18e   : >>> { %v585_v27 = vpop.f32.mrf.mxu0 }
 0x18f   : >>> { %1354 = vrot.lane.b32.xlu0 %v689_v20, %s3277_s16  ;;  %2443 = vmatmul.msk.f32.gmra.mxu2 %vm465_vm4, %v4190_v17  ;;  %v692_v24 = vpop.f32.mrf.mxu1  ;;  %v654_v46 = vpop.f32.mrf.mxu3 }
 0x191   : >>> { %2383 = vmatmul.msk.f32.gmra.mxu0 %vm465_vm4, %v4190_v17 }
 0x192   : >>> { %v799_v23 = vpop.f32.mrf.mxu2  ;;  %2413 = vmatmul.msk.f32.gmra.mxu1 %vm465_vm4, %v4190_v17 }
 0x193   : >>> { %1989 = vrot.lane.b32.xlu1 %v651_v22, %s3278_s17 }
 0x194   : >>> { %2453 = vmatmul.msk.f32.vlgmr.msrb.gmra.mxu3 %vm465_vm4, %v3785_v35 }
 0x195   : >>> { %1405 = vrot.lane.b32.xlu2 %v585_v27, %s3279_s18 }
 0x196   : >>> { %v588_v36 = vpop.f32.mrf.mxu0 }
 0x197   : >>> { %1413 = vrot.lane.b32.xlu0 %v799_v23, %s3279_s18  ;;  %2444 = vmatmul.msk.f32.gmra.mxu2 %vm465_vm4, %v4206_v57  ;;  %v695_v1 = vpop.f32.mrf.mxu1  ;;  %v657_v53 = vpop.f32.mrf.mxu3 }
 0x199   : >>> { %2384 = vmatmul.msk.f32.gmra.mxu0 %vm465_vm4, %v4206_v57 }
 0x19a   : >>> { %v802_v42 = vpop.f32.mrf.mxu2  ;;  %2414 = vmatmul.msk.f32.gmra.mxu1 %vm465_vm4, %v4206_v57 }
 0x19b   : >>> { %1409 = vrot.lane.b32.xlu1 %v692_v24, %s3279_s18 }
 0x19c   : >>> { %2454 = vmatmul.msk.f32.gmra.mxu3 %vm465_vm4, %v3854_v44 }
 0x19d   : >>> { %1991 = vrot.lane.b32.xlu2 %v654_v46, %s3278_s17 }
 0x19e   : >>> { %v591_v62 = vpop.f32.mrf.mxu0 }
 0x19f   : >>> { %1407 = vrot.lane.b32.xlu0 %v588_v36, %s3279_s18  ;;  %v698_v0 = vpop.f32.mrf.mxu1  ;;  %2445 = vmatmul.msk.f32.gmra.mxu2 %vm465_vm4, %v4221_v60  ;;  %v660_v40 = vpop.f32.mrf.mxu3 }
 0x1a1   : >>> { %2385 = vmatmul.msk.f32.gmra.mxu0 %vm465_vm4, %v4221_v60 }
 0x1a2   : >>> { %v805_v8 = vpop.f32.mrf.mxu2  ;;  %2415 = vmatmul.msk.f32.gmra.mxu1 %vm465_vm4, %v4221_v60 }
 0x1a3   : >>> { %1415 = vrot.lane.b32.xlu1 %v802_v42, %s3279_s18 }
 0x1a4   : >>> { %2455 = vmatmul.msk.f32.gmra.mxu3 %vm465_vm4, %v3936_v52 }
 0x1a5   : >>> { %1411 = vrot.lane.b32.xlu2 %v695_v1, %s3279_s18 }
 0x1a6   : >>> { %v594_v39 = vpop.f32.mrf.mxu0 }
 0x1a7   : >>> { %2046 = vrot.lane.b32.xlu0 %v657_v53, %s3280_s19  ;;  %v701_v41 = vpop.f32.mrf.mxu1  ;;  %2543 = vmatmul.msk.f32.vlgmr.msrb.gmra.mxu2 %vm465_vm4, %v3785_v35  ;;  %v749_v9 = vpop.f32.mrf.mxu3 }
 0x1a9   : >>> { %2483 = vmatmul.msk.f32.vlgmr.msrb.gmra.mxu0 %vm465_vm4, %v3785_v35 }
 0x1aa   : >>> { %v808_v61 = vpop.f32.mrf.mxu2  ;;  %2513 = vmatmul.msk.f32.vlgmr.msrb.gmra.mxu1 %vm465_vm4, %v3785_v35 }
 0x1ab   : >>> { %1462 = vrot.lane.b32.xlu1 %v591_v62, %s3281_s20 }
 0x1ac   : >>> { %2456 = vmatmul.msk.f32.gmra.mxu3 %vm465_vm4, %v3964_v49 }
 0x1ad   : >>> { %1470 = vrot.lane.b32.xlu2 %v805_v8, %s3281_s20 }
 0x1ae   : >>> { %v597_v35 = vpop.f32.mrf.mxu0 }
 0x1af   : >>> { %1466 = vrot.lane.b32.xlu0 %v698_v0, %s3281_s20  ;;  %v704_v18 = vpop.f32.mrf.mxu1  ;;  %2544 = vmatmul.msk.f32.gmra.mxu2 %vm465_vm4, %v3854_v44  ;;  %v752_v29 = vpop.f32.mrf.mxu3 }
 0x1b1   : >>> { %2484 = vmatmul.msk.f32.gmra.mxu0 %vm465_vm4, %v3854_v44 }
 0x1b2   : >>> { %v811_v58 = vpop.f32.mrf.mxu2  ;;  %2514 = vmatmul.msk.f32.gmra.mxu1 %vm465_vm4, %v3854_v44 }
 0x1b3   : >>> { %2048 = vrot.lane.b32.xlu1 %v660_v40, %s3280_s19 }
 0x1b4   : >>> { %2457 = vmatmul.msk.f32.gmra.mxu3 %vm465_vm4, %v3982_v38 }
 0x1b5   : >>> { %1464 = vrot.lane.b32.xlu2 %v594_v39, %s3281_s20 }
 0x1b6   : >>> { %v600_v44 = vpop.f32.mrf.mxu0 }
 0x1b7   : >>> { %1472 = vrot.lane.b32.xlu0 %v808_v61, %s3281_s20  ;;  %v707_v48 = vpop.f32.mrf.mxu1  ;;  %2545 = vmatmul.msk.f32.gmra.mxu2 %vm465_vm4, %v3936_v52  ;;  %v755_v13 = vpop.f32.mrf.mxu3 }
 0x1b9   : >>> { %2485 = vmatmul.msk.f32.gmra.mxu0 %vm465_vm4, %v3936_v52 }
 0x1ba   : >>> { %v814_v33 = vpop.f32.mrf.mxu2  ;;  %2515 = vmatmul.msk.f32.gmra.mxu1 %vm465_vm4, %v3936_v52 }
 0x1bb   : >>> { %1468 = vrot.lane.b32.xlu1 %v701_v41, %s3281_s20 }
 0x1bc   : >>> { %2458 = vmatmul.msk.f32.gmra.mxu3 %vm465_vm4, %v3999_v26 }
 0x1bd   : >>> { %1523 = vrot.lane.b32.xlu2 %v704_v18, %s3282_s21 }
 0x1be   : >>> { %v603_v11 = vpop.f32.mrf.mxu0 }
 0x1bf   : >>> { %1881 = vrot.lane.b32.xlu0 %v749_v9, %s3275_s13  ;;  %2546 = vmatmul.msk.f32.gmra.mxu2 %vm465_vm4, %v3964_v49  ;;  %v710_v52 = vpop.f32.mrf.mxu1  ;;  %v758_v45 = vpop.f32.mrf.mxu3 }
 0x1c1   : >>> { %2486 = vmatmul.msk.f32.gmra.mxu0 %vm465_vm4, %v3964_v49 }
 0x1c2   : >>> { %v817_v34 = vpop.f32.mrf.mxu2  ;;  %2516 = vmatmul.msk.f32.gmra.mxu1 %vm465_vm4, %v3964_v49 }
 0x1c3   : >>> { %1527 = vrot.lane.b32.xlu1 %v811_v58, %s3282_s21 }
 0x1c4   : >>> { %2459 = vmatmul.msk.f32.gmra.mxu3 %vm465_vm4, %v4013_v63  ;;  %v4274_v51 = vpop.permute.xlu2 %1313 }
 0x1c5   : >>> { %1529 = vrot.lane.b32.xlu2 %v814_v33, %s3282_s21 }
 0x1c6   : >>> { %v606_v43 = vpop.f32.mrf.mxu0 }
 0x1c7   : >>> { %1519 = vrot.lane.b32.xlu0 %v597_v35, %s3282_s21  ;;  %2547 = vmatmul.msk.f32.gmra.mxu2 %vm465_vm4, %v3982_v38  ;;  %v713_v56 = vpop.f32.mrf.mxu1 }
 0x1c9   : >>> { %2487 = vmatmul.msk.f32.gmra.mxu0 %vm465_vm4, %v3982_v38 }
 0x1ca   : >>> { %2517 = vmatmul.msk.f32.gmra.mxu1 %vm465_vm4, %v3982_v38  ;;  %v820_v49 = vpop.f32.mrf.mxu2  ;;  %v761_v38 = vpop.f32.mrf.mxu3 }
 0x1cb   : >>> { %1936 = vrot.lane.b32.xlu1 %v752_v29, %s3276_s14 }
 0x1cc   : >>> { %2460 = vmatmul.msk.f32.gmra.mxu3 %vm465_vm4, %v4025_v12 }
 0x1cd   : >>> { %1938 = vrot.lane.b32.xlu2 %v755_v13, %s3276_s14 }
 0x1cf   : >>> { %1525 = vrot.lane.b32.xlu0 %v707_v48, %s3282_s21  ;;  %v4290_v14 = vpop.permute.xlu2 %1307  ;;  %2548 = vmatmul.msk.f32.gmra.mxu2 %vm465_vm4, %v3999_v26  ;;  %v716_v20 = vpop.f32.mrf.mxu1 }
 0x1d1   : >>> { %2488 = vmatmul.msk.f32.gmra.mxu0 %vm465_vm4, %v3999_v26 }
 0x1d2   : >>> { %2518 = vmatmul.msk.f32.gmra.mxu1 %vm465_vm4, %v3999_v26  ;;  %v823_v15 = vpop.f32.mrf.mxu2  ;;  %v609_v26 = vpop.f32.mrf.mxu0 }
 0x1d3   : >>> { %1521 = vrot.lane.b32.xlu1 %v600_v44, %s3282_s21  ;;  %v764_v24 = vpop.f32.mrf.mxu3 }
 0x1d4   : >>> { %2461 = vmatmul.msk.f32.gmra.mxu3 %vm465_vm4, %v4040_v4 }
 0x1d5   : >>> { %1576 = vrot.lane.b32.xlu2 %v603_v11, %s3283_s22 }
 0x1d7   : >>> { %1584 = vrot.lane.b32.xlu0 %v817_v34, %s3283_s22  ;;  %v4303_v7 = vpop.permute.xlu2 %1932  ;;  %2549 = vmatmul.msk.f32.gmra.mxu2 %vm465_vm4, %v4013_v63  ;;  %v719_v46 = vpop.f32.mrf.mxu1 }
 0x1d8   : >>> { %5975 = vst [vmem:[#allocation17_spill] sm:$0xff] %v4303_v7 }
 0x1d9   : >>> { %v4305_v50 = vpop.permute.xlu1 %1305  ;;  %2489 = vmatmul.msk.f32.gmra.mxu0 %vm465_vm4, %v4013_v63 }
 0x1da   : >>> { %5976 = vst [vmem:[#allocation18_spill] sm:$0xff] %v4305_v50  ;;  %2519 = vmatmul.msk.f32.gmra.mxu1 %vm465_vm4, %v4013_v63  ;;  %v4317_v16 = vpop.permute.xlu0 %1309  ;;  %v826_v23 = vpop.f32.mrf.mxu2 }
 0x1db   : >>> { %1580 = vrot.lane.b32.xlu1 %v710_v52, %s3283_s22  ;;  %v612_v42 = vpop.f32.mrf.mxu0  ;;  %v767_v36 = vpop.f32.mrf.mxu3 }
 0x1dc   : >>> { %2462 = vmatmul.msk.f32.gmra.mxu3 %vm465_vm4, %v4055_v25 }
 0x1dd   : >>> { %1582 = vrot.lane.b32.xlu2 %v713_v56, %s3283_s22 }
 0x1df   : >>> { %1993 = vrot.lane.b32.xlu0 %v758_v45, %s3278_s17  ;;  %v4320_v22 = vpop.permute.xlu2 %1352  ;;  %2550 = vmatmul.msk.f32.gmra.mxu2 %vm465_vm4, %v4025_v12 }
 0x1e1   : >>> { %v4322_v27 = vpop.permute.xlu1 %1877  ;;  %2490 = vmatmul.msk.f32.gmra.mxu0 %vm465_vm4, %v4025_v12 }
 0x1e2   : >>> { %5977 = vst [vmem:[#allocation19_spill] sm:$0xff] %v4322_v27  ;;  %2520 = vmatmul.msk.f32.gmra.mxu1 %vm465_vm4, %v4025_v12  ;;  %v4344_v0 = vpop.f32.mrf.mxu2  ;;  %v4353_v12 = vpop.f32.mrf.mxu1 }
 0x1e3   : >>> { %1586 = vrot.lane.b32.xlu1 %v820_v49, %s3283_s22  ;;  %5980 = vst [vmem:[#allocation22_spill] sm:$0xff] %v4344_v0  ;;  %v4360_v40 = vpop.f32.mrf.mxu0  ;;  %v856_v41 = vpop.f32.mrf.mxu3 }
 0x1e4   : >>> { %2463 = vmatmul.msk.f32.gmra.mxu3 %vm465_vm4, %v4065_v30  ;;  %5981 = vst [vmem:[#allocation23_spill] sm:$0xff] %v4353_v12 }
 0x1e5   : >>> { %1641 = vrot.lane.b32.xlu2 %v823_v15, %s3284_s23  ;;  %5984 = vst [vmem:[#allocation26_spill] sm:$0xff] %v4360_v40 }
 0x1e7   : >>> { %1578 = vrot.lane.b32.xlu0 %v606_v43, %s3283_s22  ;;  %v4335_v63 = vpop.permute.xlu0 %1315  ;;  %v4337_v1 = vpop.permute.xlu2 %1358  ;;  %2551 = vmatmul.msk.f32.gmra.mxu2 %vm465_vm4, %v4040_v4 }
 0x1e8   : >>> { %5978 = vst [vmem:[#allocation20_spill] sm:$0xff] %v4335_v63 }
 0x1e9   : >>> { %2491 = vmatmul.msk.f32.gmra.mxu0 %vm465_vm4, %v4040_v4 }
 0x1ea   : >>> { %v4342_v53 = vpop.permute.xlu1 %1311  ;;  %2521 = vmatmul.msk.f32.gmra.mxu1 %vm465_vm4, %v4040_v4  ;;  %v4374_v61 = vpop.f32.mrf.mxu2 }
 0x1eb   : >>> { %1995 = vrot.lane.b32.xlu1 %v761_v38, %s3278_s17  ;;  %5979 = vst [vmem:[#allocation21_spill] sm:$0xff] %v4342_v53  ;;  %v4379_v9 = vpop.f32.mrf.mxu1  ;;  %v4386_v18 = vpop.f32.mrf.mxu0 }
 0x1ec   : >>> { %2464 = vmatmul.msk.f32.gmra.mxu3 %vm465_vm4, %v4076_v31  ;;  %5985 = vst [vmem:[#allocation27_spill] sm:$0xff] %v4374_v61  ;;  %v859_v35 = vpop.f32.mrf.mxu3 }
 0x1ed   : >>> { %2050 = vrot.lane.b32.xlu2 %v764_v24, %s3280_s19  ;;  %5988 = vst [vmem:[#allocation30_spill] sm:$0xff] %v4386_v18  ;;  %v3020_v18 = vld [vmem:[%s3757_s11 + $0xe0] sm:$0xff] }
 0x1ef   : >>> { %1637 = vrot.lane.b32.xlu0 %v716_v20, %s3284_s23  ;;  %v4356_v8 = vpop.permute.xlu2 %1405  ;;  %2552 = vmatmul.msk.f32.gmra.mxu2 %vm465_vm4, %v4055_v25 }
 0x1f0   : >>> { %5982 = vst [vmem:[#allocation24_spill] sm:$0xff] %v4356_v8 }
 0x1f1   : >>> { %v4358_v62 = vpop.permute.xlu0 %1348  ;;  %2492 = vmatmul.msk.f32.gmra.mxu0 %vm465_vm4, %v4055_v25 }
 0x1f2   : >>> { %5983 = vst [vmem:[#allocation25_spill] sm:$0xff] %v4358_v62  ;;  %2522 = vmatmul.msk.f32.gmra.mxu1 %vm465_vm4, %v4055_v25  ;;  %v835_v33 = vpop.f32.mrf.mxu2 }
 0x1f3   : >>> { %1633 = vrot.lane.b32.xlu1 %v609_v26, %s3284_s23  ;;  %v728_v44 = vpop.f32.mrf.mxu1  ;;  %v621_v13 = vpop.f32.mrf.mxu0 }
 0x1f4   : >>> { %2465 = vmatmul.msk.f32.gmra.mxu3 %vm465_vm4, %v4087_v32  ;;  %v862_v52 = vpop.f32.mrf.mxu3 }
 0x1f5   : >>> { %v4369_v4 = vpop.permute.xlu1 %1356  ;;  %1635 = vrot.lane.b32.xlu2 %v612_v42, %s3284_s23 }
 0x1f7   : >>> { %1643 = vrot.lane.b32.xlu0 %v826_v23, %s3284_s23  ;;  %v4377_v39 = vpop.permute.xlu2 %1991  ;;  %2553 = vmatmul.msk.f32.gmra.mxu2 %vm465_vm4, %v4065_v30 }
 0x1f8   : >>> { %5986 = vst [vmem:[#allocation28_spill] sm:$0xff] %v4377_v39 }
 0x1f9   : >>> { %v4381_v58 = vpop.permute.xlu0 %1934  ;;  %2493 = vmatmul.msk.f32.gmra.mxu0 %vm465_vm4, %v4065_v30 }
 0x1fa   : >>> { %5987 = vst [vmem:[#allocation29_spill] sm:$0xff] %v4381_v58  ;;  %2523 = vmatmul.msk.f32.gmra.mxu1 %vm465_vm4, %v4065_v30  ;;  %v838_v45 = vpop.f32.mrf.mxu2 }
 0x1fb   : >>> { %1639 = vrot.lane.b32.xlu1 %v719_v46, %s3284_s23  ;;  %v731_v49 = vpop.f32.mrf.mxu1  ;;  %v624_v43 = vpop.f32.mrf.mxu0 }
 0x1fc   : >>> { %2466 = vmatmul.msk.f32.gmra.mxu3 %vm465_vm4, %v4098_v21  ;;  %v865_v15 = vpop.f32.mrf.mxu3 }
 0x1fd   : >>> { %v4392_v25 = vpop.permute.xlu1 %1350  ;;  %1885 = vrot.lane.b32.xlu2 %v856_v41, %s3275_s13 }
 0x1ff   : >>> { %2052 = vrot.lane.b32.xlu0 %v767_v36, %s3280_s19  ;;  %v4398_v29 = vpop.permute.xlu2 %1411  ;;  %2554 = vmatmul.msk.f32.gmra.mxu2 %vm465_vm4, %v4076_v31 }
 0x200   : >>> { %5989 = vst [vmem:[#allocation31_spill] sm:$0xff] %v4398_v29 }
 0x201   : >>> { %v4400_v48 = vpop.permute.xlu0 %1354  ;;  %2494 = vmatmul.msk.f32.gmra.mxu0 %vm465_vm4, %v4076_v31 }
 0x202   : >>> { %5990 = vst [vmem:[#allocation32_spill] sm:$0xff] %v4400_v48  ;;  %2524 = vmatmul.msk.f32.gmra.mxu1 %vm465_vm4, %v4076_v31  ;;  %v841_v20 = vpop.f32.mrf.mxu2 }
 0x203   : >>> { %1712 = vrot.lane.b32.xlu1 %v835_v33, %s3285_s24  ;;  %v734_v24 = vpop.f32.mrf.mxu1  ;;  %v627_v46 = vpop.f32.mrf.mxu0 }
 0x204   : >>> { %2467 = vmatmul.msk.f32.gmra.mxu3 %vm465_vm4, %v4109_v2  ;;  %v868_v42 = vpop.f32.mrf.mxu3 }
 0x205   : >>> { %v4409_v30 = vpop.permute.xlu1 %1989  ;;  %1708 = vrot.lane.b32.xlu2 %v728_v44, %s3285_s24 }
 0x206   : >>> { %5991 = vst [vmem:[#allocation33_spill] sm:$0xff] %v4409_v30  ;;  %v3015_v30 = vld [vmem:[%s3757_s11 + $0xb8] sm:$0xff] }
 0x207   : >>> { %1940 = vrot.lane.b32.xlu0 %v859_v35, %s3276_s14  ;;  %v4415_v34 = vpop.permute.xlu2 %1470  ;;  %2555 = vmatmul.msk.f32.gmra.mxu2 %vm465_vm4, %v4087_v32 }
 0x209   : >>> { %v4417_v11 = vpop.permute.xlu0 %1413  ;;  %2495 = vmatmul.msk.f32.gmra.mxu0 %vm465_vm4, %v4087_v32 }
 0x20a   : >>> { %2525 = vmatmul.msk.f32.gmra.mxu1 %vm465_vm4, %v4087_v32  ;;  %v844_v41 = vpop.f32.mrf.mxu2 }
 0x20b   : >>> { %1942 = vrot.lane.b32.xlu1 %v862_v52, %s3276_s14  ;;  %v737_v33 = vpop.f32.mrf.mxu1  ;;  %v630_v44 = vpop.f32.mrf.mxu0 }
 0x20c   : >>> { %2468 = vmatmul.msk.f32.gmra.mxu3 %vm465_vm4, %v4120_v10  ;;  %v871_v52 = vpop.f32.mrf.mxu3 }
 0x20d   : >>> { %v4426_v31 = vpop.permute.xlu1 %1409  ;;  %1714 = vrot.lane.b32.xlu2 %v838_v45, %s3285_s24 }
 0x20f   : >>> { %1704 = vrot.lane.b32.xlu0 %v621_v13, %s3285_s24  ;;  %v4432_v56 = vpop.permute.xlu2 %1464  ;;  %2556 = vmatmul.msk.f32.gmra.mxu2 %vm465_vm4, %v4098_v21 }
 0x211   : >>> { %v4434_v38 = vpop.permute.xlu0 %1407  ;;  %2496 = vmatmul.msk.f32.gmra.mxu0 %vm465_vm4, %v4098_v21 }
 0x212   : >>> { %2526 = vmatmul.msk.f32.gmra.mxu1 %vm465_vm4, %v4098_v21 }
 0x213   : >>> { %1706 = vrot.lane.b32.xlu1 %v624_v43, %s3285_s24  ;;  %v740_v43 = vpop.f32.mrf.mxu1 }
 0x214   : >>> { %2469 = vmatmul.msk.f32.gmra.mxu3 %vm465_vm4, %v4134_v54 }
 0x215   : >>> { %v4443_v32 = vpop.permute.xlu1 %1415  ;;  %1997 = vrot.lane.b32.xlu2 %v865_v15, %s3278_s17 }
 0x217   : >>> { %1710 = vrot.lane.b32.xlu0 %v731_v49, %s3285_s24  ;;  %v4449_v26 = vpop.permute.xlu2 %1523  ;;  %2557 = vmatmul.msk.f32.gmra.mxu2 %vm465_vm4, %v4109_v2  ;;  %v847_v49 = vpop.f32.mrf.mxu2 }
 0x219   : >>> { %v4451_v23 = vpop.permute.xlu0 %2046  ;;  %2497 = vmatmul.msk.f32.gmra.mxu0 %vm465_vm4, %v4109_v2 }
 0x21a   : >>> { %5992 = vst [vmem:[#allocation34_spill] sm:$0xff] %v4451_v23  ;;  %2527 = vmatmul.msk.f32.gmra.mxu1 %vm465_vm4, %v4109_v2 }
 0x21b   : >>> { %1765 = vrot.lane.b32.xlu1 %v734_v24, %s3286_s28 }
 0x21c   : >>> { %2470 = vmatmul.msk.f32.gmra.mxu3 %vm465_vm4, %v4149_v55 }
 0x21d   : >>> { %v4460_v21 = vpop.permute.xlu1 %1462  ;;  %1761 = vrot.lane.b32.xlu2 %v627_v46, %s3286_s28  ;;  %v874_v46 = vpop.f32.mrf.mxu3 }
 0x21f   : >>> { %1769 = vrot.lane.b32.xlu0 %v841_v20, %s3286_s28  ;;  %v4466_v36 = vpop.permute.xlu2 %1529  ;;  %2558 = vmatmul.msk.f32.gmra.mxu2 %vm465_vm4, %v4120_v10  ;;  %v633_v20 = vpop.f32.mrf.mxu0 }
 0x220   : >>> { %5993 = vst [vmem:[#allocation35_spill] sm:$0xff] %v4466_v36 }
 0x221   : >>> { %v4468_v35 = vpop.permute.xlu0 %1466  ;;  %2498 = vmatmul.msk.f32.gmra.mxu0 %vm465_vm4, %v4120_v10 }
 0x222   : >>> { %2528 = vmatmul.msk.f32.gmra.mxu1 %vm465_vm4, %v4120_v10 }
 0x223   : >>> { %1771 = vrot.lane.b32.xlu1 %v844_v41, %s3286_s28  ;;  %v743_v41 = vpop.f32.mrf.mxu1 }
 0x224   : >>> { %2471 = vmatmul.msk.f32.gmra.mxu3 %vm465_vm4, %v4162_v28 }
 0x225   : >>> { %v4477_v2 = vpop.permute.xlu1 %2048  ;;  %1767 = vrot.lane.b32.xlu2 %v737_v33, %s3286_s28 }
 0x226   : >>> { %5994 = vst [vmem:[#allocation36_spill] sm:$0xff] %v4477_v2 }
 0x227   : >>> { %1999 = vrot.lane.b32.xlu0 %v868_v42, %s3278_s17  ;;  %v4483_v13 = vpop.permute.xlu2 %1938  ;;  %2559 = vmatmul.msk.f32.gmra.mxu2 %vm465_vm4, %v4134_v54  ;;  %v636_v33 = vpop.f32.mrf.mxu0 }
 0x228   : >>> { %5995 = vst [vmem:[#allocation37_spill] sm:$0xff] %v4483_v13  ;;  %v3018_v13 = vld [vmem:[%s3757_s11 + $0xd0] sm:$0xff] }
 0x229   : >>> { %v4485_v45 = vpop.permute.xlu0 %1472  ;;  %2499 = vmatmul.msk.f32.gmra.mxu0 %vm465_vm4, %v4134_v54 }
 0x22a   : >>> { %2529 = vmatmul.msk.f32.gmra.mxu1 %vm465_vm4, %v4134_v54 }
 0x22b   : >>> { %2054 = vrot.lane.b32.xlu1 %v871_v52, %s3280_s19  ;;  %v850_v52 = vpop.f32.mrf.mxu2 }
 0x22c   : >>> { %2472 = vmatmul.msk.f32.gmra.mxu3 %vm465_vm4, %v4176_v3 }
 0x22d   : >>> { %v4494_v10 = vpop.permute.xlu1 %1468  ;;  %1826 = vrot.lane.b32.xlu2 %v847_v49, %s3287_s29 }
 0x22e   : >>> { %5996 = vst [vmem:[#allocation38_spill] sm:$0xff] %v4494_v10 }
 0x22f   : >>> { %1763 = vrot.lane.b32.xlu0 %v630_v44, %s3286_s28  ;;  %v4500_v15 = vpop.permute.xlu2 %1576  ;;  %2560 = vmatmul.msk.f32.gmra.mxu2 %vm465_vm4, %v4149_v55 }
 0x231   : >>> { %v4502_v24 = vpop.permute.xlu0 %1881  ;;  %2500 = vmatmul.msk.f32.gmra.mxu0 %vm465_vm4, %v4149_v55 }
 0x232   : >>> { %5997 = vst [vmem:[#allocation39_spill] sm:$0xff] %v4502_v24  ;;  %2530 = vmatmul.msk.f32.gmra.mxu1 %vm465_vm4, %v4149_v55  ;;  %v3019_v24 = vld [vmem:[%s3757_s11 + $0xd8] sm:$0xff] }
 0x233   : >>> { %1818 = vrot.lane.b32.xlu1 %v633_v20, %s3287_s29  ;;  %v853_v23 = vpop.f32.mrf.mxu2 }
 0x234   : >>> { %2473 = vmatmul.msk.f32.gmra.mxu3 %vm465_vm4, %v4190_v17 }
 0x235   : >>> { %v4511_v54 = vpop.permute.xlu1 %1527  ;;  %2056 = vrot.lane.b32.xlu2 %v874_v46, %s3280_s19  ;;  %v639_v46 = vpop.f32.mrf.mxu0 }
 0x236   : >>> { %5998 = vst [vmem:[#allocation40_spill] sm:$0xff] %v4511_v54 }
 0x237   : >>> { %1822 = vrot.lane.b32.xlu0 %v740_v43, %s3287_s29  ;;  %v4517_v42 = vpop.permute.xlu2 %1582  ;;  %2561 = vmatmul.msk.f32.gmra.mxu2 %vm465_vm4, %v4162_v28  ;;  %v894_v43 = vpop.f32.mrf.mxu3 }
 0x239   : >>> { %v4519_v44 = vpop.permute.xlu0 %1519  ;;  %2501 = vmatmul.msk.f32.gmra.mxu0 %vm465_vm4, %v4162_v28 }
 0x23a   : >>> { %2531 = vmatmul.msk.f32.gmra.mxu1 %vm465_vm4, %v4162_v28 }
 0x23b   : >>> { %1824 = vrot.lane.b32.xlu1 %v743_v41, %s3287_s29  ;;  %v746_v41 = vpop.f32.mrf.mxu1 }
 0x23c   : >>> { %2474 = vmatmul.msk.f32.gmra.mxu3 %vm465_vm4, %v4206_v57 }
 0x23d   : >>> { %v4528_v55 = vpop.permute.xlu1 %1936  ;;  %1820 = vrot.lane.b32.xlu2 %v636_v33, %s3287_s29  ;;  %v1001_v7 = vpop.f32.mrf.mxu0 }
 0x23e   : >>> { %5999 = vst [vmem:[#allocation41_spill] sm:$0xff] %v4528_v55  ;;  %v3016_v55 = vld [vmem:[%s3757_s11 + $0xc0] sm:$0xff] }
 0x23f   : >>> { %1828 = vrot.lane.b32.xlu0 %v850_v52, %s3287_s29  ;;  %v4534_v49 = vpop.permute.xlu2 %1641  ;;  %2562 = vmatmul.msk.f32.gmra.mxu2 %vm465_vm4, %v4176_v3 }
 0x240   : >>> { %6000 = vst [vmem:[#allocation42_spill] sm:$0xff] %v4534_v49 }
 0x241   : >>> { %v4536_v20 = vpop.permute.xlu0 %1525  ;;  %2502 = vmatmul.msk.f32.gmra.mxu0 %vm465_vm4, %v4176_v3 }
 0x242   : >>> { %2532 = vmatmul.msk.f32.gmra.mxu1 %vm465_vm4, %v4176_v3 }
 0x243   : >>> { %1317 = vrot.lane.b32.xlu1 %v894_v43, %s3274_s12  ;;  %v897_v43 = vpop.f32.mrf.mxu3 }
 0x244   : >>> { %2475 = vmatmul.msk.f32.gmra.mxu3 %vm465_vm4, %v4221_v60 }
 0x245   : >>> { %v4545_v28 = vpop.permute.xlu1 %1521  ;;  %1879 = vrot.lane.b32.xlu2 %v746_v41, %s3275_s13 }
 0x247   : >>> { %1875 = vrot.lane.b32.xlu0 %v639_v46, %s3275_s13  ;;  %v4551_v33 = vpop.permute.xlu2 %2050  ;;  %2563 = vmatmul.msk.f32.gmra.mxu2 %vm465_vm4, %v4190_v17  ;;  %v1215_v46 = vpop.f32.mrf.mxu2 }
 0x248   : >>> { %6001 = vst [vmem:[#allocation43_spill] sm:$0xff] %v4551_v33  ;;  %v1108_v33 = vpop.f32.mrf.mxu1 }
 0x249   : >>> { %v4553_v52 = vpop.permute.xlu0 %1584  ;;  %2503 = vmatmul.msk.f32.gmra.mxu0 %vm465_vm4, %v4190_v17 }
 0x24a   : >>> { %6002 = vst [vmem:[#allocation44_spill] sm:$0xff] %v4553_v52  ;;  %2533 = vmatmul.msk.f32.gmra.mxu1 %vm465_vm4, %v4190_v17 }
 0x24b   : >>> { %1883 = vrot.lane.b32.xlu1 %v853_v23, %s3275_s13  ;;  %v900_v2 = vpop.f32.mrf.mxu3 }
 0x24c   : >>> { %2476 = vmatmul.msk.f32.gmra.mxu3 %vm465_vm4, %v3015_v30 }
 0x24d   : >>> { %v4562_v3 = vpop.permute.xlu1 %1580  ;;  %1319 = vrot.lane.b32.xlu2 %v897_v43, %s3274_s12 }
 0x24f   : >>> { %1321 = vrot.lane.b32.xlu0 %v1001_v7, %s3274_s12  ;;  %v4568_v23 = vpop.permute.xlu2 %1635  ;;  %2564 = vmatmul.msk.f32.gmra.mxu2 %vm465_vm4, %v4206_v57  ;;  %v1004_v7 = vpop.f32.mrf.mxu0 }
 0x250   : >>> { %v1218_v43 = vpop.f32.mrf.mxu2  ;;  %v1111_v39 = vpop.f32.mrf.mxu1 }
 0x251   : >>> { %v4570_v41 = vpop.permute.xlu0 %1993  ;;  %2504 = vmatmul.msk.f32.gmra.mxu0 %vm465_vm4, %v4206_v57 }
 0x252   : >>> { %6003 = vst [vmem:[#allocation45_spill] sm:$0xff] %v4570_v41  ;;  %2534 = vmatmul.msk.f32.gmra.mxu1 %vm465_vm4, %v4206_v57 }
 0x253   : >>> { %1329 = vrot.lane.b32.xlu1 %v1215_v46, %s3274_s12  ;;  %v903_v58 = vpop.f32.mrf.mxu3 }
 0x254   : >>> { %2477 = vmatmul.msk.f32.gmra.mxu3 %vm465_vm4, %v3016_v55 }
 0x255   : >>> { %v4579_v17 = vpop.permute.xlu1 %1586  ;;  %1325 = vrot.lane.b32.xlu2 %v1108_v33, %s3274_s12 }
 0x256   : >>> { %6004 = vst [vmem:[#allocation46_spill] sm:$0xff] %v4579_v17  ;;  %v3021_v17 = vld [vmem:[%s3757_s11 + $0xe8] sm:$0xff] }
 0x257   : >>> { %1360 = vrot.lane.b32.xlu0 %v900_v2, %s3277_s16  ;;  %v4585_v46 = vpop.permute.xlu2 %1885  ;;  %2565 = vmatmul.msk.f32.gmra.mxu2 %vm465_vm4, %v4221_v60  ;;  %v1007_v2 = vpop.f32.mrf.mxu0 }
 0x258   : >>> { %6005 = vst [vmem:[#allocation47_spill] sm:$0xff] %v4585_v46  ;;  %v1114_v27 = vpop.f32.mrf.mxu1 }
 0x259   : >>> { %v4587_v41 = vpop.permute.xlu0 %1578  ;;  %2505 = vmatmul.msk.f32.gmra.mxu0 %vm465_vm4, %v4221_v60 }
 0x25a   : >>> { %2535 = vmatmul.msk.f32.gmra.mxu1 %vm465_vm4, %v4221_v60 }
 0x25b   : >>> { %1323 = vrot.lane.b32.xlu1 %v1004_v7, %s3274_s12  ;;  %v906_v61 = vpop.f32.mrf.mxu3 }
 0x25c   : >>> { %2478 = vmatmul.msk.f32.gmra.mxu3 %vm465_vm4, %v3909_v37  ;;  %v1221_v37 = vpop.f32.mrf.mxu2 }
 0x25d   : >>> { %v4596_v57 = vpop.permute.xlu1 %1995  ;;  %1331 = vrot.lane.b32.xlu2 %v1218_v43, %s3274_s12 }
 0x25e   : >>> { %6006 = vst [vmem:[#allocation48_spill] sm:$0xff] %v4596_v57 }
 0x25f   : >>> { %1327 = vrot.lane.b32.xlu0 %v1111_v39, %s3274_s12  ;;  %v4602_v33 = vpop.permute.xlu2 %1708  ;;  %2566 = vmatmul.msk.f32.gmra.mxu2 %vm465_vm4, %v3015_v30 }
 0x260   : >>> { %6007 = vst [vmem:[#allocation49_spill] sm:$0xff] %v4602_v33 }
 0x261   : >>> { %v4604_v7 = vpop.permute.xlu0 %1637  ;;  %2506 = vmatmul.msk.f32.gmra.mxu0 %vm465_vm4, %v3015_v30 }
 0x262   : >>> { %6008 = vst [vmem:[#allocation50_spill] sm:$0xff] %v4604_v7  ;;  %2536 = vmatmul.msk.f32.gmra.mxu1 %vm465_vm4, %v3015_v30 }
 0x263   : >>> { %1362 = vrot.lane.b32.xlu1 %v903_v58, %s3277_s16  ;;  %v1010_v58 = vpop.f32.mrf.mxu0 }
 0x264   : >>> { %2479 = vmatmul.msk.f32.gmra.mxu3 %vm465_vm4, %v3953_v59  ;;  %v1224_v43 = vpop.f32.mrf.mxu2  ;;  %v1117_v59 = vpop.f32.mrf.mxu1 }
 0x265   : >>> { %v4611_v60 = vpop.permute.xlu1 %1633  ;;  %1364 = vrot.lane.b32.xlu2 %v1007_v2, %s3277_s16  ;;  %v909_v2 = vpop.f32.mrf.mxu3 }
 0x266   : >>> { %6009 = vst [vmem:[#allocation51_spill] sm:$0xff] %v4611_v60 }
 0x267   : >>> { %1372 = vrot.lane.b32.xlu0 %v1221_v37, %s3277_s16  ;;  %v4616_v39 = vpop.permute.xlu2 %1714  ;;  %2567 = vmatmul.msk.f32.gmra.mxu2 %vm465_vm4, %v3016_v55 }
 0x268   : >>> { %6010 = vst [vmem:[#allocation52_spill] sm:$0xff] %v4616_v39 }
 0x269   : >>> { %v4618_v0 = vpop.permute.xlu0 %1643  ;;  %2507 = vmatmul.msk.f32.gmra.mxu0 %vm465_vm4, %v3016_v55 }
 0x26a   : >>> { %6011 = vst [vmem:[#allocation53_spill] sm:$0xff] %v4618_v0  ;;  %2537 = vmatmul.msk.f32.gmra.mxu1 %vm465_vm4, %v3016_v55 }
 0x26b   : >>> { %1368 = vrot.lane.b32.xlu1 %v1114_v27, %s3277_s16  ;;  %v1013_v27 = vpop.f32.mrf.mxu0 }
 0x26c   : >>> { %2480 = vmatmul.msk.f32.gmra.mxu3 %vm465_vm4, %v3971_v6  ;;  %v1227_v57 = vpop.f32.mrf.mxu2  ;;  %v3017_v6 = vld [vmem:[%s3757_s11 + $0xc8] sm:$0xff]  ;;  %v1120_v55 = vpop.f32.mrf.mxu1 }
 0x26d   : >>> { %v4625_v30 = vpop.permute.xlu1 %1639  ;;  %1417 = vrot.lane.b32.xlu2 %v906_v61, %s3279_s18 }
 0x26f   : >>> { %1366 = vrot.lane.b32.xlu0 %v1010_v58, %s3277_s16  ;;  %v4630_v37 = vpop.permute.xlu2 %1997  ;;  %2568 = vmatmul.msk.f32.gmra.mxu2 %vm465_vm4, %v3017_v6  ;;  %v912_v58 = vpop.f32.mrf.mxu3 }
 0x270   : >>> { %6012 = vst [vmem:[#allocation54_spill] sm:$0xff] %v4630_v37 }
 0x271   : >>> { %v4632_v40 = vpop.permute.xlu0 %2052  ;;  %2508 = vmatmul.msk.f32.gmra.mxu0 %vm465_vm4, %v3017_v6 }
 0x272   : >>> { %6013 = vst [vmem:[#allocation55_spill] sm:$0xff] %v4632_v40  ;;  %2538 = vmatmul.msk.f32.gmra.mxu1 %vm465_vm4, %v3017_v6 }
 0x273   : >>> { %1374 = vrot.lane.b32.xlu1 %v1224_v43, %s3277_s16  ;;  %v1016_v37 = vpop.f32.mrf.mxu0 }
 0x274   : >>> { %2481 = vmatmul.msk.f32.gmra.mxu3 %vm465_vm4, %v3989_v19  ;;  %v1230_v40 = vpop.f32.mrf.mxu2 }
 0x275   : >>> { %v4640_v61 = vpop.permute.xlu1 %1712  ;;  %1370 = vrot.lane.b32.xlu2 %v1117_v59, %s3277_s16 }
 0x276   : >>> { %6014 = vst [vmem:[#allocation56_spill] sm:$0xff] %v4640_v61 }
 0x277   : >>> { %1419 = vrot.lane.b32.xlu0 %v909_v2, %s3279_s18  ;;  %v4645_v43 = vpop.permute.xlu2 %1761  ;;  %2569 = vmatmul.msk.f32.gmra.mxu2 %vm465_vm4, %v3018_v13  ;;  %v1123_v2 = vpop.f32.mrf.mxu1 }
 0x278   : >>> { %6015 = vst [vmem:[#allocation57_spill] sm:$0xff] %v4645_v43  ;;  %v915_v6 = vpop.f32.mrf.mxu3 }
 0x279   : >>> { %v4647_v19 = vpop.permute.xlu0 %1940  ;;  %2509 = vmatmul.msk.f32.gmra.mxu0 %vm465_vm4, %v3018_v13 }
 0x27a   : >>> { %6016 = vst [vmem:[#allocation58_spill] sm:$0xff] %v4647_v19  ;;  %2539 = vmatmul.msk.f32.gmra.mxu1 %vm465_vm4, %v3018_v13 }
 0x27b   : >>> { %1421 = vrot.lane.b32.xlu1 %v1013_v27, %s3279_s18 }
 0x27c   : >>> { %2482 = vmatmul.msk.f32.gmra.mxu3 %vm465_vm4, %v4004_v5  ;;  %v1019_v5 = vpop.f32.mrf.mxu0  ;;  %v1233_v43 = vpop.f32.mrf.mxu2 }
 0x27d   : >>> { %v4655_v59 = vpop.permute.xlu1 %1942  ;;  %1429 = vrot.lane.b32.xlu2 %v1227_v57, %s3279_s18 }
 0x27e   : >>> { %6017 = vst [vmem:[#allocation59_spill] sm:$0xff] %v4655_v59 }
 0x27f   : >>> { %1425 = vrot.lane.b32.xlu0 %v1120_v55, %s3279_s18  ;;  %v4660_v27 = vpop.permute.xlu2 %1767  ;;  %2570 = vmatmul.msk.f32.gmra.mxu2 %vm465_vm4, %v3019_v24  ;;  %v1126_v13 = vpop.f32.mrf.mxu1 }
 0x281   : >>> { %v4662_v19 = vpop.permute.xlu0 %1704  ;;  %2510 = vmatmul.msk.f32.gmra.mxu0 %vm465_vm4, %v3019_v24 }
 0x282   : >>> { %6018 = vst [vmem:[#allocation60_spill] sm:$0xff] %v4662_v19  ;;  %2540 = vmatmul.msk.f32.gmra.mxu1 %vm465_vm4, %v3019_v24  ;;  %v918_v19 = vpop.f32.mrf.mxu3 }
 0x283   : >>> { %1474 = vrot.lane.b32.xlu1 %v912_v58, %s3281_s20 }
 0x284   : >>> { %v1022_v58 = vpop.f32.mrf.mxu0  ;;  %v1236_v46 = vpop.f32.mrf.mxu2 }
 0x285   : >>> { %v4668_v57 = vpop.permute.xlu1 %1706  ;;  %1423 = vrot.lane.b32.xlu2 %v1016_v37, %s3279_s18 }
 0x286   : >>> { %6019 = vst [vmem:[#allocation61_spill] sm:$0xff] %v4668_v57 }
 0x287   : >>> { %1431 = vrot.lane.b32.xlu0 %v1230_v40, %s3279_s18  ;;  %v4673_v55 = vpop.permute.xlu2 %1826  ;;  %2571 = vmatmul.msk.f32.gmra.mxu2 %vm465_vm4, %v3020_v18  ;;  %v1129_v24 = vpop.f32.mrf.mxu1 }
 0x288   : >>> { %6020 = vst [vmem:[#allocation62_spill] sm:$0xff] %v4673_v55 }
 0x289   : >>> { %v4675_v59 = vpop.permute.xlu0 %1710  ;;  %2511 = vmatmul.msk.f32.gmra.mxu0 %vm465_vm4, %v3020_v18 }
 0x28a   : >>> { %2541 = vmatmul.msk.f32.gmra.mxu1 %vm465_vm4, %v3020_v18  ;;  %v921_v57 = vpop.f32.mrf.mxu3 }
 0x28b   : >>> { %1427 = vrot.lane.b32.xlu1 %v1123_v2, %s3279_s18 }
 0x28c   : >>> { %v1025_v2 = vpop.f32.mrf.mxu0  ;;  %v1239_v0 = vpop.f32.mrf.mxu2 }
 0x28d   : >>> { %v4681_v37 = vpop.permute.xlu1 %1765  ;;  %1476 = vrot.lane.b32.xlu2 %v915_v6, %s3281_s20 }
 0x28e   : >>> { %6021 = vst [vmem:[#allocation63_spill] sm:$0xff] %v4681_v37 }
 0x28f   : >>> { %1478 = vrot.lane.b32.xlu0 %v1019_v5, %s3281_s20  ;;  %v4686_v40 = vpop.permute.xlu2 %2056  ;;  %2572 = vmatmul.msk.f32.gmra.mxu2 %vm465_vm4, %v3021_v17  ;;  %v1132_v5 = vpop.f32.mrf.mxu1 }
 0x290   : >>> { %6022 = vst [vmem:[#allocation64_spill] sm:$0xff] %v4686_v40 }
 0x291   : >>> { %v4688_v49 = vpop.permute.xlu0 %1769  ;;  %2512 = vmatmul.msk.f32.gmra.mxu0 %vm465_vm4, %v3021_v17 }
 0x292   : >>> { %6023 = vst [vmem:[#allocation65_spill] sm:$0xff] %v4688_v49  ;;  %2542 = vmatmul.msk.f32.gmra.mxu1 %vm465_vm4, %v3021_v17 }
 0x293   : >>> { %1486 = vrot.lane.b32.xlu1 %v1233_v43, %s3281_s20  ;;  %v924_v43 = vpop.f32.mrf.mxu3 }
 0x294   : >>> { %v1028_v36 = vpop.f32.mrf.mxu0  ;;  %v1242_v29 = vpop.f32.mrf.mxu2 }
 0x295   : >>> { %v4694_v6 = vpop.permute.xlu1 %1771  ;;  %1482 = vrot.lane.b32.xlu2 %v1126_v13, %s3281_s20 }
 0x296   : >>> { %6024 = vst [vmem:[#allocation66_spill] sm:$0xff] %v4694_v6 }
 0x297   : >>> { %1531 = vrot.lane.b32.xlu0 %v918_v19, %s3282_s21  ;;  %v4699_v18 = vpop.permute.xlu2 %1820  ;;  %v1135_v19 = vpop.f32.mrf.mxu1 }
 0x298   : >>> { %6025 = vst [vmem:[#allocation67_spill] sm:$0xff] %v4699_v18 }
 0x299   : >>> { %v4701_v40 = vpop.permute.xlu0 %1999 }
 0x29a   : >>> { %6026 = vst [vmem:[#allocation68_spill] sm:$0xff] %v4701_v40 }
 0x29b   : >>> { %1480 = vrot.lane.b32.xlu1 %v1022_v58, %s3281_s20  ;;  %v927_v18 = vpop.f32.mrf.mxu3 }
 0x29c   : >>> { %v1031_v58 = vpop.f32.mrf.mxu0 }
 0x29d   : >>> { %v4704_v10 = vpop.permute.xlu1 %2054  ;;  %1488 = vrot.lane.b32.xlu2 %v1236_v46, %s3281_s20  ;;  %v1245_v46 = vpop.f32.mrf.mxu2 }
 0x29e   : >>> { %6027 = vst [vmem:[#allocation69_spill] sm:$0xff] %v4704_v10 }
 0x29f   : >>> { %1484 = vrot.lane.b32.xlu0 %v1129_v24, %s3281_s20  ;;  %v4708_v13 = vpop.permute.xlu2 %1879  ;;  %v1138_v24 = vpop.f32.mrf.mxu1 }
 0x2a0   : >>> { %6028 = vst [vmem:[#allocation70_spill] sm:$0xff] %v4708_v13 }
 0x2a1   : >>> { %v4710_v17 = vpop.permute.xlu0 %1763 }
 0x2a2   : >>> { %6029 = vst [vmem:[#allocation71_spill] sm:$0xff] %v4710_v17 }
 0x2a3   : >>> { %1533 = vrot.lane.b32.xlu1 %v921_v57, %s3282_s21  ;;  %v930_v57 = vpop.f32.mrf.mxu3 }
 0x2a5   : >>> { %v4713_v40 = vpop.permute.xlu1 %1818  ;;  %1535 = vrot.lane.b32.xlu2 %v1025_v2, %s3282_s21  ;;  %v1034_v2 = vpop.f32.mrf.mxu0 }
 0x2a6   : >>> { %6030 = vst [vmem:[#allocation72_spill] sm:$0xff] %v4713_v40 }
 0x2a7   : >>> { %1543 = vrot.lane.b32.xlu0 %v1239_v0, %s3282_s21  ;;  %v4717_v10 = vpop.permute.xlu2 %1319  ;;  %v1248_v0 = vpop.f32.mrf.mxu2 }
 0x2a9   : >>> { %v4719_v53 = vpop.permute.xlu0 %1822 }
 0x2aa   : >>> { %6031 = vst [vmem:[#allocation73_spill] sm:$0xff] %v4719_v53  ;;  %v1141_v53 = vpop.f32.mrf.mxu1 }
 0x2ab   : >>> { %1539 = vrot.lane.b32.xlu1 %v1132_v5, %s3282_s21  ;;  %v933_v55 = vpop.f32.mrf.mxu3 }
 0x2ad   : >>> { %v4722_v13 = vpop.permute.xlu1 %1824  ;;  %1588 = vrot.lane.b32.xlu2 %v924_v43, %s3283_s22  ;;  %v1037_v37 = vpop.f32.mrf.mxu0 }
 0x2af   : >>> { %1537 = vrot.lane.b32.xlu0 %v1028_v36, %s3282_s21  ;;  %v1326_v40 = vpop.permute.xlu2 %1325  ;;  %v1251_v36 = vpop.f32.mrf.mxu2 }
 0x2b1   : >>> { %v4726_v17 = vpop.permute.xlu0 %1828 }
 0x2b2   : >>> { %6032 = vst [vmem:[#allocation74_spill] sm:$0xff] %v4726_v17 }
 0x2b3   : >>> { %1545 = vrot.lane.b32.xlu1 %v1242_v29, %s3282_s21  ;;  %v4745_v61 = vpop.f32.mrf.mxu3 }
 0x2b4   : >>> { %6035 = vst [vmem:[#allocation77_spill] sm:$0xff] %v4745_v61 }
 0x2b5   : >>> { %v1318_v48 = vpop.permute.xlu1 %1317  ;;  %1541 = vrot.lane.b32.xlu2 %v1135_v19, %s3282_s21  ;;  %v1144_v19 = vpop.f32.mrf.mxu1 }
 0x2b7   : >>> { %1590 = vrot.lane.b32.xlu0 %v927_v18, %s3283_s22  ;;  %v4731_v5 = vpop.permute.xlu2 %1331 }
 0x2b9   : >>> { %v4733_v43 = vpop.permute.xlu0 %1875 }
 0x2ba   : >>> { %6033 = vst [vmem:[#allocation75_spill] sm:$0xff] %v4733_v43 }
 0x2bb   : >>> { %1592 = vrot.lane.b32.xlu1 %v1031_v58, %s3283_s22  ;;  %v1040_v58 = vpop.f32.mrf.mxu0  ;;  %v4771_v60 = vpop.f32.mrf.mxu3 }
 0x2bc   : >>> { %6036 = vst [vmem:[#allocation78_spill] sm:$0xff] %v4771_v60 }
 0x2bd   : >>> { %v4736_v49 = vpop.permute.xlu1 %1883  ;;  %1600 = vrot.lane.b32.xlu2 %v1245_v46, %s3283_s22 }
 0x2be   : >>> { %6034 = vst [vmem:[#allocation76_spill] sm:$0xff] %v4736_v49 }
 0x2bf   : >>> { %1596 = vrot.lane.b32.xlu0 %v1138_v24, %s3283_s22  ;;  %v1365_v29 = vpop.permute.xlu2 %1364  ;;  %v1254_v24 = vpop.f32.mrf.mxu2 }
 0x2c1   : >>> { %v1322_v18 = vpop.permute.xlu0 %1321 }
 0x2c2   : >>> { %v1336_v33 = vsel %vm1333_vm5, %v1322_v18, %v1326_v40  ;;  %v1338_v43 = vsel %vm1333_vm5, %v1318_v48, %v1322_v18  ;;  %v1340_v18 = vsel %vm1333_vm5, %v4274_v51, %v1318_v48 }
 0x2c3   : >>> { %1645 = vrot.lane.b32.xlu1 %v930_v57, %s3284_s23 }
 0x2c5   : >>> { %v1330_v49 = vpop.permute.xlu1 %1329  ;;  %1594 = vrot.lane.b32.xlu2 %v1034_v2, %s3283_s22 }
 0x2c6   : >>> { %v1334_v46 = vsel %vm1333_vm5, %v1326_v40, %v1330_v49  ;;  %v1147_v40 = vpop.f32.mrf.mxu1 }
 0x2c7   : >>> { %1602 = vrot.lane.b32.xlu0 %v1248_v0, %s3283_s22  ;;  %v4752_v12 = vpop.permute.xlu2 %1417 }
 0x2c8   : >>> { %v1440_v48 = vsel %vm1433_vm7, %v4417_v11, %v4752_v12 }
 0x2c9   : >>> { %v1361_v52 = vpop.permute.xlu0 %1360 }
 0x2ca   : >>> { %v1381_v57 = vsel %vm1376_vm6, %v1361_v52, %v1365_v29  ;;  %v1383_v2 = vsel %vm1376_vm6, %v4369_v4, %v1361_v52 }
 0x2cb   : >>> { %v1395_v0 = vadd.f32 %v1383_v2, %v1340_v18  ;;  %v4764_v61 = vadd.f32 %v1381_v57, %v1338_v43  ;;  %1598 = vrot.lane.b32.xlu1 %v1141_v53, %s3283_s22  ;;  %v4779_v43 = vpop.f32.mrf.mxu0  ;;  %v4782_v18 = vpop.f32.mrf.mxu2 }
 0x2cc   : >>> { %6037 = vst [vmem:[#allocation79_spill] sm:$0xff] %v4779_v43  ;;  %v942_v43 = vpop.f32.mrf.mxu3 }
 0x2cd   : >>> { %v4773_v7 = vadd.f32 %v1440_v48, %v1395_v0  ;;  %v1324_v54 = vpop.permute.xlu1 %1323  ;;  %1647 = vrot.lane.b32.xlu2 %v933_v55, %s3284_s23  ;;  %6038 = vst [vmem:[#allocation80_spill] sm:$0xff] %v4782_v18 }
 0x2ce   : >>> { %v1339_v52 = vsel %vm1333_vm5, %v4717_v10, %v1324_v54  ;;  %v4790_v55 = vpop.f32.mrf.mxu1 }
 0x2cf   : >>> { %1649 = vrot.lane.b32.xlu0 %v1037_v37, %s3284_s23  ;;  %v1371_v53 = vpop.permute.xlu2 %1370  ;;  %6039 = vst [vmem:[#allocation81_spill] sm:$0xff] %v4790_v55  ;;  %v1341_v37 = vsel %vm1333_vm5, %v4335_v63, %v4717_v10 }
 0x2d1   : >>> { %v1328_v57 = vpop.permute.xlu0 %1327 }
 0x2d2   : >>> { %v1335_v2 = vsel %vm1333_vm5, %v1328_v57, %v4731_v5  ;;  %v1337_v0 = vsel %vm1333_vm5, %v1324_v54, %v1328_v57 }
 0x2d3   : >>> { %1657 = vrot.lane.b32.xlu1 %v1251_v36, %s3284_s23  ;;  %v4801_v36 = vpop.f32.mrf.mxu0  ;;  %v4809_v55 = vpop.f32.mrf.mxu2 }
 0x2d4   : >>> { %6040 = vst [vmem:[#allocation82_spill] sm:$0xff] %v4801_v36 }
 0x2d5   : >>> { %v1363_v48 = vpop.permute.xlu1 %1362  ;;  %1653 = vrot.lane.b32.xlu2 %v1144_v19, %s3284_s23  ;;  %v1346_v19 = vsel %vm1333_vm5, %v1330_v49, %v4305_v50  ;;  %6041 = vst [vmem:[#allocation83_spill] sm:$0xff] %v4809_v55  ;;  %v945_v55 = vpop.f32.mrf.mxu3 }
 0x2d6   : >>> { %v1384_v60 = vsel %vm1376_vm6, %v4337_v1, %v1363_v48  ;;  %v4822_v50 = vpop.f32.mrf.mxu1 }
 0x2d7   : >>> { %v1402_v18 = vadd.f32 %v1384_v60, %v1341_v37  ;;  %1655 = vrot.lane.b32.xlu0 %v1147_v40, %s3284_s23  ;;  %v1430_v54 = vpop.permute.xlu2 %1429  ;;  %6042 = vst [vmem:[#allocation84_spill] sm:$0xff] %v4822_v50 }
 0x2d8   : >>> { %v1446_v60 = vsel %vm1433_vm7, %v1430_v54, %v4356_v8 }
 0x2d9   : >>> { %v1373_v57 = vpop.permute.xlu0 %1372 }
 0x2da   : >>> { %v1389_v10 = vsel %vm1376_vm6, %v1373_v57, %v4358_v62 }
 0x2db   : >>> { %v1392_v63 = vadd.f32 %v1389_v10, %v1346_v19  ;;  %1651 = vrot.lane.b32.xlu1 %v1040_v58, %s3284_s23 }
 0x2dd   : >>> { %v4815_v40 = vadd.f32 %v1446_v60, %v1392_v63  ;;  %v1369_v37 = vpop.permute.xlu1 %1368  ;;  %1659 = vrot.lane.b32.xlu2 %v1254_v24, %s3284_s23 }
 0x2de   : >>> { %v1377_v49 = vsel %vm1376_vm6, %v1369_v37, %v1373_v57  ;;  %v1379_v36 = vsel %vm1376_vm6, %v1365_v29, %v1369_v37  ;;  %v1049_v57 = vpop.f32.mrf.mxu0  ;;  %v1263_v29 = vpop.f32.mrf.mxu2 }
 0x2df   : >>> { %v1391_v19 = vadd.f32 %v1377_v49, %v1334_v46  ;;  %v1397_v10 = vadd.f32 %v1379_v36, %v1336_v33  ;;  %1716 = vrot.lane.b32.xlu0 %v942_v43, %s3285_s24  ;;  %v4825_v58 = vpop.permute.xlu2 %1423  ;;  %v1347_v46 = vsel %vm1333_vm5, %v4731_v5, %v4290_v14  ;;  %v1156_v36 = vpop.f32.mrf.mxu1 }
 0x2e1   : >>> { %v1367_v63 = vpop.permute.xlu0 %1366 }
 0x2e2   : >>> { %v1380_v60 = vsel %vm1376_vm6, %v1367_v63, %v1371_v53  ;;  %v1382_v24 = vsel %vm1376_vm6, %v1363_v48, %v1367_v63 }
 0x2e3   : >>> { %v1403_v8 = vadd.f32 %v1382_v24, %v1339_v52  ;;  %v4831_v62 = vadd.f32 %v1380_v60, %v1337_v0  ;;  %1718 = vrot.lane.b32.xlu1 %v945_v55, %s3285_s24 }
 0x2e5   : >>> { %v1375_v33 = vpop.permute.xlu1 %1374  ;;  %1720 = vrot.lane.b32.xlu2 %v1049_v57, %s3285_s24 }
 0x2e6   : >>> { %v1378_v43 = vsel %vm1376_vm6, %v1371_v53, %v1375_v33  ;;  %v1390_v52 = vsel %vm1376_vm6, %v1375_v33, %v4392_v25  ;;  %v948_v53 = vpop.f32.mrf.mxu3  ;;  %v1052_v24 = vpop.f32.mrf.mxu0 }
 0x2e7   : >>> { %v1398_v0 = vadd.f32 %v1378_v43, %v1335_v2  ;;  %v1399_v48 = vadd.f32 %v1390_v52, %v1347_v46  ;;  %1728 = vrot.lane.b32.xlu0 %v1263_v29, %s3285_s24  ;;  %v4845_v55 = vpop.permute.xlu2 %1476  ;;  %v1266_v46 = vpop.f32.mrf.mxu2 }
 0x2e8   : >>> { %v1498_v60 = vsel %vm1490_vm8, %v4485_v45, %v4845_v55 }
 0x2e9   : >>> { %v1420_v37 = vpop.permute.xlu0 %1419 }
 0x2ea   : >>> { %v1439_v49 = vsel %vm1433_vm7, %v1420_v37, %v4825_v58  ;;  %v1441_v5 = vsel %vm1433_vm7, %v4443_v32, %v1420_v37  ;;  %v1159_v37 = vpop.f32.mrf.mxu1 }
 0x2eb   : >>> { %v1459_v63 = vadd.f32 %v1441_v5, %v1402_v18  ;;  %v4854_v2 = vadd.f32 %v1439_v49, %v1403_v8  ;;  %1724 = vrot.lane.b32.xlu1 %v1156_v36, %s3285_s24 }
 0x2ed   : >>> { %v4861_v57 = vadd.f32 %v1498_v60, %v1459_v63  ;;  %v1422_v29 = vpop.permute.xlu1 %1421  ;;  %1773 = vrot.lane.b32.xlu2 %v948_v53, %s3286_s28 }
 0x2ee   : >>> { %v1438_v33 = vsel %vm1433_vm7, %v4752_v12, %v1422_v29  ;;  %v951_v12 = vpop.f32.mrf.mxu3  ;;  %v1055_v60 = vpop.f32.mrf.mxu0 }
 0x2ef   : >>> { %v1453_v8 = vadd.f32 %v1438_v33, %v4764_v61  ;;  %1722 = vrot.lane.b32.xlu0 %v1052_v24, %s3285_s24  ;;  %v4869_v18 = vpop.permute.xlu2 %1482  ;;  %v1269_v24 = vpop.f32.mrf.mxu2 }
 0x2f1   : >>> { %v1426_v43 = vpop.permute.xlu0 %1425 }
 0x2f2   : >>> { %v1434_v52 = vsel %vm1433_vm7, %v1426_v43, %v1430_v54  ;;  %v1436_v36 = vsel %vm1433_vm7, %v1422_v29, %v1426_v43  ;;  %v1162_v33 = vpop.f32.mrf.mxu1 }
 0x2f3   : >>> { %v1448_v49 = vadd.f32 %v1434_v52, %v1391_v19  ;;  %v1454_v5 = vadd.f32 %v1436_v36, %v1397_v10  ;;  %1730 = vrot.lane.b32.xlu1 %v1266_v46, %s3285_s24  ;;  %v1559_v52 = vsel %vm1547_vm9, %v4545_v28, %v4536_v20 }
 0x2f5   : >>> { %v1475_v53 = vpop.permute.xlu1 %1474  ;;  %1726 = vrot.lane.b32.xlu2 %v1159_v37, %s3285_s24 }
 0x2f6   : >>> { %v1497_v61 = vsel %vm1490_vm8, %v4415_v34, %v1475_v53 }
 0x2f7   : >>> { %v4881_v63 = vadd.f32 %v1497_v61, %v4773_v7  ;;  %1775 = vrot.lane.b32.xlu0 %v951_v12, %s3286_s28  ;;  %v4884_v54 = vpop.permute.xlu2 %1488 }
 0x2f8   : >>> { %v1504_v7 = vsel %vm1490_vm8, %v4884_v54, %v4432_v56 }
 0x2f9   : >>> { %v1432_v19 = vpop.permute.xlu0 %1431 }
 0x2fa   : >>> { %v1447_v10 = vsel %vm1433_vm7, %v1432_v19, %v4434_v38 }
 0x2fb   : >>> { %v1456_v29 = vadd.f32 %v1447_v10, %v1399_v48  ;;  %1777 = vrot.lane.b32.xlu1 %v1055_v60, %s3286_s28  ;;  %v954_v10 = vpop.f32.mrf.mxu3 }
 0x2fd   : >>> { %v1513_v46 = vadd.f32 %v1504_v7, %v1456_v29  ;;  %v1428_v43 = vpop.permute.xlu1 %1427  ;;  %1785 = vrot.lane.b32.xlu2 %v1269_v24, %s3286_s28  ;;  %v1673_v29 = vsel %vm1661_vm11, %v4568_v23, %v4625_v30 }
 0x2fe   : >>> { %v1435_v48 = vsel %vm1433_vm7, %v1428_v43, %v1432_v19  ;;  %v1437_v36 = vsel %vm1433_vm7, %v4825_v58, %v1428_v43  ;;  %v1385_v19 = vsel %vm1376_vm6, %v4320_v22, %v4369_v4  ;;  %v1616_v58 = vsel %vm1604_vm10, %v4587_v41, %v4517_v42 }
 0x2ff   : >>> { %v1570_v37 = vadd.f32 %v1559_v52, %v1513_v46  ;;  %v4906_v12 = vadd.f32 %v1435_v48, %v1398_v0  ;;  %v4909_v61 = vadd.f32 %v1437_v36, %v4831_v62  ;;  %1781 = vrot.lane.b32.xlu0 %v1162_v33, %s3286_s28  ;;  %v4912_v60 = vpop.permute.xlu2 %1535  ;;  %v1342_v62 = vsel %vm1333_vm5, %v4317_v16, %v4274_v51  ;;  %v1058_v33 = vpop.f32.mrf.mxu0 }
 0x300   : >>> { %v1442_v4 = vsel %vm1433_vm7, %v4426_v31, %v4417_v11  ;;  %v1394_v46 = vadd.f32 %v1385_v19, %v1342_v62  ;;  %v1272_v11 = vpop.f32.mrf.mxu2 }
 0x301   : >>> { %v1627_v0 = vadd.f32 %v1616_v58, %v1570_v37  ;;  %v1479_v24 = vpop.permute.xlu0 %1478 }
 0x302   : >>> { %v1493_v7 = vsel %vm1490_vm8, %v1479_v24, %v4869_v18  ;;  %v1495_v51 = vsel %vm1490_vm8, %v1475_v53, %v1479_v24  ;;  %v1451_v36 = vadd.f32 %v1442_v4, %v1394_v46  ;;  %v1499_v53 = vsel %vm1490_vm8, %v4468_v35, %v4415_v34  ;;  %v1165_v24 = vpop.f32.mrf.mxu1  ;;  %v6043_v46 = vld [vmem:[#allocation40_spill] sm:$0xff] }
 0x303   : >>> { %v1684_v43 = vadd.f32 %v1673_v29, %v1627_v0  ;;  %v4940_v52 = vadd.f32 %v1495_v51, %v1453_v8  ;;  %v4942_v48 = vadd.f32 %v1493_v7, %v1454_v5  ;;  %1830 = vrot.lane.b32.xlu1 %v954_v10, %s3287_s29  ;;  %v1742_v8 = vsel %vm1732_vm12, %v4675_v59, %v4616_v39 }
 0x304   : >>> { %v1558_v0 = vsel %vm1547_vm9, %v4519_v44, %v4449_v26  ;;  %v1508_v4 = vadd.f32 %v1499_v53, %v1451_v36  ;;  %v1615_v7 = vsel %vm1604_vm10, %v4500_v15, %v4562_v3  ;;  %v1856_v51 = vsel %vm1846_vm14, %v4722_v13, %v4726_v17 }
 0x305   : >>> { %v1487_v37 = vpop.permute.xlu1 %1486  ;;  %1779 = vrot.lane.b32.xlu2 %v1058_v33, %s3286_s28  ;;  %v1698_v58 = vadd.f32 %v1684_v43, %v4379_v9 }
 0x306   : >>> { %v1491_v5 = vsel %vm1490_vm8, %v4869_v18, %v1487_v37  ;;  %v1503_v19 = vsel %vm1490_vm8, %v1487_v37, %v4460_v21  ;;  %v1799_v18 = vsel %vm1789_vm13, %v4660_v27, %v4694_v6 }
 0x307   : >>> { %v1505_v9 = vadd.f32 %v1491_v5, %v1448_v49  ;;  %v1506_v10 = vadd.f32 %v1503_v19, %v4815_v40  ;;  %1787 = vrot.lane.b32.xlu0 %v1272_v11, %s3286_s28  ;;  %v4965_v34 = vpop.permute.xlu2 %1588  ;;  %v1755_v62 = vadd.f32 %v1742_v8, %v1698_v58  ;;  %v957_v11 = vpop.f32.mrf.mxu3  ;;  %v6045_v8 = vld [vmem:[#allocation50_spill] sm:$0xff]  ;;  %v6046_v5 = vld [vmem:[#allocation51_spill] sm:$0xff] }
 0x308   : >>> { %v1672_v19 = vsel %vm1661_vm11, %v6046_v5, %v6045_v8 }
 0x309   : >>> { %v1563_v40 = vadd.f32 %v1558_v0, %v1506_v10  ;;  %v1532_v49 = vpop.permute.xlu0 %1531  ;;  %v1812_v29 = vadd.f32 %v1799_v18, %v1755_v62  ;;  %v6047_v10 = vld [vmem:[#allocation44_spill] sm:$0xff]  ;;  %v1061_v0 = vpop.f32.mrf.mxu0 }
 0x30a   : >>> { %v1552_v33 = vsel %vm1547_vm9, %v1532_v49, %v4912_v60  ;;  %v1554_v43 = vsel %vm1547_vm9, %v6043_v46, %v1532_v49  ;;  %v1611_v62 = vsel %vm1604_vm10, %v6047_v10, %v4965_v34 }
 0x30b   : >>> { %v1620_v36 = vadd.f32 %v1615_v7, %v1563_v40  ;;  %v1565_v37 = vadd.f32 %v1554_v43, %v1508_v4  ;;  %v4991_v58 = vadd.f32 %v1552_v33, %v4881_v63  ;;  %1783 = vrot.lane.b32.xlu1 %v1165_v24, %s3286_s28  ;;  %v4994_v53 = vadd.f32 %v1856_v51, %v1812_v29  ;;  %v6048_v29 = vld [vmem:[#allocation23_spill] sm:$0xff]  ;;  %v6049_v51 = vld [vmem:[#allocation56_spill] sm:$0xff]  ;;  %v6050_v33 = vld [vmem:[#allocation49_spill] sm:$0xff] }
 0x30c   : >>> { %v1741_v43 = vsel %vm1732_vm12, %v6050_v33, %v6049_v51 }
 0x30d   : >>> { %6044 = vst [vmem:[#allocation40_spill] sm:$0xff] %v4994_v53  ;;  %v1677_v18 = vadd.f32 %v1672_v19, %v1620_v36  ;;  %v5004_v4 = vadd.f32 %v1611_v62, %v1565_v37  ;;  %v1481_v63 = vpop.permute.xlu1 %1480  ;;  %1832 = vrot.lane.b32.xlu2 %v957_v11, %s3287_s29  ;;  %v1275_v36 = vpop.f32.mrf.mxu2  ;;  %v6051_v11 = vld [vmem:[#allocation65_spill] sm:$0xff]  ;;  %v6052_v62 = vld [vmem:[#allocation63_spill] sm:$0xff] }
 0x30e   : >>> { %v1496_v24 = vsel %vm1490_vm8, %v4845_v55, %v1481_v63  ;;  %v1798_v55 = vsel %vm1789_vm13, %v6052_v62, %v6051_v11  ;;  %v6054_v53 = vld [vmem:[#allocation73_spill] sm:$0xff]  ;;  %v6061_v11 = vld [vmem:[#allocation35_spill] sm:$0xff] }
 0x30f   : >>> { %v1517_v40 = vadd.f32 %v1496_v24, %v4854_v2  ;;  %1834 = vrot.lane.b32.xlu0 %v1061_v0, %s3287_s29  ;;  %v1542_v49 = vpop.permute.xlu2 %1541  ;;  %v1691_v7 = vadd.f32 %v1677_v18, %v6048_v29  ;;  %v1168_v18 = vpop.f32.mrf.mxu1 }
 0x310   : >>> { %v960_v6 = vpop.f32.mrf.mxu3 }
 0x311   : >>> { %v1485_v37 = vpop.permute.xlu0 %1484  ;;  %v1748_v19 = vadd.f32 %v1741_v43, %v1691_v7  ;;  %v6053_v43 = vld [vmem:[#allocation62_spill] sm:$0xff] }
 0x312   : >>> { %v1492_v2 = vsel %vm1490_vm8, %v1485_v37, %v4884_v54  ;;  %v1494_v0 = vsel %vm1490_vm8, %v1481_v63, %v1485_v37  ;;  %v1855_v17 = vsel %vm1846_vm14, %v6054_v53, %v6053_v43 }
 0x313   : >>> { %v1512_v24 = vadd.f32 %v1492_v2, %v4906_v12  ;;  %v1518_v29 = vadd.f32 %v1494_v0, %v4909_v61  ;;  %1842 = vrot.lane.b32.xlu1 %v1275_v36, %s3287_s29  ;;  %v1805_v7 = vadd.f32 %v1798_v55, %v1748_v19  ;;  %v1064_v12 = vpop.f32.mrf.mxu0 }
 0x315   : >>> { %v1534_v50 = vpop.permute.xlu1 %1533  ;;  %1838 = vrot.lane.b32.xlu2 %v1168_v18, %s3287_s29  ;;  %v5034_v54 = vadd.f32 %v1855_v17, %v1805_v7  ;;  %v1278_v37 = vpop.f32.mrf.mxu2  ;;  %v6056_v7 = vld [vmem:[#allocation32_spill] sm:$0xff] }
 0x317   : >>> { %6055 = vst [vmem:[#allocation50_spill] sm:$0xff] %v5034_v54  ;;  %1887 = vrot.lane.b32.xlu0 %v960_v6, %s3275_s13  ;;  %v5037_v63 = vpop.permute.xlu2 %1600  ;;  %v1171_v55 = vpop.f32.mrf.mxu1 }
 0x318   : >>> { %v1617_v17 = vsel %vm1604_vm10, %v5037_v63, %v4500_v15 }
 0x319   : >>> { %v1544_v61 = vpop.permute.xlu0 %1543 }
 0x31a   : >>> { %v1560_v36 = vsel %vm1547_vm9, %v1544_v61, %v4519_v44 }
 0x31b   : >>> { %v1562_v19 = vadd.f32 %v1560_v36, %v1505_v9  ;;  %1836 = vrot.lane.b32.xlu1 %v1064_v12, %s3287_s29  ;;  %v1386_v12 = vsel %vm1376_vm6, %v6056_v7, %v4337_v1  ;;  %v963_v36 = vpop.f32.mrf.mxu3 }
 0x31d   : >>> { %v5047_v2 = vadd.f32 %v1617_v17, %v1562_v19  ;;  %v1540_v6 = vpop.permute.xlu1 %1539  ;;  %1844 = vrot.lane.b32.xlu2 %v1278_v37, %s3287_s29  ;;  %v6058_v19 = vld [vmem:[#allocation21_spill] sm:$0xff] }
 0x31e   : >>> { %v1548_v0 = vsel %vm1547_vm9, %v1540_v6, %v1544_v61  ;;  %v1550_v44 = vsel %vm1547_vm9, %v4912_v60, %v1540_v6  ;;  %v6057_v61 = vld [vmem:[#allocation20_spill] sm:$0xff]  ;;  %v1067_v6 = vpop.f32.mrf.mxu0 }
 0x31f   : >>> { %v1567_v9 = vadd.f32 %v1550_v44, %v4940_v52  ;;  %v1568_v18 = vadd.f32 %v1548_v0, %v4942_v48  ;;  %1840 = vrot.lane.b32.xlu0 %v1171_v55, %s3287_s29  ;;  %v5058_v15 = vpop.permute.xlu2 %1594  ;;  %v1343_v60 = vsel %vm1333_vm5, %v6058_v19, %v6057_v61  ;;  %v6059_v52 = vld [vmem:[#allocation31_spill] sm:$0xff]  ;;  %v6060_v61 = vld [vmem:[#allocation38_spill] sm:$0xff] }
 0x320   : >>> { %v1443_v48 = vsel %vm1433_vm7, %v6059_v52, %v4443_v32  ;;  %v1401_v1 = vadd.f32 %v1386_v12, %v1343_v60  ;;  %v1500_v54 = vsel %vm1490_vm8, %v6060_v61, %v4485_v45  ;;  %v1281_v32 = vpop.f32.mrf.mxu2  ;;  %v1555_v12 = vsel %vm1547_vm9, %v6061_v11, %v1534_v50 }
 0x321   : >>> { %v1538_v37 = vpop.permute.xlu0 %1537 }
 0x322   : >>> { %v1551_v17 = vsel %vm1547_vm9, %v1538_v37, %v1542_v49  ;;  %v1553_v55 = vsel %vm1547_vm9, %v1534_v50, %v1538_v37  ;;  %v1458_v43 = vadd.f32 %v1443_v48, %v1401_v1  ;;  %v1174_v48 = vpop.f32.mrf.mxu1 }
 0x323   : >>> { %v1573_v0 = vadd.f32 %v1553_v55, %v4861_v57  ;;  %v5077_v44 = vadd.f32 %v1551_v17, %v1517_v40  ;;  %1889 = vrot.lane.b32.xlu1 %v963_v36, %s3275_s13  ;;  %v966_v1 = vpop.f32.mrf.mxu3 }
 0x324   : >>> { %v1515_v36 = vadd.f32 %v1500_v54, %v1458_v43 }
 0x325   : >>> { %v1546_v39 = vpop.permute.xlu1 %1545  ;;  %1891 = vrot.lane.b32.xlu2 %v1067_v6, %s3275_s13  ;;  %v6062_v6 = vld [vmem:[#allocation46_spill] sm:$0xff] }
 0x326   : >>> { %v1549_v57 = vsel %vm1547_vm9, %v1542_v49, %v1546_v39  ;;  %v1561_v40 = vsel %vm1547_vm9, %v1546_v39, %v4545_v28  ;;  %v1572_v17 = vadd.f32 %v1555_v12, %v1515_v36  ;;  %v1070_v43 = vpop.f32.mrf.mxu0 }
 0x327   : >>> { %v1569_v37 = vadd.f32 %v1561_v40, %v1512_v24  ;;  %v1575_v60 = vadd.f32 %v1549_v57, %v1518_v29  ;;  %1899 = vrot.lane.b32.xlu0 %v1281_v32, %s3275_s13  ;;  %v5094_v45 = vpop.permute.xlu2 %1647  ;;  %v6063_v24 = vld [vmem:[#allocation53_spill] sm:$0xff] }
 0x328   : >>> { %v1669_v29 = vsel %vm1661_vm11, %v6063_v24, %v5094_v45  ;;  %v1284_v40 = vpop.f32.mrf.mxu2 }
 0x329   : >>> { %v1591_v55 = vpop.permute.xlu0 %1590 }
 0x32a   : >>> { %v1610_v50 = vsel %vm1604_vm10, %v1591_v55, %v5058_v15  ;;  %v1612_v49 = vsel %vm1604_vm10, %v6062_v6, %v1591_v55  ;;  %v1177_v55 = vpop.f32.mrf.mxu1 }
 0x32b   : >>> { %v1629_v28 = vadd.f32 %v1612_v49, %v1572_v17  ;;  %v5102_v39 = vadd.f32 %v1610_v50, %v1573_v0  ;;  %1895 = vrot.lane.b32.xlu1 %v1174_v48, %s3275_s13 }
 0x32d   : >>> { %v5109_v54 = vadd.f32 %v1669_v29, %v1629_v28  ;;  %v1593_v32 = vpop.permute.xlu1 %1592  ;;  %1944 = vrot.lane.b32.xlu2 %v966_v1, %s3276_s14  ;;  %v6064_v1 = vld [vmem:[#allocation42_spill] sm:$0xff] }
 0x32e   : >>> { %v1609_v12 = vsel %vm1604_vm10, %v4965_v34, %v1593_v32  ;;  %v969_v34 = vpop.f32.mrf.mxu3 }
 0x32f   : >>> { %v1623_v0 = vadd.f32 %v1609_v12, %v4991_v58  ;;  %1893 = vrot.lane.b32.xlu0 %v1070_v43, %s3275_s13  ;;  %v5117_v57 = vpop.permute.xlu2 %1653 }
 0x331   : >>> { %v1597_v36 = vpop.permute.xlu0 %1596 }
 0x332   : >>> { %v1605_v48 = vsel %vm1604_vm10, %v1597_v36, %v5037_v63  ;;  %v1607_v17 = vsel %vm1604_vm10, %v1593_v32, %v1597_v36  ;;  %v1287_v32 = vpop.f32.mrf.mxu2 }
 0x333   : >>> { %v1624_v50 = vadd.f32 %v1607_v17, %v1567_v9  ;;  %v5124_v49 = vadd.f32 %v1605_v48, %v1568_v18  ;;  %1901 = vrot.lane.b32.xlu1 %v1284_v40, %s3275_s13  ;;  %v1073_v9 = vpop.f32.mrf.mxu0  ;;  %v1180_v40 = vpop.f32.mrf.mxu1  ;;  %v6065_v17 = vld [vmem:[#allocation25_spill] sm:$0xff] }
 0x335   : >>> { %v1646_v58 = vpop.permute.xlu1 %1645  ;;  %1897 = vrot.lane.b32.xlu2 %v1177_v55, %s3275_s13  ;;  %v1387_v55 = vsel %vm1376_vm6, %v6065_v17, %v4320_v22 }
 0x336   : >>> { %v1668_v28 = vsel %vm1661_vm11, %v6064_v1, %v1646_v58 }
 0x337   : >>> { %v5132_v29 = vadd.f32 %v1668_v28, %v5004_v4  ;;  %1946 = vrot.lane.b32.xlu0 %v969_v34, %s3276_s14  ;;  %v5135_v63 = vpop.permute.xlu2 %1659  ;;  %v6066_v34 = vld [vmem:[#allocation30_spill] sm:$0xff] }
 0x338   : >>> { %v1675_v4 = vsel %vm1661_vm11, %v5135_v63, %v4568_v23 }
 0x339   : >>> { %v1603_v18 = vpop.permute.xlu0 %1602 }
 0x33a   : >>> { %v1618_v43 = vsel %vm1604_vm10, %v1603_v18, %v4587_v41  ;;  %v1388_v41 = vsel %vm1376_vm6, %v4392_v25, %v6056_v7  ;;  %v6068_v7 = vld [vmem:[#allocation24_spill] sm:$0xff] }
 0x33b   : >>> { %v1626_v12 = vadd.f32 %v1618_v43, %v1569_v37  ;;  %1948 = vrot.lane.b32.xlu1 %v1073_v9, %s3276_s14 }
 0x33d   : >>> { %v1683_v36 = vadd.f32 %v1675_v4, %v1626_v12  ;;  %v1599_v48 = vpop.permute.xlu1 %1598  ;;  %1956 = vrot.lane.b32.xlu2 %v1287_v32, %s3276_s14  ;;  %v6067_v32 = vld [vmem:[#allocation18_spill] sm:$0xff]  ;;  %v972_v12 = vpop.f32.mrf.mxu3 }
 0x33e   : >>> { %v1606_v37 = vsel %vm1604_vm10, %v1599_v48, %v1603_v18  ;;  %v1608_v23 = vsel %vm1604_vm10, %v5058_v15, %v1599_v48  ;;  %v1344_v25 = vsel %vm1333_vm5, %v6067_v32, %v4317_v16  ;;  %v1345_v15 = vsel %vm1333_vm5, %v4290_v14, %v6058_v19  ;;  %v6070_v19 = vld [vmem:[#allocation71_spill] sm:$0xff] }
 0x33f   : >>> { %v1697_v28 = vadd.f32 %v1683_v36, %v6066_v34  ;;  %v5161_v9 = vadd.f32 %v1608_v23, %v5077_v44  ;;  %v1632_v43 = vadd.f32 %v1606_v37, %v1575_v60  ;;  %1952 = vrot.lane.b32.xlu0 %v1180_v40, %s3276_s14  ;;  %v5164_v22 = vpop.permute.xlu2 %1720  ;;  %v1444_v44 = vsel %vm1433_vm7, %v6068_v7, %v4426_v31  ;;  %v6069_v60 = vld [vmem:[#allocation61_spill] sm:$0xff] }
 0x340   : >>> { %v1744_v18 = vsel %vm1732_vm12, %v6069_v60, %v4675_v59  ;;  %v1393_v4 = vadd.f32 %v1387_v55, %v1344_v25  ;;  %v1400_v40 = vadd.f32 %v1388_v41, %v1345_v15  ;;  %v1445_v16 = vsel %vm1433_vm7, %v4434_v38, %v6059_v52  ;;  %v1076_v38 = vpop.f32.mrf.mxu0  ;;  %v6072_v25 = vld [vmem:[#allocation47_spill] sm:$0xff] }
 0x341   : >>> { %v1754_v36 = vadd.f32 %v1744_v18, %v1697_v28  ;;  %v1650_v14 = vpop.permute.xlu0 %1649  ;;  %v1501_v31 = vsel %vm1490_vm8, %v4460_v21, %v4468_v35  ;;  %v1801_v59 = vsel %vm1789_vm13, %v6070_v19, %v4660_v27  ;;  %v6071_v21 = vld [vmem:[#allocation67_spill] sm:$0xff]  ;;  %v1290_v27 = vpop.f32.mrf.mxu2  ;;  %v1556_v32 = vsel %vm1547_vm9, %v4449_v26, %v6043_v46 }
 0x342   : >>> { %v1664_v48 = vsel %vm1661_vm11, %v1650_v14, %v5117_v57  ;;  %v1666_v17 = vsel %vm1661_vm11, %v1646_v58, %v1650_v14  ;;  %v1450_v52 = vadd.f32 %v1444_v44, %v1393_v4  ;;  %v1858_v35 = vsel %vm1846_vm14, %v6071_v21, %v4722_v13  ;;  %v1183_v58 = vpop.f32.mrf.mxu1  ;;  %v6073_v13 = vld [vmem:[#allocation39_spill] sm:$0xff] }
 0x343   : >>> { %v1811_v55 = vadd.f32 %v1801_v59, %v1754_v36  ;;  %v5199_v41 = vadd.f32 %v1666_v17, %v1623_v0  ;;  %v5201_v37 = vadd.f32 %v1664_v48, %v1624_v50  ;;  %2001 = vrot.lane.b32.xlu1 %v972_v12, %s3278_s17  ;;  %v1457_v23 = vadd.f32 %v1445_v16, %v1400_v40  ;;  %v6075_v12 = vld [vmem:[#allocation37_spill] sm:$0xff]  ;;  %v6076_v16 = vld [vmem:[#allocation26_spill] sm:$0xff]  ;;  %v6078_v59 = vld [vmem:[#allocation68_spill] sm:$0xff] }
 0x344   : >>> { %v1507_v34 = vadd.f32 %v1501_v31, %v1450_v52  ;;  %v1502_v0 = vsel %vm1490_vm8, %v4432_v56, %v6060_v61  ;;  %v1913_v15 = vsel %vm1903_vm0, %v6073_v13, %v6072_v25  ;;  %v6079_v48 = vld [vmem:[#allocation48_spill] sm:$0xff] }
 0x345   : >>> { %v1868_v50 = vadd.f32 %v1858_v35, %v1811_v55  ;;  %v1658_v28 = vpop.permute.xlu1 %1657  ;;  %1950 = vrot.lane.b32.xlu2 %v1076_v38, %s3276_s14  ;;  %v1514_v18 = vadd.f32 %v1502_v0, %v1457_v23  ;;  %v2027_v17 = vsel %vm2017_vm2, %v6079_v48, %v6078_v59 }
 0x346   : >>> { %v1662_v7 = vsel %vm1661_vm11, %v5117_v57, %v1658_v28  ;;  %v1674_v56 = vsel %vm1661_vm11, %v1658_v28, %v6046_v5  ;;  %v1613_v57 = vsel %vm1604_vm10, %v4562_v3, %v6047_v10  ;;  %v6074_v5 = vld [vmem:[#allocation59_spill] sm:$0xff]  ;;  %v1564_v4 = vadd.f32 %v1556_v32, %v1507_v34  ;;  %v6077_v10 = vld [vmem:[#allocation60_spill] sm:$0xff] }
 0x347   : >>> { %v1925_v61 = vadd.f32 %v1913_v15, %v1868_v50  ;;  %v1676_v44 = vadd.f32 %v1674_v56, %v5047_v2  ;;  %v5232_v26 = vadd.f32 %v1662_v7, %v5124_v49  ;;  %1958 = vrot.lane.b32.xlu0 %v1290_v27, %s3276_s14  ;;  %v5235_v46 = vpop.permute.xlu2 %1773  ;;  %v1970_v2 = vsel %vm1960_vm15, %v6075_v12, %v6074_v5  ;;  %v6081_v27 = vld [vmem:[#allocation64_spill] sm:$0xff] }
 0x348   : >>> { %v1557_v49 = vsel %vm1547_vm9, %v4536_v20, %v6061_v11  ;;  %v1670_v3 = vsel %vm1661_vm11, %v6045_v8, %v6064_v1  ;;  %v1743_v31 = vsel %vm1732_vm12, %v6077_v10, %v6050_v33  ;;  %v975_v11 = vpop.f32.mrf.mxu3  ;;  %v1621_v38 = vadd.f32 %v1613_v57, %v1564_v4  ;;  %v6080_v1 = vld [vmem:[#allocation57_spill] sm:$0xff]  ;;  %v6085_v57 = vld [vmem:[#allocation70_spill] sm:$0xff] }
 0x349   : >>> { %v1982_v40 = vadd.f32 %v1970_v2, %v1925_v61  ;;  %v1690_v36 = vadd.f32 %v1676_v44, %v6076_v16  ;;  %v1656_v14 = vpop.permute.xlu0 %1655  ;;  %v1614_v33 = vsel %vm1604_vm10, %v4517_v42, %v6062_v6  ;;  %v1800_v35 = vsel %vm1789_vm13, %v6080_v1, %v6052_v62  ;;  %v6083_v62 = vld [vmem:[#allocation72_spill] sm:$0xff]  ;;  %v1293_v2 = vpop.f32.mrf.mxu2  ;;  %v6087_v16 = vld [vmem:[#allocation77_spill] sm:$0xff] }
 0x34a   : >>> { %v1663_v20 = vsel %vm1661_vm11, %v1656_v14, %v5135_v63  ;;  %v6082_v63 = vld [vmem:[#allocation55_spill] sm:$0xff]  ;;  %v1186_v34 = vpop.f32.mrf.mxu1  ;;  %v1571_v0 = vadd.f32 %v1557_v49, %v1514_v18  ;;  %v1671_v42 = vsel %vm1661_vm11, %v4625_v30, %v6063_v24  ;;  %v1857_v6 = vsel %vm1846_vm14, %v6083_v62, %v6054_v53  ;;  %v6084_v24 = vld [vmem:[#allocation76_spill] sm:$0xff] }
 0x34b   : >>> { %v1747_v52 = vadd.f32 %v1743_v31, %v1690_v36  ;;  %v5266_v55 = vadd.f32 %v1663_v20, %v1632_v43  ;;  %1954 = vrot.lane.b32.xlu1 %v1183_v58, %s3276_s14  ;;  %v2039_v8 = vadd.f32 %v2027_v17, %v1982_v40  ;;  %v2084_v23 = vsel %vm2074_vm1, %v6082_v63, %v6081_v27  ;;  %v1079_v43 = vpop.f32.mrf.mxu0  ;;  %v6088_v17 = vld [vmem:[#allocation65_spill] sm:$0xff] }
 0x34c   : >>> { %v1678_v58 = vadd.f32 %v1670_v3, %v1621_v38  ;;  %v1628_v56 = vadd.f32 %v1614_v33, %v1571_v0  ;;  %v1912_v53 = vsel %vm1903_vm0, %v6085_v57, %v6084_v24  ;;  %v1796_v20 = vsel %vm1789_vm13, %v6088_v17, %v5235_v46  ;;  %v6090_v33 = vld [vmem:[#allocation52_spill] sm:$0xff] }
 0x34d   : >>> { %v1804_v50 = vadd.f32 %v1800_v35, %v1747_v52  ;;  %v1652_v28 = vpop.permute.xlu1 %1651  ;;  %2003 = vrot.lane.b32.xlu2 %v975_v11, %s3278_s17  ;;  %v5282_v32 = vadd.f32 %v2084_v23, %v2039_v8  ;;  %v6089_v11 = vld [vmem:[#allocation27_spill] sm:$0xff]  ;;  %v3288_v0 = vmov 0  }
 0x34e   : >>> { %v1665_v15 = vsel %vm1661_vm11, %v1652_v28, %v1656_v14  ;;  %v1667_v7 = vsel %vm1661_vm11, %v5094_v45, %v1652_v28  ;;  %v1685_v4 = vadd.f32 %v1671_v42, %v1628_v56  ;;  %v6086_v45 = vld [vmem:[#allocation22_spill] sm:$0xff]  ;;  %3013 = vset.pattern.permute.xlu2 %v3288_v0  ;;  %3014 = vset.pattern.permute.xlu0 %v3288_v0 }
 0x34f   : >>> { %v1861_v61 = vadd.f32 %v1857_v6, %v1804_v50  ;;  %v1687_v44 = vadd.f32 %v1667_v7, %v5102_v39  ;;  %v1688_v18 = vadd.f32 %v1665_v15, %v5161_v9  ;;  %2005 = vrot.lane.b32.xlu0 %v1079_v43, %s3278_s17  ;;  %v5300_v30 = vpop.permute.xlu2 %1726  ;;  %v1692_v40 = vadd.f32 %v1678_v58, %v6086_v45  ;;  %v6091_v50 = vld [vmem:[#allocation80_spill] sm:$0xff] }
 0x350   : >>> { %v1693_v39 = vadd.f32 %v5132_v29, %v6087_v16  ;;  %v978_v29 = vpop.f32.mrf.mxu3  ;;  %v1699_v38 = vadd.f32 %v1685_v4, %v6089_v11  ;;  %v1696_v28 = vadd.f32 %v5232_v26, %v6091_v50  ;;  %v6093_v26 = vld [vmem:[#allocation81_spill] sm:$0xff] }
 0x351   : >>> { %v5306_v49 = vadd.f32 %v1912_v53, %v1861_v61  ;;  %v1717_v36 = vpop.permute.xlu0 %1716  ;;  %v1296_v6 = vpop.f32.mrf.mxu2  ;;  %v6092_v61 = vld [vmem:[#allocation79_spill] sm:$0xff] }
 0x352   : >>> { %v1737_v9 = vsel %vm1732_vm12, %v1717_v36, %v5164_v22  ;;  %v1739_v14 = vsel %vm1732_vm12, %v6049_v51, %v1717_v36  ;;  %v1189_v35 = vpop.f32.mrf.mxu1  ;;  %v1694_v53 = vadd.f32 %v5199_v41, %v6092_v61  ;;  %v6094_v36 = vld [vmem:[#allocation78_spill] sm:$0xff] }
 0x353   : >>> { %v1749_v3 = vadd.f32 %v1739_v14, %v1692_v40  ;;  %v5317_v31 = vadd.f32 %v1737_v9, %v1693_v39  ;;  %2013 = vrot.lane.b32.xlu1 %v1293_v2, %s3278_s17  ;;  %v1082_v58 = vpop.f32.mrf.mxu0  ;;  %v1695_v2 = vadd.f32 %v5201_v37, %v6093_v26  ;;  %v1700_v37 = vadd.f32 %v5109_v54, %v6094_v36  ;;  %v6095_v9 = vld [vmem:[#allocation82_spill] sm:$0xff] }
 0x354   : >>> { %v1701_v14 = vadd.f32 %v1687_v44, %v6095_v9  ;;  %v289_v36 = vld [vmem:[%s288_s8] sm:$0xff] }
 0x355   : >>> { %v1719_v52 = vpop.permute.xlu1 %1718  ;;  %2009 = vrot.lane.b32.xlu2 %v1186_v34, %s3278_s17  ;;  %v5326_v8 = vadd.f32 %v1796_v20, %v1749_v3 }
 0x356   : >>> { %v1740_v51 = vsel %vm1732_vm12, %v6090_v33, %v1719_v52  ;;  %v6096_v33 = vld [vmem:[#allocation84_spill] sm:$0xff] }
 0x357   : >>> { %v1756_v23 = vadd.f32 %v1740_v51, %v1699_v38  ;;  %2058 = vrot.lane.b32.xlu0 %v978_v29, %s3280_s19  ;;  %v5332_v43 = vpop.permute.xlu2 %1785  ;;  %v1702_v51 = vadd.f32 %v1688_v18, %v6096_v33  ;;  %v6101_v33 = vld [vmem:[#allocation19_spill] sm:$0xff] }
 0x358   : >>> { %v1802_v7 = vsel %vm1789_vm13, %v5332_v43, %v6080_v1  ;;  %v981_v41 = vpop.f32.mrf.mxu3 }
 0x359   : >>> { %v1729_v34 = vpop.permute.xlu0 %1728  ;;  %v1299_v38 = vpop.f32.mrf.mxu2 }
 0x35a   : >>> { %v1745_v42 = vsel %vm1732_vm12, %v1729_v34, %v6077_v10  ;;  %v1192_v39 = vpop.f32.mrf.mxu1 }
 0x35b   : >>> { %v1753_v15 = vadd.f32 %v1745_v42, %v1696_v28  ;;  %2007 = vrot.lane.b32.xlu1 %v1082_v58, %s3278_s17  ;;  %v1085_v20 = vpop.f32.mrf.mxu0 }
 0x35d   : >>> { %v5344_v56 = vadd.f32 %v1802_v7, %v1753_v15  ;;  %v1725_v4 = vpop.permute.xlu1 %1724  ;;  %2015 = vrot.lane.b32.xlu2 %v1296_v6, %s3278_s17 }
 0x35e   : >>> { %v1733_v10 = vsel %vm1732_vm12, %v1725_v4, %v1729_v34  ;;  %v1735_v45 = vsel %vm1732_vm12, %v5164_v22, %v1725_v4  ;;  %v6098_v34 = vld [vmem:[#allocation66_spill] sm:$0xff] }
 0x35f   : >>> { %v1751_v40 = vadd.f32 %v1735_v45, %v1694_v53  ;;  %v1752_v1 = vadd.f32 %v1733_v10, %v1695_v2  ;;  %2011 = vrot.lane.b32.xlu0 %v1189_v35, %s3278_s17  ;;  %v5357_v16 = vpop.permute.xlu2 %1779  ;;  %v6097_v35 = vld [vmem:[#allocation83_spill] sm:$0xff] }
 0x360   : >>> { %v1703_v54 = vadd.f32 %v5266_v55, %v6097_v35 }
 0x361   : >>> { %v1723_v3 = vpop.permute.xlu0 %1722  ;;  %v1302_v10 = vpop.f32.mrf.mxu2 }
 0x362   : >>> { %v1736_v17 = vsel %vm1732_vm12, %v1723_v3, %v5300_v30  ;;  %v1738_v22 = vsel %vm1732_vm12, %v1719_v52, %v1723_v3 }
 0x363   : >>> { %v1757_v29 = vadd.f32 %v1738_v22, %v1700_v37  ;;  %v1758_v11 = vadd.f32 %v1736_v17, %v1701_v14  ;;  %2060 = vrot.lane.b32.xlu1 %v981_v41, %s3280_s19  ;;  %v1088_v61 = vpop.f32.mrf.mxu0  ;;  %v6100_v14 = vld [vmem:[#allocation62_spill] sm:$0xff] }
 0x365   : >>> { %v1731_v44 = vpop.permute.xlu1 %1730  ;;  %2062 = vrot.lane.b32.xlu2 %v1085_v20, %s3280_s19 }
 0x366   : >>> { %v1734_v0 = vsel %vm1732_vm12, %v5300_v30, %v1731_v44  ;;  %v1746_v52 = vsel %vm1732_vm12, %v1731_v44, %v6069_v60  ;;  %v1195_v30 = vpop.f32.mrf.mxu1  ;;  %v6099_v60 = vld [vmem:[#allocation74_spill] sm:$0xff] }
 0x367   : >>> { %v1759_v58 = vadd.f32 %v1734_v0, %v1702_v51  ;;  %v1760_v50 = vadd.f32 %v1746_v52, %v1703_v54  ;;  %2070 = vrot.lane.b32.xlu0 %v1299_v38, %s3280_s19  ;;  %v5379_v18 = vpop.permute.xlu2 %1832  ;;  %v1915_v51 = vsel %vm1903_vm0, %v6101_v33, %v6073_v13  ;;  %v6103_v13 = vld [vmem:[#allocation28_spill] sm:$0xff] }
 0x368   : >>> { %v1854_v7 = vsel %vm1846_vm14, %v6099_v60, %v5379_v18 }
 0x369   : >>> { %v1776_v28 = vpop.permute.xlu0 %1775 }
 0x36a   : >>> { %v1795_v55 = vsel %vm1789_vm13, %v1776_v28, %v5357_v16  ;;  %v1797_v42 = vsel %vm1789_vm13, %v6098_v34, %v1776_v28 }
 0x36b   : >>> { %v1813_v6 = vadd.f32 %v1797_v42, %v1756_v23  ;;  %v5387_v15 = vadd.f32 %v1795_v55, %v1757_v29  ;;  %2066 = vrot.lane.b32.xlu1 %v1192_v39, %s3280_s19  ;;  %v2029_v55 = vsel %vm2017_vm2, %v6103_v13, %v6079_v48 }
 0x36d   : >>> { %v5395_v53 = vadd.f32 %v1854_v7, %v1813_v6  ;;  %v1778_v26 = vpop.permute.xlu1 %1777  ;;  %2068 = vrot.lane.b32.xlu2 %v1195_v30, %s3280_s19  ;;  %v6104_v30 = vld [vmem:[#allocation36_spill] sm:$0xff] }
 0x36e   : >>> { %v1794_v23 = vsel %vm1789_vm13, %v5235_v46, %v1778_v26 }
 0x36f   : >>> { %v1807_v2 = vadd.f32 %v1794_v23, %v5317_v31  ;;  %2064 = vrot.lane.b32.xlu0 %v1088_v61, %s3280_s19  ;;  %v1839_v4 = vpop.permute.xlu2 %1838  ;;  %v290_v31 = vld [vmem:[%s288_s8 + $0x8] sm:$0xff] }
 0x371   : >>> { %v1782_v45 = vpop.permute.xlu0 %1781 }
 0x372   : >>> { %v1790_v41 = vsel %vm1789_vm13, %v1782_v45, %v5332_v43  ;;  %v1792_v39 = vsel %vm1789_vm13, %v1778_v26, %v1782_v45 }
 0x373   : >>> { %v1808_v46 = vadd.f32 %v1792_v39, %v1751_v40  ;;  %v1809_v37 = vadd.f32 %v1790_v41, %v1752_v1  ;;  %2072 = vrot.lane.b32.xlu1 %v1302_v10, %s3280_s19  ;;  %v6107_v39 = vld [vmem:[#allocation50_spill] sm:$0xff] }
 0x375   : >>> { %v1831_v9 = vpop.permute.xlu1 %1830  ;;  %2105 = vperm.xlu2 %3013, %v289_v36  }
 0x376   : >>> { %v1853_v3 = vsel %vm1846_vm14, %v6100_v14, %v1831_v9 }
 0x377   : >>> { %v1863_v17 = vadd.f32 %v1853_v3, %v5326_v8  ;;  %2110 = vperm.xlu0 %3014, %v290_v31   ;;  %v1845_v22 = vpop.permute.xlu2 %1844 }
 0x378   : >>> { %v1860_v1 = vsel %vm1846_vm14, %v1845_v22, %v6071_v21  ;;  %v6102_v21 = vld [vmem:[#allocation29_spill] sm:$0xff] }
 0x379   : >>> { %v1788_v43 = vpop.permute.xlu0 %1787  ;;  %v1972_v52 = vsel %vm1960_vm15, %v6102_v21, %v6075_v12  ;;  %v2086_v12 = vsel %vm2074_vm1, %v6104_v30, %v6082_v63 }
 0x37a   : >>> { %v1803_v20 = vsel %vm1789_vm13, %v1788_v43, %v6070_v19 }
 0x37b   : >>> { %v1817_v40 = vadd.f32 %v1803_v20, %v1760_v50 }
 0x37d   : >>> { %v1874_v29 = vadd.f32 %v1860_v1, %v1817_v40  ;;  %v1784_v38 = vpop.permute.xlu1 %1783 }
 0x37e   : >>> { %v1791_v8 = vsel %vm1789_vm13, %v1784_v38, %v1788_v43  ;;  %v1793_v35 = vsel %vm1789_vm13, %v5357_v16, %v1784_v38 }
 0x37f   : >>> { %v1931_v19 = vadd.f32 %v1915_v51, %v1874_v29  ;;  %v1815_v54 = vadd.f32 %v1793_v35, %v1758_v11  ;;  %v1816_v44 = vadd.f32 %v1791_v8, %v1759_v58  ;;  %v1892_v0 = vpop.permute.xlu2 %1891 }
 0x381   : >>> { %v1988_v50 = vadd.f32 %v1972_v52, %v1931_v19  ;;  %v1835_v28 = vpop.permute.xlu0 %1834 }
 0x382   : >>> { %v1849_v34 = vsel %vm1846_vm14, %v1835_v28, %v1839_v4  ;;  %v1851_v16 = vsel %vm1846_vm14, %v1831_v9, %v1835_v28 }
 0x383   : >>> { %v2045_v11 = vadd.f32 %v2029_v55, %v1988_v50  ;;  %v1864_v58 = vadd.f32 %v1851_v16, %v1807_v2  ;;  %v1865_v42 = vadd.f32 %v1849_v34, %v1808_v46  ;;  %v6106_v2 = vld [vmem:[#allocation75_spill] sm:$0xff]  ;;  %v6108_v46 = vld [vmem:[#allocation58_spill] sm:$0xff] }
 0x384   : >>> { %v1914_v10 = vsel %vm1903_vm0, %v6106_v2, %v6085_v57 }
 0x385   : >>> { %v5447_v6 = vadd.f32 %v2086_v12, %v2045_v11  ;;  %v1843_v60 = vpop.permute.xlu1 %1842 }
 0x386   : >>> { %v1847_v48 = vsel %vm1846_vm14, %v1839_v4, %v1843_v60  ;;  %v1859_v7 = vsel %vm1846_vm14, %v1843_v60, %v6083_v62 }
 0x387   : >>> { %6105 = vst [vmem:[#allocation51_spill] sm:$0xff] %v5447_v6  ;;  %v1866_v61 = vadd.f32 %v1847_v48, %v1809_v37  ;;  %v1867_v26 = vadd.f32 %v1859_v7, %v5344_v56  ;;  %v1945_v23 = vpop.permute.xlu2 %1944 }
 0x388   : >>> { %v1967_v56 = vsel %vm1960_vm15, %v6108_v46, %v1945_v23 }
 0x389   : >>> { %v1924_v63 = vadd.f32 %v1914_v10, %v1867_v26  ;;  %v1888_v45 = vpop.permute.xlu0 %1887  ;;  %v6111_v10 = vld [vmem:[#allocation17_spill] sm:$0xff] }
 0x38a   : >>> { %v1908_v41 = vsel %vm1903_vm0, %v1888_v45, %v1892_v0  ;;  %v1910_v4 = vsel %vm1903_vm0, %v6084_v24, %v1888_v45 }
 0x38b   : >>> { %v1919_v62 = vadd.f32 %v1910_v4, %v6107_v39  ;;  %v1920_v36 = vadd.f32 %v1908_v41, %v1863_v17 }
 0x38d   : >>> { %v1976_v37 = vadd.f32 %v1967_v56, %v1919_v62  ;;  %v1837_v31 = vpop.permute.xlu1 %1836  ;;  %v6113_v56 = vld [vmem:[#allocation33_spill] sm:$0xff] }
 0x38e   : >>> { %v1852_v57 = vsel %vm1846_vm14, %v5379_v18, %v1837_v31 }
 0x38f   : >>> { %v5472_v9 = vadd.f32 %v1852_v57, %v5387_v15  ;;  %v5474_v14 = vpop.permute.xlu2 %1897  ;;  %v6109_v15 = vld [vmem:[#allocation40_spill] sm:$0xff]  ;;  %v6114_v57 = vld [vmem:[#allocation54_spill] sm:$0xff] }
 0x391   : >>> { %v1841_v3 = vpop.permute.xlu0 %1840 }
 0x392   : >>> { %v1848_v24 = vsel %vm1846_vm14, %v1841_v3, %v1845_v22  ;;  %v1850_v17 = vsel %vm1846_vm14, %v1837_v31, %v1841_v3 }
 0x393   : >>> { %v5480_v43 = vadd.f32 %v1850_v17, %v1815_v54  ;;  %v5482_v20 = vadd.f32 %v1848_v24, %v1816_v44 }
 0x395   : >>> { %v1890_v40 = vpop.permute.xlu1 %1889 }
 0x396   : >>> { %v1911_v18 = vsel %vm1903_vm0, %v6072_v25, %v1890_v40 }
 0x397   : >>> { %v5488_v1 = vadd.f32 %v1911_v18, %v6109_v15  ;;  %v5490_v29 = vpop.permute.xlu2 %1956  ;;  %v6115_v18 = vld [vmem:[#allocation69_spill] sm:$0xff] }
 0x399   : >>> { %v1900_v38 = vpop.permute.xlu0 %1899 }
 0x39a   : >>> { %v1916_v22 = vsel %vm1903_vm0, %v1900_v38, %v6106_v2  ;;  %v6110_v2 = vld [vmem:[#allocation41_spill] sm:$0xff] }
 0x39b   : >>> { %v5495_v51 = vadd.f32 %v1916_v22, %v1866_v61  ;;  %v1971_v45 = vsel %vm1960_vm15, %v6111_v10, %v6110_v2 }
 0x39c   : >>> { %v1981_v39 = vadd.f32 %v1971_v45, %v1924_v63 }
 0x39d   : >>> { %v1896_v8 = vpop.permute.xlu1 %1895 }
 0x39e   : >>> { %v1904_v35 = vsel %vm1903_vm0, %v1896_v8, %v1900_v38  ;;  %v1906_v19 = vsel %vm1903_vm0, %v1892_v0, %v1896_v8  ;;  %v6116_v8 = vld [vmem:[#allocation43_spill] sm:$0xff] }
 0x39f   : >>> { %v5501_v25 = vadd.f32 %v1906_v19, %v1864_v58  ;;  %v5503_v54 = vadd.f32 %v1904_v35, %v1865_v42  ;;  %v5505_v44 = vpop.permute.xlu2 %1950  ;;  %v6117_v35 = vld [vmem:[#allocation34_spill] sm:$0xff] }
 0x3a0   : >>> { %v2085_v19 = vsel %vm2074_vm1, %v6117_v35, %v6116_v8 }
 0x3a1   : >>> { %v5507_v52 = vpop.permute.xlu0 %1893 }
 0x3a2   : >>> { %v1909_v50 = vsel %vm1903_vm0, %v1890_v40, %v5507_v52 }
 0x3a3   : >>> { %v5513_v28 = vadd.f32 %v1909_v50, %v5395_v53  ;;  %v2083_v50 = vsel %vm2074_vm1, %v6116_v8, %v6115_v18 }
 0x3a5   : >>> { %v5515_v55 = vpop.permute.xlu1 %1901 }
 0x3a7   : >>> { %v5517_v34 = vpop.permute.xlu2 %2003 }
 0x3a9   : >>> { %v5519_v0 = vpop.permute.xlu0 %1946 }
 0x3ad   : >>> { %v1949_v16 = vpop.permute.xlu1 %1948 }
 0x3ae   : >>> { %v1965_v11 = vsel %vm1960_vm15, %v1945_v23, %v1949_v16  ;;  %v1969_v23 = vsel %vm1960_vm15, %v6110_v2, %v6108_v46 }
 0x3af   : >>> { %v1977_v58 = vadd.f32 %v1965_v11, %v1920_v36  ;;  %v5523_v42 = vpop.permute.xlu2 %2009  ;;  %v1975_v4 = vadd.f32 %v1969_v23, %v5306_v49  ;;  %v6112_v36 = vld [vmem:[#allocation45_spill] sm:$0xff] }
 0x3b0   : >>> { %v2028_v31 = vsel %vm2017_vm2, %v6113_v56, %v6112_v36  ;;  %v2026_v3 = vsel %vm2017_vm2, %v6112_v36, %v6114_v57 }
 0x3b1   : >>> { %v1953_v12 = vpop.permute.xlu0 %1952  ;;  %v2038_v24 = vadd.f32 %v2028_v31, %v1981_v39  ;;  %v2032_v17 = vadd.f32 %v2026_v3, %v1975_v4  ;;  %v6118_v4 = vld [vmem:[#allocation2_spill] sm:$0xff] }
 0x3b2   : >>> { %v6119_v39 = vmov %v6118_v4  ;;  %v2142_v36 = vperm.slane %v6118_v4, 0  ;;  %v1961_v4 = vsel %vm1960_vm15, %v1953_v12, %v5490_v29 }
 0x3b3   : >>> { %v2089_v23 = vadd.f32 %v2083_v50, %v2032_v17 }
 0x3b5   : >>> { %v2002_v60 = vpop.permute.xlu1 %2001 }
 0x3b6   : >>> { %v2024_v46 = vsel %vm2017_vm2, %v6114_v57, %v2002_v60 }
 0x3b7   : >>> { %v5525_v48 = vpop.permute.xlu2 %2015  ;;  %v2033_v38 = vadd.f32 %v2024_v46, %v1976_v37  ;;  %v2143_v37 = vperm.slane %v6119_v39, 1 }
 0x3b9   : >>> { %v5527_v7 = vpop.permute.xlu0 %1958 }
 0x3bd   : >>> { %v5529_v53 = vpop.permute.xlu1 %1954 }
 0x3bf   : >>> { %v5531_v61 = vpop.permute.xlu2 %2062 }
 0x3c1   : >>> { %v2006_v26 = vpop.permute.xlu0 %2005 }
 0x3c2   : >>> { %v2022_v49 = vsel %vm2017_vm2, %v2002_v60, %v2006_v26  ;;  %v2095_v60 = vadd.f32 %v2085_v19, %v2038_v24 }
 0x3c3   : >>> { %v2034_v22 = vadd.f32 %v2022_v49, %v1977_v58 }
 0x3c5   : >>> { %v2014_v41 = vpop.permute.xlu1 %2013 }
 0x3c7   : >>> { %v5542_v62 = vpop.permute.xlu2 %2068 }
 0x3c9   : >>> { %v2059_v63 = vpop.permute.xlu0 %2058 }
 0x3ca   : >>> { %v2079_v40 = vsel %vm2074_vm1, %v2059_v63, %v5531_v61  ;;  %v2081_v15 = vsel %vm2074_vm1, %v6115_v18, %v2059_v63  ;;  %v2144_v63 = vperm.slane %v6119_v39, 2  ;;  %v2148_v18 = vperm.slane %v6119_v39, 6 }
 0x3cb   : >>> { %v2090_v2 = vadd.f32 %v2081_v15, %v2033_v38  ;;  %v2091_v45 = vadd.f32 %v2079_v40, %v2034_v22 }
 0x3cd   : >>> { %v5571_v11 = vpop.permute.xlu1 %2007 }
 0x3cf   : >>> { %v2106_v58 = vpop.permute.xlu2 %2105 }
 0x3d0   : >>> { %v2113_v31 = vadd.f32 %v2106_v58, %v2089_v23  ;;  %v2114_v57 = vadd.f32 %v2106_v58, %v2090_v2  ;;  %v2115_v3 = vadd.f32 %v2106_v58, %v2091_v45  ;;  %v2119_v46 = vadd.f32 %v2106_v58, %v2095_v60 }
 0x3d1   : >>> { %v2012_v49 = vpop.permute.xlu0 %2011  ;;  %v1973_v2 = vsel %vm1960_vm15, %v5490_v29, %v6111_v10  ;;  %v2030_v45 = vsel %vm2017_vm2, %v2014_v41, %v6113_v56  ;;  %v1907_v23 = vsel %vm1903_vm0, %v5507_v52, %v5474_v14  ;;  %v1905_v10 = vsel %vm1903_vm0, %v5474_v14, %v5515_v55 }
 0x3d2   : >>> { %v2127_v8 = vmax.f32 %v2113_v31, 0.0  ;;  %v2128_v6 = vmax.f32 %v2114_v57, 0.0  ;;  %v2129_v24 = vmax.f32 %v2115_v3, 0.0  ;;  %v2133_v15 = vmax.f32 %v2119_v46, 0.0 }
 0x3d3   : >>> { %v1963_v31 = vsel %vm1960_vm15, %v1949_v16, %v1953_v12  ;;  %v1928_v52 = vadd.f32 %v1907_v23, %v5472_v9  ;;  %v2020_v29 = vsel %vm2017_vm2, %v2006_v26, %v5523_v42  ;;  %v2018_v16 = vsel %vm2017_vm2, %v5523_v42, %v2014_v41 }
 0x3d4   : >>> { %v5579_v17 = vmul.f32 %v2142_v36, %v2127_v8   ;;  %v5583_v38 = vmul.f32 %v2143_v37, %v2128_v6   ;;  %v5587_v22 = vmul.f32 %v2144_v63, %v2129_v24   ;;  %v1980_v6 = vadd.f32 %v1973_v2, %v5495_v51 }
 0x3d5   : >>> { %v2061_v19 = vpop.permute.xlu1 %2060  ;;  %v1917_v51 = vsel %vm1903_vm0, %v5515_v55, %v6101_v33  ;;  %v1968_v33 = vsel %vm1960_vm15, %v6074_v5, %v5519_v0  ;;  %v1978_v55 = vadd.f32 %v1963_v31, %v5501_v25  ;;  %v1979_v9 = vadd.f32 %v1961_v4, %v5503_v54 }
 0x3d6   : >>> { %v6120_v40 = vmov %v5579_v17  ;;  %v6121_v50 = vmov %v5587_v22  ;;  %v5591_v22 = vmul.f32 %v2148_v18, %v2133_v15   ;;  %v2037_v56 = vadd.f32 %v2030_v45, %v1980_v6 }
 0x3d7   : >>> { %v1929_v26 = vadd.f32 %v1905_v10, %v5480_v43  ;;  %v1930_v3 = vadd.f32 %v1917_v51, %v5482_v20  ;;  %v2025_v42 = vsel %vm2017_vm2, %v6078_v59, %v5517_v34  ;;  %v2147_v41 = vperm.slane %v6119_v39, 5 }
 0x3d8   : >>> { %v6122_v60 = vmov %v5591_v22  ;;  %v1974_v5 = vsel %vm1960_vm15, %v5527_v7, %v6102_v21  ;;  %v2035_v25 = vadd.f32 %v2020_v29, %v1978_v55  ;;  %v1966_v43 = vsel %vm1960_vm15, %v5519_v0, %v5505_v44 }
 0x3d9   : >>> { %v2071_v57 = vpop.permute.xlu0 %2070  ;;  %v1983_v20 = vadd.f32 %v1968_v33, %v5488_v1  ;;  %v1962_v21 = vsel %vm1960_vm15, %v5529_v53, %v5527_v7  ;;  %v1987_v22 = vadd.f32 %v1974_v5, %v1930_v3  ;;  %v1964_v1 = vsel %vm1960_vm15, %v5505_v44, %v5529_v53 }
 0x3da   : >>> { %v2087_v14 = vsel %vm2074_vm1, %v2071_v57, %v6117_v35  ;;  %v2036_v35 = vadd.f32 %v2018_v16, %v1979_v9  ;;  %v2145_v0 = vperm.slane %v6119_v39, 3  ;;  %v2146_v2 = vperm.slane %v6119_v39, 4 }
 0x3db   : >>> { %v2094_v12 = vadd.f32 %v2087_v14, %v2037_v56  ;;  %v1984_v31 = vadd.f32 %v1966_v43, %v5513_v28  ;;  %v2040_v10 = vadd.f32 %v2025_v42, %v1983_v20  ;;  %v2031_v44 = vsel %vm2017_vm2, %v5525_v48, %v6103_v13  ;;  %v6124_v43 = vld [vmem:[#allocation51_spill] sm:$0xff] }
 0x3dc   : >>> { %v1986_v53 = vadd.f32 %v1962_v21, %v1929_v26  ;;  %v2023_v51 = vsel %vm2017_vm2, %v5517_v34, %v5571_v11  ;;  %v1985_v28 = vadd.f32 %v1964_v1, %v1928_v52  ;;  %v2082_v16 = vsel %vm2074_vm1, %v6081_v27, %v2061_v19 }
 0x3dd   : >>> { %v2118_v54 = vadd.f32 %v2106_v58, %v2094_v12  ;;  %v2067_v46 = vpop.permute.xlu1 %2066  ;;  %v2097_v12 = vadd.f32 %v2082_v16, %v2040_v10  ;;  %v6144_v10 = vld [vmem:[#allocation12_spill] sm:$0xff] (%p5711_p4) }
 0x3de   : >>> { %v2075_v59 = vsel %vm2074_vm1, %v2067_v46, %v2071_v57  ;;  %v2077_v8 = vsel %vm2074_vm1, %v5531_v61, %v2067_v46  ;;  %v2019_v61 = vsel %vm2017_vm2, %v2012_v49, %v5525_v48  ;;  %v2044_v57 = vadd.f32 %v2031_v44, %v1987_v22 }
 0x3df   : >>> { %v2132_v24 = vmax.f32 %v2118_v54, 0.0  ;;  %v2092_v15 = vadd.f32 %v2077_v8, %v2035_v25  ;;  %v2093_v17 = vadd.f32 %v2075_v59, %v2036_v35  ;;  %v2043_v29 = vadd.f32 %v2019_v61, %v1986_v53 }
 0x3e0   : >>> { %v6133_v22 = vmov %v6122_v60 }
 0x3e1   : >>> { %v5670_v23 = vmul.f32 %v2147_v41, %v2132_v24   ;;  %v2116_v45 = vadd.f32 %v2106_v58, %v2092_v15  ;;  %v2117_v6 = vadd.f32 %v2106_v58, %v2093_v17  ;;  %v2065_v4 = vpop.permute.xlu0 %2064 }
 0x3e2   : >>> { %v2078_v14 = vsel %vm2074_vm1, %v2065_v4, %v5542_v62  ;;  %v2080_v34 = vsel %vm2074_vm1, %v2061_v19, %v2065_v4 }
 0x3e3   : >>> { %v6123_v7 = vmov %v5670_v23  ;;  %v2021_v23 = vsel %vm2017_vm2, %v5571_v11, %v2012_v49  ;;  %v2130_v58 = vmax.f32 %v2116_v45, 0.0  ;;  %v2131_v56 = vmax.f32 %v2117_v6, 0.0 }
 0x3e4   : >>> { %v2041_v11 = vadd.f32 %v2023_v51, %v1984_v31  ;;  %v2042_v49 = vadd.f32 %v2021_v23, %v1985_v28  ;;  %v6134_v23 = vmov %v6123_v7  ;;  %v6139_v28 = vmov %v6120_v40 }
 0x3e5   : >>> { %v2159_v13 = vmul.f32 %v2145_v0, %v2130_v58   ;;  %v2160_v48 = vmul.f32 %v2146_v2, %v2131_v56   ;;  %v2073_v33 = vpop.permute.xlu1 %2072  ;;  %v6145_v58 = vld [vmem:[#allocation11_spill] sm:$0xff] (%p5711_p4) }
 0x3e6   : >>> { %v2076_v52 = vsel %vm2074_vm1, %v5542_v62, %v2073_v33  ;;  %v2088_v27 = vsel %vm2074_vm1, %v2073_v33, %v6104_v30  ;;  %v2098_v26 = vadd.f32 %v2080_v34, %v2041_v11  ;;  %v2099_v3 = vadd.f32 %v2078_v14, %v2042_v49  ;;  %v6152_v14 = vld [vmem:[#allocation4_spill] sm:$0xff] (%p5711_p4) }
 0x3e7   : >>> { %v2100_v55 = vadd.f32 %v2076_v52, %v2043_v29  ;;  %v2101_v9 = vadd.f32 %v2088_v27, %v2044_v57  ;;  %v6138_v27 = vmov %v5583_v38  ;;  %v2174_v51 = vadd.f32 (%p5711_p4), %v6144_v10, %v2160_v48   ;;  %v6146_v57 = vld [vmem:[#allocation10_spill] sm:$0xff] (%p5711_p4)  ;;  %v6147_v29 = vld [vmem:[#allocation9_spill] sm:$0xff] (%p5711_p4) }
 0x3e8   : >> { %v2175_v56 = vadd.f32 (%p5711_p4), %v6145_v58, %v6123_v7   ;;  %v2176_v28 = vadd.f32 (%p5711_p4), %v6146_v57, %v6122_v60  }
 0x3e9   : >>> { %v2111_v42 = vpop.permute.xlu0 %2110 }
 0x3ea   : >>> { %v2120_v5 = vadd.f32 %v2111_v42, %v5282_v32  ;;  %v2121_v19 = vadd.f32 %v2111_v42, %v2097_v12  ;;  %v2122_v25 = vadd.f32 %v2111_v42, %v2098_v26  ;;  %v2123_v35 = vadd.f32 %v2111_v42, %v2099_v3 }
 0x3eb   : >>> { %v2124_v54 = vadd.f32 %v2111_v42, %v2100_v55  ;;  %v2125_v46 = vadd.f32 %v2111_v42, %v2101_v9  ;;  %v2126_v20 = vadd.f32 %v2111_v42, %v6124_v43  ;;  %v6137_v26 = vmov %v6121_v50 }
 0x3ec   : >>> { %v2134_v62 = vmax.f32 %v2120_v5, 0.0  ;;  %v2135_v59 = vmax.f32 %v2121_v19, 0.0  ;;  %v2136_v8 = vmax.f32 %v2122_v25, 0.0  ;;  %v2137_v47 = vmax.f32 %v2123_v35, 0.0 }
 0x3ed   : >>> { %v2138_v30 = vmax.f32 %v2124_v54, 0.0  ;;  %v2139_v21 = vmax.f32 %v2125_v46, 0.0  ;;  %v2140_v24 = vmax.f32 %v2126_v20, 0.0  ;;  %v6136_v25 = vmov %v2159_v13  ;;  %237 = sbr.rel (!%p5711_p4) target bundleno = 36 (0x24), region = 82 }
 0x3ee   : >>> { %v2163_v1 = vmul.f32 %v2142_v36, %v2134_v62   ;;  %v2164_v32 = vmul.f32 %v2143_v37, %v2135_v59   ;;  %v2165_v61 = vmul.f32 %v2144_v63, %v2136_v8   ;;  %v2166_v45 = vmul.f32 %v2145_v0, %v2137_v47   ;;  %v6140_v36 = vld [vmem:[#allocation16_spill] sm:$0xff] (%p5711_p4)  ;;  %v6141_v63 = vld [vmem:[#allocation15_spill] sm:$0xff] (%p5711_p4)  ;;  %v6142_v0 = vld [vmem:[#allocation14_spill] sm:$0xff] (%p5711_p4) }
 0x3ef   : >>> { %v2167_v6 = vmul.f32 %v2146_v2, %v2138_v30   ;;  %v2168_v4 = vmul.f32 %v2147_v41, %v2139_v21   ;;  %v2169_v31 = vmul.f32 %v2148_v18, %v2140_v24   ;;  %v6135_v24 = vmov %v2160_v48  ;;  %v6143_v2 = vld [vmem:[#allocation13_spill] sm:$0xff] (%p5711_p4) }
 0x3f0   : >>> { %v6129_v18 = vmov %v2166_v45  ;;  %v6130_v19 = vmov %v2165_v61  ;;  %v6131_v20 = vmov %v2164_v32  ;;  %v6132_v21 = vmov %v2163_v1 }
 0x3f1   : >>> { %v6126_v15 = vmov %v2169_v31  ;;  %v6127_v16 = vmov %v2168_v4  ;;  %v6128_v17 = vmov %v2167_v6  ;;  %v2170_v37 = vadd.f32 (%p5711_p4), %v6140_v36, %v6120_v40  }
 0x3f2   : >> { %v2171_v41 = vadd.f32 %v6141_v63, %v5583_v38   ;;  %v2172_v44 = vadd.f32 %v6142_v0, %v6121_v50   ;;  %v2173_v53 = vadd.f32 %v6143_v2, %v2159_v13   ;;  %v2177_v18 = vadd.f32 %v6147_v29, %v2163_v1   ;;  %v6148_v15 = vld [vmem:[#allocation8_spill] sm:$0xff]  ;;  %v6149_v17 = vld [vmem:[#allocation7_spill] sm:$0xff]  ;;  %v6150_v38 = vld [vmem:[#allocation6_spill] sm:$0xff]  ;;  %2188 = vst [vmem:[%s3333_s25 + $0x20] sm:$0xff] (%p5772_p5), %v2174_v51 }
 0x3f3   : >> { %v2178_v40 = vadd.f32 %v6148_v15, %v2164_v32   ;;  %v2179_v22 = vadd.f32 %v6149_v17, %v2165_v61   ;;  %v2180_v23 = vadd.f32 %v6150_v38, %v2166_v45   ;;  %v6151_v16 = vld [vmem:[#allocation5_spill] sm:$0xff]  ;;  %v2182_v34 = vadd.f32 %v6152_v14, %v2168_v4   ;;  %v6153_v13 = vld [vmem:[#allocation3_spill] sm:$0xff]  ;;  %217 = sbr.rel (!%p5772_p5) target bundleno = 22 (0x16), region = 93  ;;  %2184 = vst [vmem:[%s3333_s25] sm:$0xff] (%p5772_p5), %v2170_v37 }
 0x3f4   : >> { %v2181_v50 = vadd.f32 %v6151_v16, %v2167_v6   ;;  %v2183_v48 = vadd.f32 %v6153_v13, %v2169_v31   ;;  %v6161_v8 = vmov %v2177_v18  ;;  %v6162_v7 = vmov %v2176_v28  ;;  %2185 = vst [vmem:[%s3333_s25 + $0x8] sm:$0xff] (%p5772_p5), %v2171_v41 }
 0x3f5   : >> { %v6156_v13 = vmov %v2182_v34  ;;  %v6158_v11 = vmov %v2180_v23  ;;  %v6159_v10 = vmov %v2179_v22  ;;  %v6160_v9 = vmov %v2178_v40  ;;  %2186 = vst [vmem:[%s3333_s25 + $0x10] sm:$0xff] (%p5772_p5), %v2172_v44 }
 0x3f6   : >> { %v6155_v14 = vmov %v2183_v48  ;;  %v6157_v12 = vmov %v2181_v50  ;;  %v6163_v6 = vmov %v2175_v56  ;;  %v6164_v5 = vmov %v2174_v51  ;;  %2187 = vst [vmem:[%s3333_s25 + $0x18] sm:$0xff] (%p5772_p5), %v2173_v53 }
 0x3f7   : >> { %v6165_v4 = vmov %v2173_v53  ;;  %v6166_v3 = vmov %v2172_v44  ;;  %v6167_v2 = vmov %v2171_v41  ;;  %v6168_v1 = vmov %v2170_v37  ;;  %2189 = vst [vmem:[%s3333_s25 + $0x28] sm:$0xff] (%p5772_p5), %v2175_v56 }
 0x3f8   : > { %2190 = vst [vmem:[%s3333_s25 + $0x30] sm:$0xff] %v2176_v28 }
 0x3f9   : > { %2191 = vst [vmem:[%s3333_s25 + $0x38] sm:$0xff] %v2177_v18 }
 0x3fa   : > { %2192 = vst [vmem:[%s3333_s25 + $0x40] sm:$0xff] %v2178_v40 }
 0x3fb   : > { %2193 = vst [vmem:[%s3333_s25 + $0x48] sm:$0xff] %v2179_v22 }
 0x3fc   : > { %2194 = vst [vmem:[%s3333_s25 + $0x50] sm:$0xff] %v2180_v23 }
 0x3fd   : > { %2195 = vst [vmem:[%s3333_s25 + $0x58] sm:$0xff] %v2181_v50 }
 0x3fe   : > { %2196 = vst [vmem:[%s3333_s25 + $0x60] sm:$0xff] %v2182_v34 }
 0x3ff   : > { %2197 = vst [vmem:[%s3333_s25 + $0x68] sm:$0xff] %v2183_v48 }
 0x400 PF: > { %s14_s15 = sadd.s32 1, %s3148_s15  }
 0x401   : > { %p11_p6 = scmp.ge.s32.totalorder %s14_s15, 4  }
 0x403   :  { %13 = sbr.rel (!%p11_p6) target bundleno = 1 (0x1), region = 104 }

</bundles_post_ra>
